<compile_context>
chip_gen: v7x
topology: tpu7x:2x2x1
jax: 0.10.0
libtpu: 0.0.40
codegen_flags: <defaults>
</compile_context>

<pallas_src>
import jax
import jax.numpy as jnp
from jax.experimental import pallas as pl
from jax.experimental.pallas import tpu as pltpu

EPS = 1e-5


def _bn_relu_conv1x1_kernel(x_ref, gb_ref, w_ref, o_ref):
    # x_ref:  (Cin, M)   f32   channels on sublanes, flattened spatial on lanes
    # gb_ref: (8, Cin)   f32   row 0 = gamma, row 1 = beta, rows 2-7 zero padding
    # w_ref:  (Cout, Cin) bf16 conv weight (pre-cast once at init)
    # o_ref:  (Cout, M)  f32
    x = x_ref[...]                                           # (Cin, M) f32
    m = x.shape[1]
    inv_m = 1.0 / m

    # Lane-major packed params -> per-channel columns with one small XLU transpose.
    gbt = jnp.transpose(gb_ref[...])                         # (Cin, 8)
    gamma = gbt[:, 0:1]                                      # (Cin, 1)
    beta = gbt[:, 1:2]                                       # (Cin, 1)

    # One-pass per-channel batch statistics (training-mode BN, biased variance).
    mean = jnp.sum(x, axis=1, keepdims=True) * inv_m         # (Cin, 1)
    ex2 = jnp.sum(x * x, axis=1, keepdims=True) * inv_m      # (Cin, 1)
    var = jnp.maximum(ex2 - mean * mean, 0.0)

    # Fold BN into a single scale/shift, fuse ReLU.  rsqrt runs on the EUP.
    scale = gamma * jax.lax.rsqrt(var + EPS)                 # (Cin, 1)
    shift = beta - mean * scale                              # (Cin, 1)
    y = jnp.maximum(x * scale + shift, 0.0)                  # (Cin, M) f32

    # 1x1 conv == (Cout, Cin) @ (Cin, M) on the MXU; bf16 inputs, f32 accumulate.
    # Kept in this orientation: y's NCHW-derived (Cin, M) layout is already the
    # MXU stationary orientation, so no activation transpose is needed.
    o_ref[...] = jax.lax.dot_general(
        w_ref[...],
        y.astype(jnp.bfloat16),
        dimension_numbers=(((1,), (0,)), ((), ())),
        preferred_element_type=jnp.float32,
    )


def _apply(x_nchw, gb, w2d):
    """Per-call path: one free reshape, one pallas_call, one free reshape."""
    N, C, H, W = x_nchw.shape
    Cout = w2d.shape[0]
    M = N * H * W

    if N == 1:
        # Free reshape: NCHW with N=1 is already (Cin, H*W) in memory.
        x2d = x_nchw.reshape(C, M).astype(jnp.float32)
    else:
        # Fallback (module is N=1): one transpose to group channels first.
        x2d = jnp.transpose(x_nchw.reshape(N, C, H * W), (1, 0, 2)).reshape(C, M)
        x2d = x2d.astype(jnp.float32)

    out2d = pl.pallas_call(
        _bn_relu_conv1x1_kernel,
        out_shape=jax.ShapeDtypeStruct((Cout, M), jnp.float32),
        in_specs=[
            pl.BlockSpec(memory_space=pltpu.MemorySpace.VMEM),
            pl.BlockSpec(memory_space=pltpu.MemorySpace.VMEM),
            pl.BlockSpec(memory_space=pltpu.MemorySpace.VMEM),
        ],
        out_specs=pl.BlockSpec(memory_space=pltpu.MemorySpace.VMEM),
        cost_estimate=pl.CostEstimate(
            flops=2 * M * C * Cout + 10 * M * C,
            transcendentals=C,
            bytes_accessed=M * C * 4 + Cout * C * 2 + 8 * C * 4 + Cout * M * 4,
        ),
    )(x2d, gb, w2d)

    if N == 1:
        return out2d.reshape(1, Cout, H, W)                  # free reshape back to NCHW
    return jnp.transpose(out2d.reshape(Cout, N, H, W), (1, 0, 2, 3))


_apply_jit = jax.jit(_apply)


def make_bn_relu_conv1x1(gamma, beta, w_oihw):
    """One-time parameter preparation, hoisted out of the per-call path."""
    Cout, Cin = w_oihw.shape[0], w_oihw.shape[1]
    # Weight: (Cout, Cin, 1, 1) -> (Cout, Cin) bf16, converted exactly once.
    w2d = jnp.asarray(w_oihw).reshape(Cout, Cin).astype(jnp.bfloat16)
    # Params: lane-major (8, Cin) slab -> one contiguous DMA instead of two
    # 128x-lane-padded (Cin, 1) operands.
    gb = (
        jnp.zeros((8, Cin), jnp.float32)
        .at[0].set(jnp.asarray(gamma, jnp.float32))
        .at[1].set(jnp.asarray(beta, jnp.float32))
    )

    def fn(x_nchw):
        return _apply_jit(x_nchw, gb, w2d)

    return fn


def reference(x_nchw, gamma, beta, w_oihw):
    """Plain-JAX f32 reference (PyTorch training-mode BN -> ReLU -> 1x1 conv)."""
    mean = jnp.mean(x_nchw, axis=(0, 2, 3), keepdims=True)
    var = jnp.mean((x_nchw - mean) ** 2, axis=(0, 2, 3), keepdims=True)
    y = (x_nchw - mean) * jax.lax.rsqrt(var + EPS)
    y = y * gamma.reshape(1, -1, 1, 1) + beta.reshape(1, -1, 1, 1)
    y = jnp.maximum(y, 0.0)
    w = w_oihw[:, :, 0, 0]  # (Cout, Cin)
    return jnp.einsum("nchw,oc->nohw", y, w)


if __name__ == "__main__":
    # Shapes fixed by the module: Cin = 544, Cout = 128; input (1, 544, 7, 7).
    N, Cin, H, W = 1, 544, 7, 7
    Cout = 128

    key = jax.random.PRNGKey(0)
    kx, kw, kg, kb = jax.random.split(key, 4)

    x = jax.random.normal(kx, (N, Cin, H, W), dtype=jnp.float32)
    w = jax.random.normal(kw, (Cout, Cin, 1, 1), dtype=jnp.float32) * 0.05
    gamma = jnp.ones((Cin,), jnp.float32) + 0.01 * jax.random.normal(kg, (Cin,), dtype=jnp.float32)
    beta = jnp.zeros((Cin,), jnp.float32) + 0.01 * jax.random.normal(kb, (Cin,), dtype=jnp.float32)

    # One-time prep (weight bf16 cast + param packing), then the per-call fused kernel.
    fused = make_bn_relu_conv1x1(gamma, beta, w)

    out = jax.block_until_ready(fused(x))
    ref = jax.block_until_ready(reference(x, gamma, beta, w))

    assert out.shape == (N, Cout, H, W), out.shape
    # Tolerance accounts for bf16 MXU inputs (f32 accumulate) vs the f32 reference.
    err = float(jnp.max(jnp.abs(out - ref)))
    assert jnp.allclose(out, ref, atol=1e-2, rtol=1e-2), err

    print("KERNEL_OK")
</pallas_src>

<mosaic_0001>
module attributes {stable_mosaic.version = 11 : i64} {
  func.func @_bn_relu_conv1x1_kernel(%arg0: memref<544x49xf32, #tpu.memory_space<vmem>>, %arg1: memref<8x544xf32, #tpu.memory_space<vmem>>, %arg2: memref<128x544xbf16, #tpu.memory_space<vmem>>, %arg3: memref<128x49xf32, #tpu.memory_space<vmem>>) attributes {dimension_semantics = [], scalar_prefetch = 0 : i64, scratch_operands = 0 : i64, tpu.core_type = #tpu.core_type<tc>} {
    %c0 = arith.constant 0 : index
    %c0_0 = arith.constant 0 : index
    %0 = vector.load %arg0[%c0, %c0_0] : memref<544x49xf32, #tpu.memory_space<vmem>>, vector<544x49xf32>
    %c0_1 = arith.constant 0 : index
    %c0_2 = arith.constant 0 : index
    %1 = vector.load %arg1[%c0_1, %c0_2] : memref<8x544xf32, #tpu.memory_space<vmem>>, vector<8x544xf32>
    %2 = tpu.transpose %1, [1, 0] : vector<8x544xf32> -> vector<544x8xf32>
    %3 = vector.extract_strided_slice %2 {offsets = [0, 0], sizes = [544, 1], strides = [1, 1]} : vector<544x8xf32> to vector<544x1xf32>
    %4 = vector.extract_strided_slice %2 {offsets = [0, 1], sizes = [544, 1], strides = [1, 1]} : vector<544x8xf32> to vector<544x1xf32>
    %cst = arith.constant dense<0.000000e+00> : vector<544xf32>
    %5 = vector.multi_reduction <add>, %0, %cst [1] : vector<544x49xf32> to vector<544xf32>
    %6 = vector.shape_cast %5 : vector<544xf32> to vector<544x1xf32>
    %cst_3 = arith.constant 0.0204081628 : f32
    %7 = vector.broadcast %cst_3 : f32 to vector<544x1xf32>
    %8 = arith.mulf %6, %7 : vector<544x1xf32>
    %9 = arith.mulf %0, %0 : vector<544x49xf32>
    %cst_4 = arith.constant dense<0.000000e+00> : vector<544xf32>
    %10 = vector.multi_reduction <add>, %9, %cst_4 [1] : vector<544x49xf32> to vector<544xf32>
    %11 = vector.shape_cast %10 : vector<544xf32> to vector<544x1xf32>
    %cst_5 = arith.constant 0.0204081628 : f32
    %12 = vector.broadcast %cst_5 : f32 to vector<544x1xf32>
    %13 = arith.mulf %11, %12 : vector<544x1xf32>
    %14 = arith.mulf %8, %8 : vector<544x1xf32>
    %15 = arith.subf %13, %14 : vector<544x1xf32>
    %cst_6 = arith.constant 0.000000e+00 : f32
    %16 = vector.broadcast %cst_6 : f32 to vector<544x1xf32>
    %17 = arith.maximumf %15, %16 : vector<544x1xf32>
    %cst_7 = arith.constant 9.99999974E-6 : f32
    %18 = vector.broadcast %cst_7 : f32 to vector<544x1xf32>
    %19 = arith.addf %17, %18 : vector<544x1xf32>
    %20 = math.rsqrt %19 : vector<544x1xf32>
    %21 = arith.mulf %3, %20 : vector<544x1xf32>
    %22 = arith.mulf %8, %21 : vector<544x1xf32>
    %23 = arith.subf %4, %22 : vector<544x1xf32>
    %24 = vector.broadcast %21 : vector<544x1xf32> to vector<544x49xf32>
    %25 = arith.mulf %0, %24 : vector<544x49xf32>
    %26 = vector.broadcast %23 : vector<544x1xf32> to vector<544x49xf32>
    %27 = arith.addf %25, %26 : vector<544x49xf32>
    %cst_8 = arith.constant 0.000000e+00 : f32
    %28 = vector.broadcast %cst_8 : f32 to vector<544x49xf32>
    %29 = arith.maximumf %27, %28 : vector<544x49xf32>
    %c0_9 = arith.constant 0 : index
    %c0_10 = arith.constant 0 : index
    %30 = vector.load %arg2[%c0_9, %c0_10] : memref<128x544xbf16, #tpu.memory_space<vmem>>, vector<128x544xbf16>
    %31 = arith.truncf %29 : vector<544x49xf32> to vector<544x49xbf16>
    %cst_11 = arith.constant dense<0.000000e+00> : vector<128x49xf32>
    %32 = tpu.matmul %30, %31, %cst_11 {dimension_numbers = #tpu.dot_dimension_numbers<[1], [0], [0], [1], [0, 0, 1, 1], [], []>} : vector<128x544xbf16>, vector<544x49xbf16>, vector<128x49xf32> -> vector<128x49xf32>
    %c0_12 = arith.constant 0 : index
    %c0_13 = arith.constant 0 : index
    %33 = vector.load %arg3[%c0_12, %c0_13] : memref<128x49xf32, #tpu.memory_space<vmem>>, vector<128x49xf32>
    tpu.vector_store %arg3[%c0_12, %c0_13], %32 {strides = array<i32>} : memref<128x49xf32, #tpu.memory_space<vmem>>, vector<128x49xf32>,
    return
  }
}

</mosaic_0001>

<bundles_post_ra>
// kernel: _apply.1
= control target key start
LH: loop header
LB: loop body
LE: loop exit
PB: predicated region body
PF: predicated region fallthrough
CT: control target
= control target key end

     0   :  { %vm248_vm0 = vcmask 400384   ;;  %s3677_s18 = smov 1   ;;  %vm2843_vm1 = vcmask 261120   ;;  %s6535_s1 = inlined_call_operand.vmem [shape: f32[8,544], index: 1, kind: input, shape index: {}]   ;;  %s6536_s0 = inlined_call_operand.vmem [shape: f32[544,49], index: 0, kind: input, shape index: {}]   ;;  %s6537_s2 = inlined_call_operand.vmem [shape: bf16[128,544], index: 2, kind: input, shape index: {}]   ;;  %s6538_s3 = inlined_call_operand.vmem [shape: f32[128,49], index: 3, kind: output, shape index: {}]  }
   0x1   :  { %v85_v0 = vld [vmem:[%s6535_s1 + $0x10] sm:$0xff]  ;;  %v83_v1 = vld [vmem:[%s6535_s1] sm:$0xff]  ;;  %v86_v2 = vld [vmem:[%s6535_s1 + $0x18] sm:$0xff] }
   0x2   :  { %152 = vxpose.xlu1.b32.start.end [1/1] (short) %v85_v0, 128  ;;  %88 = vxpose.xlu0.b32.start.end [1/1] (short) %v83_v1, 128  ;;  %v84_v3 = vld [vmem:[%s6535_s1 + $0x8] sm:$0xff]  ;;  %v87_v4 = vld [vmem:[%s6535_s1 + $0x20] sm:$0xff]  ;;  %v3757_v23 = vld [vmem:[%s6536_s0 + $0x10] sm:$0xff] }
   0x3   :  { %v3746_v19 = vld [vmem:[%s6536_s0] sm:$0xff]  ;;  %v255_v26 = vsel %vm248_vm0, %v3757_v23, 0.0  ;;  %v3768_v27 = vld [vmem:[%s6536_s0 + $0x18] sm:$0xff]  ;;  %v3790_v35 = vld [vmem:[%s6536_s0 + $0x28] sm:$0xff] }
   0x4   :  { %v249_v22 = vsel %vm248_vm0, %v3746_v19, 0.0  ;;  %v258_v30 = vsel %vm248_vm0, %v3768_v27, 0.0  ;;  %v3779_v31 = vld [vmem:[%s6536_s0 + $0x20] sm:$0xff]  ;;  %v264_v37 = vsel %vm248_vm0, %v3790_v35, 0.0  ;;  %v3799_v38 = vld [vmem:[%s6536_s0 + $0x8] sm:$0xff]  ;;  %v3804_v39 = vld [vmem:[%s6536_s0 + $0x30] sm:$0xff] }
   0x5   :  { %v261_v33 = vsel %vm248_vm0, %v3779_v31, 0.0  ;;  %v252_v41 = vsel %vm248_vm0, %v3799_v38, 0.0  ;;  %v267_v43 = vsel %vm248_vm0, %v3804_v39, 0.0  ;;  %v3817_v44 = vld [vmem:[%s6536_s0 + $0x38] sm:$0xff]  ;;  %v3822_v45 = vld [vmem:[%s6536_s0 + $0x40] sm:$0xff]  ;;  %v3831_v48 = vld [vmem:[%s6536_s0 + $0x48] sm:$0xff] }
   0x6   :  { %v270_v46 = vsel %vm248_vm0, %v3817_v44, 0.0  ;;  %v273_v47 = vsel %vm248_vm0, %v3822_v45, 0.0  ;;  %v3838_v50 = vld [vmem:[%s6536_s0 + $0x50] sm:$0xff]  ;;  %v276_v52 = vsel %vm248_vm0, %v3831_v48, 0.0  ;;  %v3849_v54 = vld [vmem:[%s6536_s0 + $0x58] sm:$0xff]  ;;  %v3854_v55 = vld [vmem:[%s6536_s0 + $0x60] sm:$0xff] }
   0x7   :  { %v279_v53 = vsel %vm248_vm0, %v3838_v50, 0.0  ;;  %v282_v57 = vsel %vm248_vm0, %v3849_v54, 0.0  ;;  %v285_v59 = vsel %vm248_vm0, %v3854_v55, 0.0  ;;  %v3867_v60 = vld [vmem:[%s6536_s0 + $0x68] sm:$0xff]  ;;  %v3872_v61 = vld [vmem:[%s6536_s0 + $0x70] sm:$0xff]  ;;  %v3881_v0 = vld [vmem:[%s6536_s0 + $0x78] sm:$0xff] }
   0x8   :  { %v288_v62 = vsel %vm248_vm0, %v3867_v60, 0.0  ;;  %v291_v63 = vsel %vm248_vm0, %v3872_v61, 0.0 }
  0x3f   :  { %184 = vxpose.xlu1.b32.start.end [1/1] (short) %v86_v2, 128  ;;  %120 = vxpose.xlu0.b32.start.end [1/1] (short) %v84_v3, 128  ;;  %v3888_v2 = vld [vmem:[%s6536_s0 + $0x80] sm:$0xff] }
  0x7c   :  { %216 = vxpose.xlu0.b32.start.end [1/1] (short) (narrow) %v87_v4, 32  ;;  %v294_v4 = vsel %vm248_vm0, %v3881_v0, 0.0 }
  0x82   :  { %v3715_v5 = vpop.trf.xlu1  ;;  %v3717_v6 = vpop.trf.xlu0 }
  0x83   :  { %6690 = vst [vmem:[#allocation2_spill] sm:$0xff] %v3715_v5  ;;  %6691 = vst [vmem:[#allocation3_spill] sm:$0xff] %v3717_v6  ;;  %v4238_v6 = vld [vmem:[%s6536_s0 + $0x1d0] sm:$0xff] }
  0x84   :  { %6752 = vst [vmem:[#allocation64_spill] sm:$0xff] %v4238_v6 }
  0x86   :  { %v3719_v7 = vpop.trf.xlu1  ;;  %v3721_v8 = vpop.trf.xlu0 }
  0x87   :  { %6692 = vst [vmem:[#allocation4_spill] sm:$0xff] %v3719_v7  ;;  %6693 = vst [vmem:[#allocation5_spill] sm:$0xff] %v3721_v8  ;;  %v4049_v7 = vld [vmem:[%s6536_s0 + $0x118] sm:$0xff] }
  0x8a   :  { %v3723_v9 = vpop.trf.xlu1  ;;  %v3725_v10 = vpop.trf.xlu0 }
  0x8b   :  { %6694 = vst [vmem:[#allocation6_spill] sm:$0xff] %v3723_v9  ;;  %6695 = vst [vmem:[#allocation7_spill] sm:$0xff] %v3725_v10  ;;  %v4217_v10 = vld [vmem:[%s6536_s0 + $0x1b8] sm:$0xff] }
  0x8c   :  { %6748 = vst [vmem:[#allocation60_spill] sm:$0xff] %v4217_v10 }
  0x8e   :  { %v3727_v11 = vpop.trf.xlu1  ;;  %v3729_v12 = vpop.trf.xlu0 }
  0x8f   :  { %6696 = vst [vmem:[#allocation8_spill] sm:$0xff] %v3727_v11  ;;  %6697 = vst [vmem:[#allocation9_spill] sm:$0xff] %v3729_v12  ;;  %v4038_v11 = vld [vmem:[%s6536_s0 + $0x110] sm:$0xff] }
  0x90   :  { %v351_v9 = vsel %vm248_vm0, %v4038_v11, 0.0 }
  0x92   :  { %v3731_v13 = vpop.trf.xlu1  ;;  %v3733_v14 = vpop.trf.xlu0 }
  0x93   :  { %6698 = vst [vmem:[#allocation10_spill] sm:$0xff] %v3731_v13  ;;  %6699 = vst [vmem:[#allocation11_spill] sm:$0xff] %v3733_v14  ;;  %v4199_v14 = vld [vmem:[%s6536_s0 + $0x1a8] sm:$0xff] }
  0x96   :  { %v3735_v15 = vpop.trf.xlu1  ;;  %v3737_v16 = vpop.trf.xlu0 }
  0x97   :  { %6700 = vst [vmem:[#allocation12_spill] sm:$0xff] %v3735_v15  ;;  %6701 = vst [vmem:[#allocation13_spill] sm:$0xff] %v3737_v16  ;;  %v4031_v15 = vld [vmem:[%s6536_s0 + $0x108] sm:$0xff] }
  0x9a   :  { %v3739_v17 = vpop.trf.xlu1  ;;  %v3741_v18 = vpop.trf.xlu0 }
  0x9b   :  { %6702 = vst [vmem:[#allocation14_spill] sm:$0xff] %v3739_v17  ;;  %6703 = vst [vmem:[#allocation15_spill] sm:$0xff] %v3741_v18  ;;  %v4017_v17 = vld [vmem:[%s6536_s0 + $0xf8] sm:$0xff]  ;;  %v4188_v18 = vld [vmem:[%s6536_s0 + $0x1a0] sm:$0xff] }
  0x9c   :  { %v405_v16 = vsel %vm248_vm0, %v4188_v18, 0.0 }
  0x9e   :  { %v3748_v20 = vpop.trf.xlu1  ;;  %v3750_v21 = vpop.trf.xlu0 }
  0x9f   :  { %6704 = vst [vmem:[#allocation16_spill] sm:$0xff] %v3748_v20  ;;  %6705 = vst [vmem:[#allocation17_spill] sm:$0xff] %v3750_v21 }
  0xa2   :  { %250 = vadd.xlane.f32.xlu1 %v249_v22  ;;  %v3759_v24 = vpop.trf.xlu1  ;;  %v3761_v25 = vpop.trf.xlu0  ;;  %v297_v22 = vsel %vm248_vm0, %v3888_v2, 0.0 }
  0xa3   :  { %6706 = vst [vmem:[#allocation18_spill] sm:$0xff] %v3759_v24  ;;  %6707 = vst [vmem:[#allocation19_spill] sm:$0xff] %v3761_v25  ;;  %v4167_v25 = vld [vmem:[%s6536_s0 + $0x188] sm:$0xff] }
  0xa6   :  { %256 = vadd.xlane.f32.xlu1 %v255_v26  ;;  %v3770_v28 = vpop.trf.xlu1  ;;  %v3772_v29 = vpop.trf.xlu0  ;;  %v3899_v26 = vld [vmem:[%s6536_s0 + $0x88] sm:$0xff] }
  0xa7   :  { %6708 = vst [vmem:[#allocation20_spill] sm:$0xff] %v3770_v28  ;;  %6709 = vst [vmem:[#allocation21_spill] sm:$0xff] %v3772_v29  ;;  %v3999_v28 = vld [vmem:[%s6536_s0 + $0xe8] sm:$0xff] }
  0xaa   :  { %259 = vadd.xlane.f32.xlu1 %v258_v30  ;;  %v3781_v32 = vpop.trf.xlu0  ;;  %v3785_v34 = vpop.trf.xlu1  ;;  %v3904_v30 = vld [vmem:[%s6536_s0 + $0x90] sm:$0xff] }
  0xab   :  { %6710 = vst [vmem:[#allocation22_spill] sm:$0xff] %v3781_v32  ;;  %6711 = vst [vmem:[#allocation23_spill] sm:$0xff] %v3785_v34  ;;  %v4149_v32 = vld [vmem:[%s6536_s0 + $0x178] sm:$0xff] }
  0xae   :  { %262 = vadd.xlane.f32.xlu1 %v261_v33  ;;  %v3792_v36 = vpop.trf.xlu0  ;;  %v3806_v40 = vpop.trf.xlu1 }
  0xaf   :  { %6712 = vst [vmem:[#allocation24_spill] sm:$0xff] %v3792_v36  ;;  %6713 = vst [vmem:[#allocation25_spill] sm:$0xff] %v3806_v40  ;;  %v3988_v40 = vld [vmem:[%s6536_s0 + $0xe0] sm:$0xff] }
  0xb0   :  { %v333_v34 = vsel %vm248_vm0, %v3988_v40, 0.0 }
  0xb2   :  { %265 = vadd.xlane.f32.xlu1 %v264_v37  ;;  %v3810_v42 = vpop.trf.xlu0  ;;  %v3833_v49 = vpop.trf.xlu1  ;;  %v300_v37 = vsel %vm248_vm0, %v3899_v26, 0.0 }
  0xb3   :  { %6714 = vst [vmem:[#allocation26_spill] sm:$0xff] %v3810_v42  ;;  %6715 = vst [vmem:[#allocation27_spill] sm:$0xff] %v3833_v49  ;;  %v4138_v42 = vld [vmem:[%s6536_s0 + $0x170] sm:$0xff] }
  0xb4   :  { %v387_v36 = vsel %vm248_vm0, %v4138_v42, 0.0 }
  0xb5   :  { %253 = vadd.xlane.f32.xlu0 %v252_v41 }
  0xb6   :  { %268 = vadd.xlane.f32.xlu1 %v267_v43  ;;  %v3840_v51 = vpop.trf.xlu0  ;;  %v3856_v56 = vpop.trf.xlu1  ;;  %v303_v43 = vsel %vm248_vm0, %v3904_v30, 0.0 }
  0xb7   :  { %6716 = vst [vmem:[#allocation28_spill] sm:$0xff] %v3840_v51  ;;  %6717 = vst [vmem:[#allocation29_spill] sm:$0xff] %v3856_v56  ;;  %v3981_v56 = vld [vmem:[%s6536_s0 + $0xd8] sm:$0xff] }
  0xb9   :  { %271 = vadd.xlane.f32.xlu0 %v270_v46  ;;  %v3917_v46 = vld [vmem:[%s6536_s0 + $0x98] sm:$0xff] }
  0xba   :  { %274 = vadd.xlane.f32.xlu1 %v273_v47  ;;  %v3860_v58 = vpop.trf.xlu0  ;;  %v3883_v1 = vpop.trf.xlu1  ;;  %v3922_v47 = vld [vmem:[%s6536_s0 + $0xa0] sm:$0xff] }
  0xbb   :  { %6718 = vst [vmem:[#allocation30_spill] sm:$0xff] %v3860_v58  ;;  %6719 = vst [vmem:[#allocation31_spill] sm:$0xff] %v3883_v1  ;;  %v3967_v1 = vld [vmem:[%s6536_s0 + $0xc8] sm:$0xff]  ;;  %v4117_v58 = vld [vmem:[%s6536_s0 + $0x158] sm:$0xff] }
  0xbd   :  { %277 = vadd.xlane.f32.xlu0 %v276_v52  ;;  %v306_v52 = vsel %vm248_vm0, %v3917_v46, 0.0 }
  0xbe   :  { %280 = vadd.xlane.f32.xlu1 %v279_v53  ;;  %v3890_v3 = vpop.trf.xlu0  ;;  %v3906_v33 = vpop.trf.xlu1  ;;  %v309_v53 = vsel %vm248_vm0, %v3922_v47, 0.0 }
  0xbf   :  { %6720 = vst [vmem:[#allocation32_spill] sm:$0xff] %v3890_v3  ;;  %6721 = vst [vmem:[#allocation33_spill] sm:$0xff] %v3906_v33 }
  0xc1   :  { %283 = vadd.xlane.f32.xlu0 %v282_v57  ;;  %v3931_v57 = vld [vmem:[%s6536_s0 + $0xa8] sm:$0xff] }
  0xc2   :  { %286 = vadd.xlane.f32.xlu1 %v285_v59  ;;  %v3910_v41 = vpop.trf.xlu0  ;;  %v3933_v59 = vpop.trf.xlu1 }
  0xc3   :  { %6722 = vst [vmem:[#allocation34_spill] sm:$0xff] %v3910_v41  ;;  %6723 = vst [vmem:[#allocation35_spill] sm:$0xff] %v3933_v59  ;;  %v4099_v41 = vld [vmem:[%s6536_s0 + $0x148] sm:$0xff] }
  0xc5   :  { %289 = vadd.xlane.f32.xlu0 %v288_v62  ;;  %v3938_v62 = vld [vmem:[%s6536_s0 + $0xb0] sm:$0xff] }
  0xc6   :  { %292 = vadd.xlane.f32.xlu1 %v291_v63  ;;  %v3940_v63 = vpop.trf.xlu0  ;;  %v3956_v59 = vpop.trf.xlu1 }
  0xc7   :  { %6724 = vst [vmem:[#allocation36_spill] sm:$0xff] %v3940_v63  ;;  %6725 = vst [vmem:[#allocation37_spill] sm:$0xff] %v3956_v59 }
  0xc9   :  { %295 = vadd.xlane.f32.xlu0 %v294_v4  ;;  %v312_v4 = vsel %vm248_vm0, %v3931_v57, 0.0 }
  0xca   :  { %298 = vadd.xlane.f32.xlu1 %v297_v22  ;;  %v315_v22 = vsel %vm248_vm0, %v3938_v62, 0.0  ;;  %v3983_v49 = vpop.trf.xlu1 }
  0xcb   :  { %6727 = vst [vmem:[#allocation39_spill] sm:$0xff] %v3983_v49  ;;  %v4004_v49 = vld [vmem:[%s6536_s0 + $0xf0] sm:$0xff] }
  0xcc   :  { %v339_v20 = vsel %vm248_vm0, %v4004_v49, 0.0 }
  0xcd   :  { %301 = vadd.xlane.f32.xlu0 %v300_v37  ;;  %v3949_v37 = vld [vmem:[%s6536_s0 + $0xb8] sm:$0xff] }
  0xce   :  { %304 = vadd.xlane.f32.xlu1 %v303_v43  ;;  %v3954_v43 = vld [vmem:[%s6536_s0 + $0xc0] sm:$0xff]  ;;  %v4006_v24 = vpop.trf.xlu1 }
  0xcf   :  { %v321_v33 = vsel %vm248_vm0, %v3954_v43, 0.0  ;;  %6729 = vst [vmem:[#allocation41_spill] sm:$0xff] %v4006_v24 }
  0xd1   :  { %307 = vadd.xlane.f32.xlu0 %v306_v52  ;;  %v318_v52 = vsel %vm248_vm0, %v3949_v37, 0.0 }
  0xd2   :  { %310 = vadd.xlane.f32.xlu1 %v309_v53  ;;  %v3960_v53 = vpop.trf.xlu0  ;;  %v4033_v13 = vpop.trf.xlu1 }
  0xd3   :  { %6726 = vst [vmem:[#allocation38_spill] sm:$0xff] %v3960_v53  ;;  %6731 = vst [vmem:[#allocation43_spill] sm:$0xff] %v4033_v13  ;;  %v4054_v13 = vld [vmem:[%s6536_s0 + $0x120] sm:$0xff] }
  0xd4   :  { %v4088_v53 = vld [vmem:[%s6536_s0 + $0x140] sm:$0xff] }
  0xd5   :  { %313 = vadd.xlane.f32.xlu0 %v312_v4  ;;  %v3972_v4 = vld [vmem:[%s6536_s0 + $0xd0] sm:$0xff]  ;;  %v369_v63 = vsel %vm248_vm0, %v4088_v53, 0.0 }
  0xd6   :  { %316 = vadd.xlane.f32.xlu1 %v315_v22  ;;  %v324_v22 = vsel %vm248_vm0, %v3967_v1, 0.0  ;;  %v327_v59 = vsel %vm248_vm0, %v3972_v4, 0.0  ;;  %v4056_v5 = vpop.trf.xlu1 }
  0xd7   :  { %6733 = vst [vmem:[#allocation45_spill] sm:$0xff] %v4056_v5 }
  0xd9   :  { %319 = vadd.xlane.f32.xlu0 %v318_v52  ;;  %v3990_v52 = vpop.trf.xlu0 }
  0xda   :  { %322 = vadd.xlane.f32.xlu1 %v321_v33  ;;  %6728 = vst [vmem:[#allocation40_spill] sm:$0xff] %v3990_v52  ;;  %v330_v33 = vsel %vm248_vm0, %v3981_v56, 0.0  ;;  %v4083_v52 = vpop.trf.xlu1 }
  0xdb   :  { %6735 = vst [vmem:[#allocation47_spill] sm:$0xff] %v4083_v52  ;;  %v4104_v52 = vld [vmem:[%s6536_s0 + $0x150] sm:$0xff] }
  0xdc   :  { %v375_v3 = vsel %vm248_vm0, %v4104_v52, 0.0 }
  0xdd   :  { %325 = vadd.xlane.f32.xlu0 %v324_v22  ;;  %v4010_v22 = vpop.trf.xlu0 }
  0xde   :  { %328 = vadd.xlane.f32.xlu1 %v327_v59  ;;  %v336_v59 = vsel %vm248_vm0, %v3999_v28, 0.0  ;;  %6730 = vst [vmem:[#allocation42_spill] sm:$0xff] %v4010_v22  ;;  %v4067_v22 = vld [vmem:[%s6536_s0 + $0x128] sm:$0xff] }
  0xe1   :  { %331 = vadd.xlane.f32.xlu0 %v330_v33  ;;  %v4022_v33 = vld [vmem:[%s6536_s0 + $0x100] sm:$0xff] }
  0xe2   :  { %334 = vadd.xlane.f32.xlu1 %v333_v34  ;;  %v342_v34 = vsel %vm248_vm0, %v4017_v17, 0.0  ;;  %v345_v24 = vsel %vm248_vm0, %v4022_v33, 0.0 }
  0xe5   :  { %337 = vadd.xlane.f32.xlu0 %v336_v59  ;;  %v4040_v59 = vpop.trf.xlu0 }
  0xe6   :  { %340 = vadd.xlane.f32.xlu1 %v339_v20  ;;  %6732 = vst [vmem:[#allocation44_spill] sm:$0xff] %v4040_v59  ;;  %v348_v20 = vsel %vm248_vm0, %v4031_v15, 0.0  ;;  %v357_v59 = vsel %vm248_vm0, %v4054_v13, 0.0 }
  0xe9   :  { %343 = vadd.xlane.f32.xlu0 %v342_v34  ;;  %v4060_v34 = vpop.trf.xlu0 }
  0xea   :  { %346 = vadd.xlane.f32.xlu1 %v345_v24  ;;  %v354_v24 = vsel %vm248_vm0, %v4049_v7, 0.0  ;;  %6734 = vst [vmem:[#allocation46_spill] sm:$0xff] %v4060_v34  ;;  %v4081_v34 = vld [vmem:[%s6536_s0 + $0x138] sm:$0xff] }
  0xed   :  { %349 = vadd.xlane.f32.xlu0 %v348_v20  ;;  %v4072_v20 = vld [vmem:[%s6536_s0 + $0x130] sm:$0xff] }
  0xee   :  { %352 = vadd.xlane.f32.xlu1 %v351_v9  ;;  %v360_v9 = vsel %vm248_vm0, %v4067_v22, 0.0  ;;  %v363_v5 = vsel %vm248_vm0, %v4072_v20, 0.0 }
  0xf1   :  { %355 = vadd.xlane.f32.xlu0 %v354_v24  ;;  %v4090_v24 = vpop.trf.xlu0 }
  0xf2   :  { %358 = vadd.xlane.f32.xlu1 %v357_v59  ;;  %6736 = vst [vmem:[#allocation48_spill] sm:$0xff] %v4090_v24  ;;  %v366_v59 = vsel %vm248_vm0, %v4081_v34, 0.0  ;;  %v4106_v24 = vpop.trf.xlu1 }
  0xf3   :  { %6737 = vst [vmem:[#allocation49_spill] sm:$0xff] %v4106_v24 }
  0xf5   :  { %361 = vadd.xlane.f32.xlu0 %v360_v9  ;;  %v4110_v9 = vpop.trf.xlu0 }
  0xf6   :  { %364 = vadd.xlane.f32.xlu1 %v363_v5  ;;  %v372_v5 = vsel %vm248_vm0, %v4099_v41, 0.0  ;;  %6738 = vst [vmem:[#allocation50_spill] sm:$0xff] %v4110_v9  ;;  %v4131_v9 = vld [vmem:[%s6536_s0 + $0x168] sm:$0xff]  ;;  %v4133_v51 = vpop.trf.xlu1 }
  0xf7   :  { %6739 = vst [vmem:[#allocation51_spill] sm:$0xff] %v4133_v51  ;;  %v4154_v51 = vld [vmem:[%s6536_s0 + $0x180] sm:$0xff] }
  0xf8   :  { %v393_v29 = vsel %vm248_vm0, %v4154_v51, 0.0 }
  0xf9   :  { %367 = vadd.xlane.f32.xlu0 %v366_v59  ;;  %v4122_v59 = vld [vmem:[%s6536_s0 + $0x160] sm:$0xff] }
  0xfa   :  { %370 = vadd.xlane.f32.xlu1 %v369_v63  ;;  %v378_v63 = vsel %vm248_vm0, %v4117_v58, 0.0  ;;  %v381_v24 = vsel %vm248_vm0, %v4122_v59, 0.0 }
  0xfd   :  { %373 = vadd.xlane.f32.xlu0 %v372_v5  ;;  %v4140_v5 = vpop.trf.xlu0 }
  0xfe   :  { %376 = vadd.xlane.f32.xlu1 %v375_v3  ;;  %6740 = vst [vmem:[#allocation52_spill] sm:$0xff] %v4140_v5  ;;  %v384_v3 = vsel %vm248_vm0, %v4131_v9, 0.0  ;;  %v4156_v5 = vpop.trf.xlu1 }
  0xff   :  { %6741 = vst [vmem:[#allocation53_spill] sm:$0xff] %v4156_v5 }
 0x101   :  { %379 = vadd.xlane.f32.xlu0 %v378_v63  ;;  %v4160_v63 = vpop.trf.xlu0 }
 0x102   :  { %382 = vadd.xlane.f32.xlu1 %v381_v24  ;;  %v390_v24 = vsel %vm248_vm0, %v4149_v32, 0.0  ;;  %6742 = vst [vmem:[#allocation54_spill] sm:$0xff] %v4160_v63  ;;  %v4181_v63 = vld [vmem:[%s6536_s0 + $0x198] sm:$0xff]  ;;  %v4183_v21 = vpop.trf.xlu1 }
 0x103   :  { %6743 = vst [vmem:[#allocation55_spill] sm:$0xff] %v4183_v21  ;;  %v4204_v21 = vld [vmem:[%s6536_s0 + $0x1b0] sm:$0xff] }
 0x104   :  { %6745 = vst [vmem:[#allocation57_spill] sm:$0xff] %v4204_v21  ;;  %v411_v12 = vsel %vm248_vm0, %v4204_v21, 0.0  ;;  %v521_v21 = vmul.f32 %v3746_v19, %v3746_v19 }
 0x105   :  { %385 = vadd.xlane.f32.xlu0 %v384_v3  ;;  %v4172_v3 = vld [vmem:[%s6536_s0 + $0x190] sm:$0xff] }
 0x106   :  { %388 = vadd.xlane.f32.xlu1 %v387_v36  ;;  %v396_v36 = vsel %vm248_vm0, %v4167_v25, 0.0  ;;  %v399_v5 = vsel %vm248_vm0, %v4172_v3, 0.0 }
 0x109   :  { %391 = vadd.xlane.f32.xlu0 %v390_v24  ;;  %v4190_v24 = vpop.trf.xlu0 }
 0x10a   :  { %394 = vadd.xlane.f32.xlu1 %v393_v29  ;;  %6744 = vst [vmem:[#allocation56_spill] sm:$0xff] %v4190_v24  ;;  %v402_v29 = vsel %vm248_vm0, %v4181_v63, 0.0  ;;  %v4206_v24 = vpop.trf.xlu1 }
 0x10b   :  { %6746 = vst [vmem:[#allocation58_spill] sm:$0xff] %v4206_v24 }
 0x10d   :  { %397 = vadd.xlane.f32.xlu0 %v396_v36  ;;  %v4210_v36 = vpop.trf.xlu0 }
 0x10e   :  { %400 = vadd.xlane.f32.xlu1 %v399_v5  ;;  %v408_v5 = vsel %vm248_vm0, %v4199_v14, 0.0  ;;  %6747 = vst [vmem:[#allocation59_spill] sm:$0xff] %v4210_v36  ;;  %v4231_v36 = vld [vmem:[%s6536_s0 + $0x1c8] sm:$0xff]  ;;  %v4233_v8 = vpop.trf.xlu1 }
 0x10f   :  { %6750 = vst [vmem:[#allocation62_spill] sm:$0xff] %v4231_v36  ;;  %6751 = vst [vmem:[#allocation63_spill] sm:$0xff] %v4233_v8  ;;  %v4254_v8 = vld [vmem:[%s6536_s0 + $0x1e0] sm:$0xff] }
 0x110   :  { %6755 = vst [vmem:[#allocation67_spill] sm:$0xff] %v4254_v8 }
 0x111   :  { %403 = vadd.xlane.f32.xlu0 %v402_v29  ;;  %v4222_v29 = vld [vmem:[%s6536_s0 + $0x1c0] sm:$0xff] }
 0x112   :  { %406 = vadd.xlane.f32.xlu1 %v405_v16  ;;  %6749 = vst [vmem:[#allocation61_spill] sm:$0xff] %v4222_v29  ;;  %v414_v16 = vsel %vm248_vm0, %v4217_v10, 0.0  ;;  %v417_v24 = vsel %vm248_vm0, %v4222_v29, 0.0  ;;  %v423_v29 = vsel %vm248_vm0, %v4238_v6, 0.0  ;;  %v4249_v10 = vld [vmem:[%s6536_s0 + $0x1d8] sm:$0xff]  ;;  %v429_v6 = vsel %vm248_vm0, %v4254_v8, 0.0 }
 0x113   :  { %6754 = vst [vmem:[#allocation66_spill] sm:$0xff] %v4249_v10  ;;  %v4283_v8 = vld [vmem:[%s6536_s0 + $0x1f8] sm:$0xff] }
 0x114   :  { %6761 = vst [vmem:[#allocation73_spill] sm:$0xff] %v4283_v8 }
 0x115   :  { %409 = vadd.xlane.f32.xlu0 %v408_v5  ;;  %v4240_v5 = vpop.trf.xlu0 }
 0x116   :  { %412 = vadd.xlane.f32.xlu1 %v411_v12  ;;  %6753 = vst [vmem:[#allocation65_spill] sm:$0xff] %v4240_v5  ;;  %v420_v12 = vsel %vm248_vm0, %v4231_v36, 0.0  ;;  %v4256_v5 = vpop.trf.xlu1  ;;  %v4267_v36 = vld [vmem:[%s6536_s0 + $0x1e8] sm:$0xff] }
 0x117   :  { %6756 = vst [vmem:[#allocation68_spill] sm:$0xff] %v4256_v5  ;;  %6758 = vst [vmem:[#allocation70_spill] sm:$0xff] %v4267_v36 }
 0x119   :  { %415 = vadd.xlane.f32.xlu0 %v414_v16  ;;  %v4260_v16 = vpop.trf.xlu0 }
 0x11a   :  { %418 = vadd.xlane.f32.xlu1 %v417_v24  ;;  %v426_v24 = vsel %vm248_vm0, %v4249_v10, 0.0  ;;  %6757 = vst [vmem:[#allocation69_spill] sm:$0xff] %v4260_v16  ;;  %v4278_v16 = vpop.trf.xlu1  ;;  %v4288_v10 = vld [vmem:[%s6536_s0 + $0x200] sm:$0xff] }
 0x11b   :  { %6760 = vst [vmem:[#allocation72_spill] sm:$0xff] %v4278_v16  ;;  %6762 = vst [vmem:[#allocation74_spill] sm:$0xff] %v4288_v10  ;;  %v441_v16 = vsel %vm248_vm0, %v4288_v10, 0.0 }
 0x11d   :  { %421 = vadd.xlane.f32.xlu0 %v420_v12  ;;  %v4272_v12 = vld [vmem:[%s6536_s0 + $0x1f0] sm:$0xff] }
 0x11e   :  { %424 = vadd.xlane.f32.xlu1 %v423_v29  ;;  %6759 = vst [vmem:[#allocation71_spill] sm:$0xff] %v4272_v12  ;;  %v432_v29 = vsel %vm248_vm0, %v4267_v36, 0.0  ;;  %v435_v5 = vsel %vm248_vm0, %v4272_v12, 0.0  ;;  %v4299_v12 = vld [vmem:[%s6536_s0 + $0x208] sm:$0xff]  ;;  %v4304_v36 = vld [vmem:[%s6536_s0 + $0x210] sm:$0xff] }
 0x11f   :  { %6764 = vst [vmem:[#allocation76_spill] sm:$0xff] %v4299_v12  ;;  %6765 = vst [vmem:[#allocation77_spill] sm:$0xff] %v4304_v36  ;;  %v447_v10 = vsel %vm248_vm0, %v4304_v36, 0.0  ;;  %v523_v36 = vmul.f32 %v3757_v23, %v3757_v23 }
 0x121   :  { %427 = vadd.xlane.f32.xlu0 %v426_v24  ;;  %v4290_v24 = vpop.trf.xlu0 }
 0x122   :  { %430 = vadd.xlane.f32.xlu1 %v429_v6  ;;  %6763 = vst [vmem:[#allocation75_spill] sm:$0xff] %v4290_v24  ;;  %v438_v6 = vsel %vm248_vm0, %v4283_v8, 0.0  ;;  %v4306_v24 = vpop.trf.xlu1  ;;  %v4317_v8 = vld [vmem:[%s6536_s0 + $0x218] sm:$0xff] }
 0x123   :  { %6766 = vst [vmem:[#allocation78_spill] sm:$0xff] %v4306_v24  ;;  %v589_v24 = vsel %vm248_vm0, %v521_v21, 0.0 }
 0x125   :  { %433 = vadd.xlane.f32.xlu0 %v432_v29  ;;  %v4310_v29 = vpop.trf.xlu0 }
 0x126   :  { %436 = vadd.xlane.f32.xlu1 %v435_v5  ;;  %v444_v5 = vsel %vm248_vm0, %v4299_v12, 0.0  ;;  %6767 = vst [vmem:[#allocation79_spill] sm:$0xff] %v4310_v29 }
 0x129   :  { %439 = vadd.xlane.f32.xlu0 %v438_v6  ;;  %v522_v6 = vmul.f32 %v3799_v38, %v3799_v38  ;;  %v4330_v12 = vpop.trf.xlu0  ;;  %v595_v38 = vsel %vm248_vm0, %v523_v36, 0.0  ;;  %v528_v36 = vmul.f32 %v3817_v44, %v3817_v44 }
 0x12a   :  { %442 = vadd.xlane.f32.xlu1 %v441_v16  ;;  %v450_v16 = vsel %vm248_vm0, %v4317_v8, 0.0  ;;  %6769 = vst [vmem:[#allocation81_spill] sm:$0xff] %v4330_v12  ;;  %v6784_v12 = vld [vmem:[#allocation64_spill] sm:$0xff] }
 0x12b   :  { %v592_v19 = vsel %vm248_vm0, %v522_v6, 0.0  ;;  %v527_v6 = vmul.f32 %v3804_v39, %v3804_v39  ;;  %v610_v39 = vsel %vm248_vm0, %v528_v36, 0.0  ;;  %v533_v36 = vmul.f32 %v3854_v55, %v3854_v55 }
 0x12d   :  { %445 = vadd.xlane.f32.xlu0 %v444_v5  ;;  %v4341_v23 = vpop.trf.xlu0 }
 0x12e   :  { %448 = vadd.xlane.f32.xlu1 %v447_v10  ;;  %v524_v10 = vmul.f32 %v3768_v27, %v3768_v27  ;;  %6770 = vst [vmem:[#allocation82_spill] sm:$0xff] %v4341_v23 }
 0x12f   :  { %v4325_v29 = vpop.xlane.xlu1 %250 }
 0x130   :  { %6768 = vst [vmem:[#allocation80_spill] sm:$0xff] %v4325_v29  ;;  %v525_v29 = vmul.f32 %v3779_v31, %v3779_v31  ;;  %v598_v21 = vsel %vm248_vm0, %v524_v10, 0.0  ;;  %v607_v10 = vsel %vm248_vm0, %v527_v6, 0.0  ;;  %v532_v6 = vmul.f32 %v3849_v54, %v3849_v54 }
 0x131   :  { %451 = vadd.xlane.f32.xlu0 %v450_v16  ;;  %v625_v54 = vsel %vm248_vm0, %v533_v36, 0.0  ;;  %v538_v36 = vmul.f32 %v3899_v26, %v3899_v26 }
 0x132   :  { %590 = vadd.xlane.f32.xlu1 %v589_v24  ;;  %v526_v24 = vmul.f32 %v3790_v35, %v3790_v35  ;;  %v601_v27 = vsel %vm248_vm0, %v525_v29, 0.0  ;;  %v529_v35 = vmul.f32 %v3822_v45, %v3822_v45  ;;  %v530_v29 = vmul.f32 %v3831_v48, %v3831_v48 }
 0x133   :  { %v4335_v5 = vpop.xlane.xlu1 %256 }
 0x134   :  { %v604_v31 = vsel %vm248_vm0, %v526_v24, 0.0  ;;  %v613_v44 = vsel %vm248_vm0, %v529_v35, 0.0  ;;  %v531_v24 = vmul.f32 %v3838_v50, %v3838_v50  ;;  %v616_v45 = vsel %vm248_vm0, %v530_v29, 0.0 }
 0x135   :  { %593 = vadd.xlane.f32.xlu0 %v592_v19  ;;  %v622_v50 = vsel %vm248_vm0, %v532_v6, 0.0  ;;  %v534_v35 = vmul.f32 %v3867_v60, %v3867_v60  ;;  %v535_v29 = vmul.f32 %v3872_v61, %v3872_v61  ;;  %v537_v6 = vmul.f32 %v3888_v2, %v3888_v2 }
 0x136   :  { %596 = vadd.xlane.f32.xlu1 %v595_v38  ;;  %v4358_v38 = vpop.trf.xlu0  ;;  %v619_v48 = vsel %vm248_vm0, %v531_v24, 0.0  ;;  %v536_v24 = vmul.f32 %v3881_v0, %v3881_v0  ;;  %v640_v2 = vsel %vm248_vm0, %v538_v36, 0.0  ;;  %v543_v36 = vmul.f32 %v3938_v62, %v3938_v62 }
 0x137   :  { %v4345_v16 = vpop.xlane.xlu1 %259  ;;  %6771 = vst [vmem:[#allocation83_spill] sm:$0xff] %v4358_v38  ;;  %v628_v55 = vsel %vm248_vm0, %v534_v35, 0.0  ;;  %v631_v60 = vsel %vm248_vm0, %v535_v29, 0.0  ;;  %v637_v0 = vsel %vm248_vm0, %v537_v6, 0.0  ;;  %v539_v35 = vmul.f32 %v3904_v30, %v3904_v30  ;;  %v6780_v38 = vld [vmem:[#allocation61_spill] sm:$0xff] }
 0x138   :  { %v634_v61 = vsel %vm248_vm0, %v536_v24, 0.0  ;;  %v540_v29 = vmul.f32 %v3917_v46, %v3917_v46  ;;  %v541_v24 = vmul.f32 %v3922_v47, %v3922_v47  ;;  %v542_v6 = vmul.f32 %v3931_v57, %v3931_v57 }
 0x139   :  { %599 = vadd.xlane.f32.xlu0 %v598_v21  ;;  %v643_v26 = vsel %vm248_vm0, %v539_v35, 0.0  ;;  %v544_v35 = vmul.f32 %v3949_v37, %v3949_v37  ;;  %v655_v57 = vsel %vm248_vm0, %v543_v36, 0.0  ;;  %v548_v36 = vmul.f32 %v3981_v56, %v3981_v56 }
 0x13a   :  { %602 = vadd.xlane.f32.xlu1 %v601_v27  ;;  %v646_v30 = vsel %vm248_vm0, %v540_v29, 0.0  ;;  %v649_v46 = vsel %vm248_vm0, %v541_v24, 0.0  ;;  %v652_v47 = vsel %vm248_vm0, %v542_v6, 0.0  ;;  %v545_v29 = vmul.f32 %v3954_v43, %v3954_v43 }
 0x13b   :  { %v4353_v19 = vpop.xlane.xlu1 %262  ;;  %v658_v62 = vsel %vm248_vm0, %v544_v35, 0.0  ;;  %v546_v24 = vmul.f32 %v3967_v1, %v3967_v1  ;;  %v547_v6 = vmul.f32 %v3972_v4, %v3972_v4  ;;  %v549_v35 = vmul.f32 %v3988_v40, %v3988_v40 }
 0x13c   :  { %v661_v37 = vsel %vm248_vm0, %v545_v29, 0.0  ;;  %v670_v4 = vsel %vm248_vm0, %v548_v36, 0.0  ;;  %v550_v29 = vmul.f32 %v3999_v28, %v3999_v28  ;;  %v553_v36 = vmul.f32 %v4022_v33, %v4022_v33 }
 0x13d   :  { %605 = vadd.xlane.f32.xlu0 %v604_v31  ;;  %v664_v43 = vsel %vm248_vm0, %v546_v24, 0.0  ;;  %v667_v1 = vsel %vm248_vm0, %v547_v6, 0.0  ;;  %v673_v56 = vsel %vm248_vm0, %v549_v35, 0.0  ;;  %v551_v24 = vmul.f32 %v4004_v49, %v4004_v49 }
 0x13e   :  { %608 = vadd.xlane.f32.xlu1 %v607_v10  ;;  %v676_v40 = vsel %vm248_vm0, %v550_v29, 0.0  ;;  %v552_v6 = vmul.f32 %v4017_v17, %v4017_v17  ;;  %v554_v35 = vmul.f32 %v4031_v15, %v4031_v15  ;;  %v685_v17 = vsel %vm248_vm0, %v553_v36, 0.0 }
 0x13f   :  { %v4363_v21 = vpop.xlane.xlu1 %265  ;;  %v679_v28 = vsel %vm248_vm0, %v551_v24, 0.0  ;;  %v555_v29 = vmul.f32 %v4038_v11, %v4038_v11  ;;  %v556_v24 = vmul.f32 %v4049_v7, %v4049_v7  ;;  %v558_v36 = vmul.f32 %v4067_v22, %v4067_v22 }
 0x140   :  { %v682_v49 = vsel %vm248_vm0, %v552_v6, 0.0  ;;  %v688_v33 = vsel %vm248_vm0, %v554_v35, 0.0  ;;  %v557_v6 = vmul.f32 %v4054_v13, %v4054_v13  ;;  %v559_v35 = vmul.f32 %v4072_v20, %v4072_v20 }
 0x141   :  { %611 = vadd.xlane.f32.xlu0 %v610_v39  ;;  %v691_v15 = vsel %vm248_vm0, %v555_v29, 0.0  ;;  %v694_v11 = vsel %vm248_vm0, %v556_v24, 0.0  ;;  %v700_v13 = vsel %vm248_vm0, %v558_v36, 0.0  ;;  %v560_v29 = vmul.f32 %v4081_v34, %v4081_v34 }
 0x142   :  { %v4368_v27 = vpop.xlane.xlu0 %253  ;;  %614 = vadd.xlane.f32.xlu1 %v613_v44  ;;  %v697_v7 = vsel %vm248_vm0, %v557_v6, 0.0  ;;  %v703_v22 = vsel %vm248_vm0, %v559_v35, 0.0  ;;  %v561_v24 = vmul.f32 %v4088_v53, %v4088_v53  ;;  %v562_v6 = vmul.f32 %v4099_v41, %v4099_v41 }
 0x143   :  { %v4373_v31 = vpop.xlane.xlu1 %268  ;;  %v706_v20 = vsel %vm248_vm0, %v560_v29, 0.0  ;;  %v563_v36 = vmul.f32 %v4104_v52, %v4104_v52  ;;  %v564_v35 = vmul.f32 %v4117_v58, %v4117_v58  ;;  %v565_v29 = vmul.f32 %v4122_v59, %v4122_v59 }
 0x144   :  { %v709_v34 = vsel %vm248_vm0, %v561_v24, 0.0  ;;  %v712_v53 = vsel %vm248_vm0, %v562_v6, 0.0  ;;  %v566_v24 = vmul.f32 %v4131_v9, %v4131_v9  ;;  %v567_v6 = vmul.f32 %v4138_v42, %v4138_v42 }
 0x145   :  { %617 = vadd.xlane.f32.xlu0 %v616_v45  ;;  %v715_v41 = vsel %vm248_vm0, %v563_v36, 0.0  ;;  %v718_v52 = vsel %vm248_vm0, %v564_v35, 0.0  ;;  %v721_v58 = vsel %vm248_vm0, %v565_v29, 0.0  ;;  %v568_v36 = vmul.f32 %v4149_v32, %v4149_v32 }
 0x146   :  { %v4378_v10 = vpop.xlane.xlu0 %271  ;;  %620 = vadd.xlane.f32.xlu1 %v619_v48  ;;  %v724_v59 = vsel %vm248_vm0, %v566_v24, 0.0  ;;  %v727_v9 = vsel %vm248_vm0, %v567_v6, 0.0  ;;  %v569_v35 = vmul.f32 %v4154_v51, %v4154_v51  ;;  %v570_v29 = vmul.f32 %v4167_v25, %v4167_v25 }
 0x147   :  { %v4383_v39 = vpop.xlane.xlu1 %274  ;;  %v730_v42 = vsel %vm248_vm0, %v568_v36, 0.0  ;;  %v571_v24 = vmul.f32 %v4172_v3, %v4172_v3  ;;  %v572_v6 = vmul.f32 %v4181_v63, %v4181_v63  ;;  %v573_v36 = vmul.f32 %v4188_v18, %v4188_v18 }
 0x148   :  { %v733_v32 = vsel %vm248_vm0, %v569_v35, 0.0  ;;  %v736_v51 = vsel %vm248_vm0, %v570_v29, 0.0  ;;  %v574_v35 = vmul.f32 %v4199_v14, %v4199_v14  ;;  %v6776_v29 = vld [vmem:[#allocation57_spill] sm:$0xff]  ;;  %v577_v23 = vmul.f32 %v6780_v38, %v6780_v38 }
 0x149   :  { %623 = vadd.xlane.f32.xlu0 %v622_v50  ;;  %v739_v25 = vsel %vm248_vm0, %v571_v24, 0.0  ;;  %v742_v3 = vsel %vm248_vm0, %v572_v6, 0.0  ;;  %v745_v63 = vsel %vm248_vm0, %v573_v36, 0.0 }
 0x14a   :  { %v4388_v44 = vpop.xlane.xlu0 %277  ;;  %626 = vadd.xlane.f32.xlu1 %v625_v54  ;;  %v748_v18 = vsel %vm248_vm0, %v574_v35, 0.0 }
 0x14b   :  { %v4393_v45 = vpop.xlane.xlu1 %280 }
 0x14d   :  { %629 = vadd.xlane.f32.xlu0 %v628_v55 }
 0x14e   :  { %v4398_v48 = vpop.xlane.xlu0 %283  ;;  %632 = vadd.xlane.f32.xlu1 %v631_v60 }
 0x14f   :  { %v4403_v50 = vpop.xlane.xlu1 %286 }
 0x151   :  { %635 = vadd.xlane.f32.xlu0 %v634_v61 }
 0x152   :  { %v4408_v54 = vpop.xlane.xlu0 %289  ;;  %638 = vadd.xlane.f32.xlu1 %v637_v0 }
 0x153   :  { %v4413_v55 = vpop.xlane.xlu1 %292 }
 0x155   :  { %641 = vadd.xlane.f32.xlu0 %v640_v2 }
 0x156   :  { %v4418_v60 = vpop.xlane.xlu0 %295  ;;  %644 = vadd.xlane.f32.xlu1 %v643_v26 }
 0x157   :  { %v4423_v61 = vpop.xlane.xlu1 %298 }
 0x159   :  { %647 = vadd.xlane.f32.xlu0 %v646_v30 }
 0x15a   :  { %v4428_v0 = vpop.xlane.xlu0 %301  ;;  %650 = vadd.xlane.f32.xlu1 %v649_v46 }
 0x15b   :  { %v4433_v2 = vpop.xlane.xlu1 %304 }
 0x15d   :  { %653 = vadd.xlane.f32.xlu0 %v652_v47 }
 0x15e   :  { %v4438_v26 = vpop.xlane.xlu0 %307  ;;  %656 = vadd.xlane.f32.xlu1 %v655_v57 }
 0x15f   :  { %v4443_v30 = vpop.xlane.xlu1 %310 }
 0x161   :  { %659 = vadd.xlane.f32.xlu0 %v658_v62 }
 0x162   :  { %v4448_v46 = vpop.xlane.xlu0 %313  ;;  %662 = vadd.xlane.f32.xlu1 %v661_v37 }
 0x163   :  { %v4453_v47 = vpop.xlane.xlu1 %316 }
 0x165   :  { %665 = vadd.xlane.f32.xlu0 %v664_v43 }
 0x166   :  { %v4458_v57 = vpop.xlane.xlu0 %319  ;;  %668 = vadd.xlane.f32.xlu1 %v667_v1 }
 0x167   :  { %v4463_v62 = vpop.xlane.xlu1 %322 }
 0x169   :  { %671 = vadd.xlane.f32.xlu0 %v670_v4 }
 0x16a   :  { %v4468_v37 = vpop.xlane.xlu0 %325  ;;  %674 = vadd.xlane.f32.xlu1 %v673_v56 }
 0x16b   :  { %v4473_v43 = vpop.xlane.xlu1 %328 }
 0x16d   :  { %677 = vadd.xlane.f32.xlu0 %v676_v40 }
 0x16e   :  { %v4478_v1 = vpop.xlane.xlu0 %331  ;;  %680 = vadd.xlane.f32.xlu1 %v679_v28 }
 0x16f   :  { %v4483_v4 = vpop.xlane.xlu1 %334 }
 0x171   :  { %683 = vadd.xlane.f32.xlu0 %v682_v49 }
 0x172   :  { %v4488_v56 = vpop.xlane.xlu0 %337  ;;  %686 = vadd.xlane.f32.xlu1 %v685_v17 }
 0x173   :  { %v4493_v40 = vpop.xlane.xlu1 %340 }
 0x175   :  { %689 = vadd.xlane.f32.xlu0 %v688_v33 }
 0x176   :  { %v4498_v28 = vpop.xlane.xlu0 %343  ;;  %692 = vadd.xlane.f32.xlu1 %v691_v15 }
 0x177   :  { %v4503_v49 = vpop.xlane.xlu1 %346 }
 0x179   :  { %695 = vadd.xlane.f32.xlu0 %v694_v11 }
 0x17a   :  { %v4508_v17 = vpop.xlane.xlu0 %349  ;;  %698 = vadd.xlane.f32.xlu1 %v697_v7 }
 0x17b   :  { %v4513_v33 = vpop.xlane.xlu1 %352 }
 0x17d   :  { %701 = vadd.xlane.f32.xlu0 %v700_v13 }
 0x17e   :  { %v4518_v15 = vpop.xlane.xlu0 %355  ;;  %704 = vadd.xlane.f32.xlu1 %v703_v22 }
 0x17f   :  { %v4523_v11 = vpop.xlane.xlu1 %358 }
 0x181   :  { %707 = vadd.xlane.f32.xlu0 %v706_v20 }
 0x182   :  { %v4528_v7 = vpop.xlane.xlu0 %361  ;;  %710 = vadd.xlane.f32.xlu1 %v709_v34 }
 0x183   :  { %v4533_v13 = vpop.xlane.xlu1 %364 }
 0x185   :  { %713 = vadd.xlane.f32.xlu0 %v712_v53 }
 0x186   :  { %v4538_v22 = vpop.xlane.xlu0 %367  ;;  %716 = vadd.xlane.f32.xlu1 %v715_v41 }
 0x187   :  { %v4543_v20 = vpop.xlane.xlu1 %370 }
 0x189   :  { %719 = vadd.xlane.f32.xlu0 %v718_v52 }
 0x18a   :  { %v4548_v34 = vpop.xlane.xlu0 %373  ;;  %722 = vadd.xlane.f32.xlu1 %v721_v58 }
 0x18b   :  { %v4553_v53 = vpop.xlane.xlu1 %376 }
 0x18d   :  { %725 = vadd.xlane.f32.xlu0 %v724_v59 }
 0x18e   :  { %v4558_v41 = vpop.xlane.xlu0 %379  ;;  %728 = vadd.xlane.f32.xlu1 %v727_v9 }
 0x18f   :  { %v4563_v52 = vpop.xlane.xlu1 %382 }
 0x191   :  { %731 = vadd.xlane.f32.xlu0 %v730_v42 }
 0x192   :  { %v4568_v58 = vpop.xlane.xlu0 %385  ;;  %734 = vadd.xlane.f32.xlu1 %v733_v32  ;;  %v575_v32 = vmul.f32 %v6776_v29, %v6776_v29  ;;  %v6782_v29 = vld [vmem:[#allocation62_spill] sm:$0xff] }
 0x193   :  { %6772 = vst [vmem:[#allocation84_spill] sm:$0xff] %v4568_v58  ;;  %v4573_v59 = vpop.xlane.xlu1 %388 }
 0x194   :  { %6773 = vst [vmem:[#allocation85_spill] sm:$0xff] %v4573_v59  ;;  %v751_v14 = vsel %vm248_vm0, %v575_v32, 0.0  ;;  %v4781_v59 = vmul.f32 0.020408163, %v4448_v46 }
 0x195   :  { %737 = vadd.xlane.f32.xlu0 %v736_v51  ;;  %v6778_v51 = vld [vmem:[#allocation60_spill] sm:$0xff] }
 0x196   :  { %v4578_v9 = vpop.xlane.xlu0 %391  ;;  %740 = vadd.xlane.f32.xlu1 %v739_v25  ;;  %v576_v25 = vmul.f32 %v6778_v51, %v6778_v51  ;;  %v757_v51 = vsel %vm248_vm0, %v577_v23, 0.0  ;;  %6819 = vst [vmem:[#allocation103_spill] sm:$0xff] %v4781_v59 }
 0x197   :  { %6774 = vst [vmem:[#allocation86_spill] sm:$0xff] %v4578_v9  ;;  %v4583_v42 = vpop.xlane.xlu1 %394  ;;  %v4778_v9 = vmul.f32 0.020408163, %v4443_v30  ;;  %v4798_v30 = vmul.f32 0.020408163, %v4453_v47 }
 0x198   :  { %6775 = vst [vmem:[#allocation87_spill] sm:$0xff] %v4583_v42 }
 0x199   :  { %743 = vadd.xlane.f32.xlu0 %v742_v3  ;;  %v754_v3 = vsel %vm248_vm0, %v576_v25, 0.0  ;;  %6818 = vst [vmem:[#allocation102_spill] sm:$0xff] %v4778_v9  ;;  %6821 = vst [vmem:[#allocation105_spill] sm:$0xff] %v4798_v30 }
 0x19a   :  { %v4588_v24 = vpop.xlane.xlu0 %397  ;;  %746 = vadd.xlane.f32.xlu1 %v745_v63  ;;  %v578_v63 = vmul.f32 %v6782_v29, %v6782_v29 }
 0x19b   :  { %6777 = vst [vmem:[#allocation57_spill] sm:$0xff] %v4588_v24  ;;  %v4593_v6 = vpop.xlane.xlu1 %400  ;;  %v4767_v24 = vmul.f32 0.020408163, %v4438_v26 }
 0x19c   :  { %6779 = vst [vmem:[#allocation60_spill] sm:$0xff] %v4593_v6  ;;  %v579_v6 = vmul.f32 %v6784_v12, %v6784_v12  ;;  %v760_v38 = vsel %vm248_vm0, %v578_v63, 0.0 }
 0x19d   :  { %749 = vadd.xlane.f32.xlu0 %v748_v18  ;;  %v6786_v18 = vld [vmem:[#allocation66_spill] sm:$0xff]  ;;  %6817 = vst [vmem:[#allocation101_spill] sm:$0xff] %v4767_v24  ;;  %v4816_v47 = vmul.f32 %v4767_v24, %v4767_v24 }
 0x19e   :  { %v4598_v36 = vpop.xlane.xlu0 %403  ;;  %752 = vadd.xlane.f32.xlu1 %v751_v14  ;;  %v580_v14 = vmul.f32 %v6786_v18, %v6786_v18  ;;  %v763_v29 = vsel %vm248_vm0, %v579_v6, 0.0 }
 0x19f   :  { %6781 = vst [vmem:[#allocation61_spill] sm:$0xff] %v4598_v36  ;;  %v4603_v35 = vpop.xlane.xlu1 %406  ;;  %v6788_v36 = vld [vmem:[#allocation67_spill] sm:$0xff] }
 0x1a0   :  { %6783 = vst [vmem:[#allocation62_spill] sm:$0xff] %v4603_v35  ;;  %v581_v35 = vmul.f32 %v6788_v36, %v6788_v36  ;;  %v766_v12 = vsel %vm248_vm0, %v580_v14, 0.0 }
 0x1a1   :  { %755 = vadd.xlane.f32.xlu0 %v754_v3  ;;  %v6790_v3 = vld [vmem:[#allocation70_spill] sm:$0xff] }
 0x1a2   :  { %v4608_v32 = vpop.xlane.xlu0 %409  ;;  %758 = vadd.xlane.f32.xlu1 %v757_v51  ;;  %v582_v51 = vmul.f32 %v6790_v3, %v6790_v3  ;;  %v769_v18 = vsel %vm248_vm0, %v581_v35, 0.0 }
 0x1a3   :  { %6785 = vst [vmem:[#allocation64_spill] sm:$0xff] %v4608_v32  ;;  %v4613_v25 = vpop.xlane.xlu1 %412  ;;  %v6792_v32 = vld [vmem:[#allocation71_spill] sm:$0xff] }
 0x1a4   :  { %6787 = vst [vmem:[#allocation66_spill] sm:$0xff] %v4613_v25  ;;  %v583_v25 = vmul.f32 %v6792_v32, %v6792_v32  ;;  %v772_v36 = vsel %vm248_vm0, %v582_v51, 0.0 }
 0x1a5   :  { %761 = vadd.xlane.f32.xlu0 %v760_v38  ;;  %v6794_v38 = vld [vmem:[#allocation73_spill] sm:$0xff] }
 0x1a6   :  { %v4618_v23 = vpop.xlane.xlu0 %415  ;;  %764 = vadd.xlane.f32.xlu1 %v763_v29  ;;  %v584_v29 = vmul.f32 %v6794_v38, %v6794_v38  ;;  %v775_v3 = vsel %vm248_vm0, %v583_v25, 0.0 }
 0x1a7   :  { %6789 = vst [vmem:[#allocation67_spill] sm:$0xff] %v4618_v23  ;;  %v4623_v63 = vpop.xlane.xlu1 %418  ;;  %v6796_v23 = vld [vmem:[#allocation74_spill] sm:$0xff] }
 0x1a8   :  { %6791 = vst [vmem:[#allocation70_spill] sm:$0xff] %v4623_v63  ;;  %v585_v63 = vmul.f32 %v6796_v23, %v6796_v23  ;;  %v778_v32 = vsel %vm248_vm0, %v584_v29, 0.0  ;;  %v6802_v29 = vld [vmem:[#allocation80_spill] sm:$0xff] }
 0x1a9   :  { %767 = vadd.xlane.f32.xlu0 %v766_v12  ;;  %v6798_v12 = vld [vmem:[#allocation76_spill] sm:$0xff] }
 0x1aa   :  { %v4628_v6 = vpop.xlane.xlu0 %421  ;;  %770 = vadd.xlane.f32.xlu1 %v769_v18  ;;  %v586_v18 = vmul.f32 %v6798_v12, %v6798_v12  ;;  %v781_v38 = vsel %vm248_vm0, %v585_v63, 0.0  ;;  %v4660_v63 = vmul.f32 0.020408163, %v4335_v5 }
 0x1ab   :  { %6793 = vst [vmem:[#allocation71_spill] sm:$0xff] %v4628_v6  ;;  %v4633_v14 = vpop.xlane.xlu1 %424  ;;  %v6800_v6 = vld [vmem:[#allocation77_spill] sm:$0xff] }
 0x1ac   :  { %6795 = vst [vmem:[#allocation73_spill] sm:$0xff] %v4633_v14  ;;  %v587_v14 = vmul.f32 %v6800_v6, %v6800_v6  ;;  %v784_v23 = vsel %vm248_vm0, %v586_v18, 0.0  ;;  %v4663_v6 = vmul.f32 0.020408163, %v4345_v16  ;;  %v4669_v18 = vmul.f32 0.020408163, %v4363_v21 }
 0x1ad   :  { %773 = vadd.xlane.f32.xlu0 %v772_v36  ;;  %v588_v36 = vmul.f32 %v4317_v8, %v4317_v8  ;;  %v4672_v8 = vmul.f32 0.020408163, %v4368_v27  ;;  %v4680_v16 = vmul.f32 0.020408163, %v4373_v31  ;;  %v4686_v21 = vmul.f32 %v4660_v63, %v4660_v63 }
 0x1ae   :  { %v4638_v35 = vpop.xlane.xlu0 %427  ;;  %776 = vadd.xlane.f32.xlu1 %v775_v3  ;;  %v4654_v3 = vmul.f32 0.020408163, %v6802_v29  ;;  %v4689_v27 = vmul.f32 0.020408163, %v4378_v10  ;;  %v4706_v29 = vmul.f32 0.020408163, %v4393_v45 }
 0x1af   :  { %6797 = vst [vmem:[#allocation74_spill] sm:$0xff] %v4638_v35  ;;  %v4643_v51 = vpop.xlane.xlu1 %430  ;;  %v4709_v10 = vmul.f32 0.020408163, %v4398_v48  ;;  %v4727_v45 = vmul.f32 %v4680_v16, %v4680_v16  ;;  %v4730_v48 = vmul.f32 0.020408163, %v4413_v55 }
 0x1b0   :  { %6799 = vst [vmem:[#allocation76_spill] sm:$0xff] %v4643_v51  ;;  %v787_v51 = vsel %vm248_vm0, %v587_v14, 0.0  ;;  %v790_v14 = vsel %vm248_vm0, %v588_v36, 0.0  ;;  %v861_v5 = vmul.f32 %v4654_v3, %v4654_v3  ;;  %v4699_v36 = vmul.f32 %v4663_v6, %v4663_v6  ;;  %6806 = vst [vmem:[#allocation90_spill] sm:$0xff] %v4706_v29 }
 0x1b1   :  { %779 = vadd.xlane.f32.xlu0 %v778_v32  ;;  %v4666_v32 = vmul.f32 0.020408163, %v4353_v19  ;;  %6807 = vst [vmem:[#allocation91_spill] sm:$0xff] %v4709_v10  ;;  %6811 = vst [vmem:[#allocation95_spill] sm:$0xff] %v4730_v48  ;;  %v4764_v35 = vmul.f32 0.020408163, %v4433_v2  ;;  %v4787_v2 = vmul.f32 %v4730_v48, %v4730_v48 }
 0x1b2   :  { %v4648_v25 = vpop.xlane.xlu0 %433  ;;  %782 = vadd.xlane.f32.xlu1 %v781_v38  ;;  %v4808_v48 = vmul.f32 0.020408163, %v4463_v62  ;;  %v4830_v62 = vmul.f32 %v4781_v59, %v4781_v59 }
 0x1b3   :  { %6801 = vst [vmem:[#allocation77_spill] sm:$0xff] %v4648_v25  ;;  %v4656_v12 = vpop.xlane.xlu1 %436  ;;  %v4703_v31 = vmul.f32 %v4666_v32, %v4666_v32  ;;  %v4736_v25 = vmul.f32 0.020408163, %v4423_v61  ;;  %v4757_v61 = vmul.f32 %v4706_v29, %v4706_v29  ;;  %6816 = vst [vmem:[#allocation100_spill] sm:$0xff] %v4764_v35  ;;  %v4812_v58 = vmul.f32 %v4764_v35, %v4764_v35 }
 0x1b4   :  { %6803 = vst [vmem:[#allocation80_spill] sm:$0xff] %v4656_v12  ;;  %6823 = vst [vmem:[#allocation107_spill] sm:$0xff] %v4808_v48  ;;  %v4843_v29 = vmul.f32 0.020408163, %v4488_v56  ;;  %v4862_v56 = vmul.f32 0.020408163, %v4493_v40 }
 0x1b5   :  { %785 = vadd.xlane.f32.xlu0 %v784_v23  ;;  %v4692_v23 = vmul.f32 0.020408163, %v4383_v39  ;;  %v4713_v39 = vmul.f32 %v4669_v18, %v4669_v18  ;;  %6813 = vst [vmem:[#allocation97_spill] sm:$0xff] %v4736_v25 }
 0x1b6   :  { %v4674_v38 = vpop.xlane.xlu0 %439  ;;  %788 = vadd.xlane.f32.xlu1 %v787_v51  ;;  %v4695_v51 = vmul.f32 0.020408163, %v4388_v44  ;;  %v862_v44 = vmul.f32 %v4672_v8, %v4672_v8  ;;  %6829 = vst [vmem:[#allocation113_spill] sm:$0xff] %v4843_v29  ;;  %6831 = vst [vmem:[#allocation115_spill] sm:$0xff] %v4862_v56  ;;  %v4878_v40 = vmul.f32 %v4843_v29, %v4843_v29 }
 0x1b7   :  { %6804 = vst [vmem:[#allocation88_spill] sm:$0xff] %v4674_v38  ;;  %v4682_v19 = vpop.xlane.xlu1 %442  ;;  %v4721_v38 = vmul.f32 0.020408163, %v4408_v54  ;;  %v4742_v54 = vmul.f32 %v4689_v27, %v4689_v27 }
 0x1b8   :  { %6805 = vst [vmem:[#allocation89_spill] sm:$0xff] %v4682_v19  ;;  %v4718_v19 = vmul.f32 0.020408163, %v4403_v50  ;;  %v4750_v55 = vmul.f32 %v4695_v51, %v4695_v51 }
 0x1b9   :  { %791 = vadd.xlane.f32.xlu0 %v790_v14  ;;  %6809 = vst [vmem:[#allocation93_spill] sm:$0xff] %v4721_v38  ;;  %v4733_v14 = vmul.f32 0.020408163, %v4418_v60  ;;  %v4753_v60 = vmul.f32 0.020408163, %v4428_v0  ;;  %v4775_v0 = vmul.f32 %v4721_v38, %v4721_v38  ;;  %v4795_v38 = vmul.f32 %v4736_v25, %v4736_v25 }
 0x1ba   :  { %6808 = vst [vmem:[#allocation92_spill] sm:$0xff] %v4718_v19  ;;  %v4723_v12 = vpop.xlane.xlu0 %445  ;;  %v4771_v42 = vmul.f32 %v4718_v19, %v4718_v19  ;;  %v4819_v25 = vmul.f32 0.020408163, %v4468_v37  ;;  %v4837_v37 = vmul.f32 %v4798_v30, %v4798_v30 }
 0x1bb   :  { %6810 = vst [vmem:[#allocation94_spill] sm:$0xff] %v4723_v12  ;;  %6812 = vst [vmem:[#allocation96_spill] sm:$0xff] %v4733_v14  ;;  %v4738_v50 = vpop.xlane.xlu1 %448  ;;  %v4746_v12 = vmul.f32 %v4692_v23, %v4692_v23  ;;  %v4791_v26 = vmul.f32 %v4733_v14, %v4733_v14  ;;  %v4802_v46 = vmul.f32 %v4753_v60, %v4753_v60 }
 0x1bc   :  { %6814 = vst [vmem:[#allocation98_spill] sm:$0xff] %v4738_v50  ;;  %6815 = vst [vmem:[#allocation99_spill] sm:$0xff] %v4753_v60  ;;  %v4761_v50 = vmul.f32 %v4709_v10, %v4709_v10  ;;  %v4822_v60 = vmul.f32 0.020408163, %v4473_v43  ;;  %v4840_v43 = vmul.f32 0.020408163, %v4483_v4  ;;  %v4855_v30 = vmul.f32 %v4819_v25, %v4819_v25 }
 0x1bd   :  { %6824 = vst [vmem:[#allocation108_spill] sm:$0xff] %v4819_v25 }
 0x1be   :  { %v4783_v10 = vpop.xlane.xlu0 %451  ;;  %6825 = vst [vmem:[#allocation109_spill] sm:$0xff] %v4822_v60  ;;  %6828 = vst [vmem:[#allocation112_spill] sm:$0xff] %v4840_v43  ;;  %v4859_v4 = vmul.f32 %v4822_v60, %v4822_v60 }
 0x1bf   :  { %6820 = vst [vmem:[#allocation104_spill] sm:$0xff] %v4783_v10  ;;  %v591_v19 = vpop.xlane.xlu1 %590  ;;  %v4805_v10 = vmul.f32 0.020408163, %v4458_v57  ;;  %v4826_v57 = vmul.f32 %v4778_v9, %v4778_v9  ;;  %6830 = vst [vmem:[#allocation114_spill] sm:$0xff] %v4855_v30  ;;  %v4874_v30 = vmul.f32 %v4840_v43, %v4840_v43 }
 0x1c0   :  { %v793_v14 = vmul.f32 0.020408163, %v591_v19  ;;  %v4833_v19 = vmul.f32 0.020408163, %v4478_v1  ;;  %v4851_v1 = vmul.f32 %v4808_v48, %v4808_v48  ;;  %v4869_v48 = vmul.f32 0.020408163, %v4498_v28 }
 0x1c1   :  { %6822 = vst [vmem:[#allocation106_spill] sm:$0xff] %v4805_v10  ;;  %6826 = vst [vmem:[#allocation110_spill] sm:$0xff] %v4826_v57  ;;  %v4847_v59 = vmul.f32 %v4805_v10, %v4805_v10 }
 0x1c2   :  { %6827 = vst [vmem:[#allocation111_spill] sm:$0xff] %v4833_v19  ;;  %v929_v35 = vsub.f32 %v793_v14, %v861_v5  ;;  %v594_v24 = vpop.xlane.xlu0 %593  ;;  %v4866_v10 = vmul.f32 %v4833_v19, %v4833_v19  ;;  %6832 = vst [vmem:[#allocation116_spill] sm:$0xff] %v4869_v48  ;;  %v4881_v19 = vmul.f32 0.020408163, %v4503_v49  ;;  %v4896_v49 = vmul.f32 0.020408163, %v4513_v33 }
 0x1c3   :  { %v794_v9 = vmul.f32 0.020408163, %v594_v24  ;;  %v597_v57 = vpop.xlane.xlu1 %596 }
 0x1c4   :  { %v997_v5 = vmax.f32 %v929_v35, 0.0  ;;  %v795_v14 = vmul.f32 0.020408163, %v597_v57  ;;  %6833 = vst [vmem:[#allocation117_spill] sm:$0xff] %v4896_v49 }
 0x1c5   :  { %v930_v24 = vsub.f32 %v794_v9, %v862_v44 }
 0x1c6   :  { %v1065_v35 = vadd.f32 1e-05, %v997_v5  ;;  %v931_v57 = vsub.f32 %v795_v14, %v4686_v21  ;;  %v600_v25 = vpop.xlane.xlu0 %599  ;;  %v4885_v21 = vmul.f32 %v4862_v56, %v4862_v56  ;;  %v4888_v14 = vmul.f32 0.020408163, %v4508_v17 }
 0x1c7   :  { %v998_v9 = vmax.f32 %v930_v24, 0.0  ;;  %v796_v44 = vmul.f32 0.020408163, %v600_v25  ;;  %v603_v60 = vpop.xlane.xlu1 %602  ;;  %v4893_v25 = vmul.f32 %v4869_v48, %v4869_v48 }
 0x1c8   :  { %3473 = vrsqrt.f32 %v1065_v35  ;;  %v999_v28 = vmax.f32 %v931_v57, 0.0  ;;  %v797_v5 = vmul.f32 0.020408163, %v603_v60  ;;  %v4900_v57 = vmul.f32 0.020408163, %v4518_v15 }
 0x1c9   :  { %v1066_v43 = vadd.f32 1e-05, %v998_v9  ;;  %v932_v29 = vsub.f32 %v796_v44, %v4699_v36  ;;  %v4904_v36 = vmul.f32 %v4881_v19, %v4881_v19  ;;  %v4908_v33 = vmul.f32 %v4888_v14, %v4888_v14 }
 0x1ca   :  { %v1067_v24 = vadd.f32 1e-05, %v999_v28  ;;  %v933_v60 = vsub.f32 %v797_v5, %v4703_v31  ;;  %v606_v35 = vpop.xlane.xlu0 %605  ;;  %6834 = vst [vmem:[#allocation118_spill] sm:$0xff] %v4900_v57  ;;  %v4911_v31 = vmul.f32 0.020408163, %v4523_v11 }
 0x1cb   :  { %3475 = vrsqrt.f32 %v1066_v43  ;;  %v1000_v17 = vmax.f32 %v932_v29, 0.0  ;;  %v798_v56 = vmul.f32 0.020408163, %v606_v35  ;;  %v609_v9 = vpop.xlane.xlu1 %608  ;;  %v4916_v29 = vmul.f32 %v4896_v49, %v4896_v49 }
 0x1cc   :  { %3477 = vrsqrt.f32 %v1067_v24  ;;  %v1001_v44 = vmax.f32 %v933_v60, 0.0  ;;  %v799_v48 = vmul.f32 0.020408163, %v609_v9  ;;  %6835 = vst [vmem:[#allocation119_spill] sm:$0xff] %v4911_v31  ;;  %v4919_v28 = vmul.f32 0.020408163, %v4528_v7 }
 0x1cd   :  { %v1068_v15 = vadd.f32 1e-05, %v1000_v17  ;;  %v934_v43 = vsub.f32 %v798_v56, %v4713_v39  ;;  %v4924_v35 = vmul.f32 %v4900_v57, %v4900_v57  ;;  %v4927_v39 = vmul.f32 0.020408163, %v4533_v13  ;;  %v6839_v57 = vld [vmem:[#allocation3_spill] sm:$0xff] }
 0x1ce   :  { %6836 = vst [vmem:[#allocation120_spill] sm:$0xff] %v4919_v28  ;;  %v1069_v5 = vadd.f32 1e-05, %v1001_v44  ;;  %v935_v24 = vsub.f32 %v799_v48, %v4727_v45  ;;  %v612_v60 = vpop.xlane.xlu0 %611  ;;  %v4931_v7 = vmul.f32 %v4911_v31, %v4911_v31  ;;  %v4934_v45 = vmul.f32 0.020408163, %v4538_v22 }
 0x1cf   :  { %3479 = vrsqrt.f32 %v1068_v15  ;;  %v1002_v11 = vmax.f32 %v934_v43, 0.0  ;;  %v800_v17 = vmul.f32 0.020408163, %v612_v60  ;;  %v615_v9 = vpop.xlane.xlu1 %614  ;;  %v4939_v43 = vmul.f32 %v4919_v28, %v4919_v28 }
 0x1d0   :  { %3481 = vrsqrt.f32 %v1069_v5  ;;  %v1003_v56 = vmax.f32 %v935_v24, 0.0  ;;  %v801_v49 = vmul.f32 0.020408163, %v615_v9  ;;  %6837 = vst [vmem:[#allocation121_spill] sm:$0xff] %v4934_v45  ;;  %v4942_v13 = vmul.f32 0.020408163, %v4543_v20 }
 0x1d1   :  { %v1070_v48 = vadd.f32 1e-05, %v1002_v11  ;;  %v936_v44 = vsub.f32 %v800_v17, %v4742_v54  ;;  %v4950_v54 = vmul.f32 %v4927_v39, %v4927_v39 }
 0x1d2   :  { %v3474_v15 = vpop.eup %3473  ;;  %6838 = vst [vmem:[#allocation122_spill] sm:$0xff] %v4942_v13  ;;  %v1071_v5 = vadd.f32 1e-05, %v1003_v56  ;;  %v937_v24 = vsub.f32 %v801_v49, %v4746_v12  ;;  %v618_v60 = vpop.xlane.xlu0 %617  ;;  %v4954_v56 = vmul.f32 %v4934_v45, %v4934_v45 }
 0x1d3   :  { %3483 = vrsqrt.f32 %v1070_v48  ;;  %v1004_v9 = vmax.f32 %v936_v44, 0.0  ;;  %v802_v31 = vmul.f32 0.020408163, %v618_v60  ;;  %v621_v22 = vpop.xlane.xlu1 %620  ;;  %v4946_v11 = vmul.f32 %v3474_v15, %v6839_v57 }
 0x1d4   :  { %3485 = vrsqrt.f32 %v1071_v5  ;;  %v1005_v17 = vmax.f32 %v937_v24, 0.0  ;;  %v803_v28 = vmul.f32 0.020408163, %v621_v22  ;;  %v4961_v15 = vmul.f32 %v4942_v13, %v4942_v13  ;;  %v6841_v22 = vld [vmem:[#allocation5_spill] sm:$0xff] }
 0x1d5   :  { %6840 = vst [vmem:[#allocation123_spill] sm:$0xff] %v4946_v11  ;;  %v3476_v20 = vpop.eup %3475  ;;  %v1072_v12 = vadd.f32 1e-05, %v1004_v9  ;;  %v938_v49 = vsub.f32 %v802_v31, %v4750_v55  ;;  %v1269_v48 = vmul.f32 %v4946_v11, %v4654_v3  ;;  %v6842_v3 = vld [vmem:[#allocation7_spill] sm:$0xff] }
 0x1d6   :  { %v3478_v44 = vpop.eup %3477  ;;  %v1073_v60 = vadd.f32 1e-05, %v1005_v17  ;;  %v939_v5 = vsub.f32 %v803_v28, %v4757_v61  ;;  %v624_v24 = vpop.xlane.xlu0 %623  ;;  %v4965_v57 = vmul.f32 %v3476_v20, %v6841_v22  ;;  %v4974_v17 = vmul.f32 0.020408163, %v4548_v34  ;;  %v6865_v22 = vld [vmem:[#allocation93_spill] sm:$0xff] }
 0x1d7   :  { %3487 = vrsqrt.f32 %v1072_v12  ;;  %v1006_v45 = vmax.f32 %v938_v49, 0.0  ;;  %v804_v9 = vmul.f32 0.020408163, %v624_v24  ;;  %1405 = vrot.lane.b32.xlu1 %v1269_v48, %s3677_s18  ;;  %v627_v55 = vpop.xlane.xlu1 %626  ;;  %v4969_v31 = vmul.f32 %v3478_v44, %v6842_v3  ;;  %v6843_v24 = vld [vmem:[#allocation9_spill] sm:$0xff] }
 0x1d8   :  { %3489 = vrsqrt.f32 %v1073_v60  ;;  %v1007_v11 = vmax.f32 %v939_v5, 0.0  ;;  %v805_v13 = vmul.f32 0.020408163, %v627_v55  ;;  %v1270_v61 = vmul.f32 %v4965_v57, %v4672_v8 }
 0x1d9   :  { %v3480_v28 = vpop.eup %3479  ;;  %v1074_v20 = vadd.f32 1e-05, %v1006_v45  ;;  %v940_v12 = vsub.f32 %v804_v9, %v4761_v50  ;;  %v1271_v49 = vmul.f32 %v4969_v31, %v4660_v63  ;;  %v4980_v44 = vmul.f32 0.020408163, %v4553_v53  ;;  %v6844_v63 = vld [vmem:[#allocation11_spill] sm:$0xff] }
 0x1da   :  { %v3482_v48 = vpop.eup %3481  ;;  %v1075_v60 = vadd.f32 1e-05, %v1007_v11  ;;  %v941_v5 = vsub.f32 %v805_v13, %v4771_v42  ;;  %1407 = vrot.lane.b32.xlu0 %v1270_v61, %s3677_s18  ;;  %v630_v8 = vpop.xlane.xlu0 %629  ;;  %v4985_v55 = vmul.f32 %v3480_v28, %v6843_v24 }
 0x1db   :  { %3491 = vrsqrt.f32 %v1074_v20  ;;  %v1008_v34 = vmax.f32 %v940_v12, 0.0  ;;  %v806_v45 = vmul.f32 0.020408163, %v630_v8  ;;  %1409 = vrot.lane.b32.xlu1 %v1271_v49, %s3677_s18  ;;  %v633_v50 = vpop.xlane.xlu1 %632  ;;  %v4989_v9 = vmul.f32 %v3482_v48, %v6844_v63  ;;  %v6845_v8 = vld [vmem:[#allocation13_spill] sm:$0xff] }
 0x1dc   :  { %3493 = vrsqrt.f32 %v1075_v60  ;;  %v1009_v53 = vmax.f32 %v941_v5, 0.0  ;;  %v807_v11 = vmul.f32 0.020408163, %v633_v50  ;;  %v1272_v42 = vmul.f32 %v4985_v55, %v4663_v6 }
 0x1dd   :  { %v3484_v13 = vpop.eup %3483  ;;  %v1076_v61 = vadd.f32 1e-05, %v1008_v34  ;;  %v942_v28 = vsub.f32 %v806_v45, %v4775_v0  ;;  %v1273_v20 = vmul.f32 %v4989_v9, %v4666_v32  ;;  %v4998_v49 = vmul.f32 %v4974_v17, %v4974_v17  ;;  %v6846_v45 = vld [vmem:[#allocation15_spill] sm:$0xff] }
 0x1de   :  { %v3486_v12 = vpop.eup %3485  ;;  %v1077_v48 = vadd.f32 1e-05, %v1009_v53  ;;  %v943_v60 = vsub.f32 %v807_v11, %v4787_v2  ;;  %v636_v5 = vpop.xlane.xlu0 %635  ;;  %v5002_v50 = vmul.f32 %v3484_v13, %v6845_v8  ;;  %v6649_v6 = vmov 0  }
 0x1df   :  { %3393 = vset.pattern.permute.xlu0 %v6649_v6  ;;  %3394 = vset.pattern.permute.xlu1 %v6649_v6  ;;  %3495 = vrsqrt.f32 %v1076_v61  ;;  %v1010_v0 = vmax.f32 %v942_v28, 0.0  ;;  %v808_v32 = vmul.f32 0.020408163, %v636_v5  ;;  %v639_v34 = vpop.xlane.xlu1 %638  ;;  %v5009_v53 = vmul.f32 %v3486_v12, %v6846_v45 }
 0x1e0   :  { %1411 = vrot.lane.b32.xlu1 %v1272_v42, %s3677_s18  ;;  %1413 = vrot.lane.b32.xlu0 %v1273_v20, %s3677_s18  ;;  %3497 = vrsqrt.f32 %v1077_v48  ;;  %v1011_v2 = vmax.f32 %v943_v60, 0.0  ;;  %v809_v11 = vmul.f32 0.020408163, %v639_v34  ;;  %v1274_v13 = vmul.f32 %v5002_v50, %v4669_v18  ;;  %v6847_v18 = vld [vmem:[#allocation17_spill] sm:$0xff] }
 0x1e1   :  { %v3488_v63 = vpop.eup %3487  ;;  %v5015_v61 = vmul.f32 %v4980_v44, %v4980_v44  ;;  %v1078_v28 = vadd.f32 1e-05, %v1010_v0  ;;  %v944_v42 = vsub.f32 %v808_v32, %v4791_v26  ;;  %v1275_v20 = vmul.f32 %v5009_v53, %v4680_v16  ;;  %v6848_v16 = vld [vmem:[#allocation19_spill] sm:$0xff] }
 0x1e2   :  { %v3490_v5 = vpop.eup %3489  ;;  %v5021_v12 = vmul.f32 0.020408163, %v4558_v41  ;;  %v1079_v48 = vadd.f32 1e-05, %v1011_v2  ;;  %v945_v60 = vsub.f32 %v809_v11, %v4795_v38  ;;  %v642_v34 = vpop.xlane.xlu0 %641  ;;  %v5025_v6 = vmul.f32 %v3488_v63, %v6847_v18 }
 0x1e3   :  { %3499 = vrsqrt.f32 %v1078_v28  ;;  %v1012_v45 = vmax.f32 %v944_v42, 0.0  ;;  %v810_v8 = vmul.f32 0.020408163, %v642_v34  ;;  %v645_v26 = vpop.xlane.xlu1 %644  ;;  %v5030_v0 = vmul.f32 %v3490_v5, %v6848_v16 }
 0x1e4   :  { %1415 = vrot.lane.b32.xlu1 %v1274_v13, %s3677_s18  ;;  %1417 = vrot.lane.b32.xlu0 %v1275_v20, %s3677_s18  ;;  %3501 = vrsqrt.f32 %v1079_v48  ;;  %v1013_v41 = vmax.f32 %v945_v60, 0.0  ;;  %v811_v32 = vmul.f32 0.020408163, %v645_v26  ;;  %v1276_v38 = vmul.f32 %v5025_v6, %v4689_v27  ;;  %v6849_v27 = vld [vmem:[#allocation21_spill] sm:$0xff] }
 0x1e5   :  { %v3492_v2 = vpop.eup %3491  ;;  %v5035_v63 = vmul.f32 0.020408163, %v4563_v52  ;;  %v1080_v11 = vadd.f32 1e-05, %v1012_v45  ;;  %v946_v28 = vsub.f32 %v810_v8, %v4802_v46  ;;  %v1277_v13 = vmul.f32 %v5030_v0, %v4692_v23  ;;  %v6850_v46 = vld [vmem:[#allocation22_spill] sm:$0xff] }
 0x1e6   :  { %v3494_v42 = vpop.eup %3493  ;;  %v5042_v20 = vmul.f32 %v5021_v12, %v5021_v12  ;;  %v1081_v5 = vadd.f32 1e-05, %v1013_v41  ;;  %v947_v48 = vsub.f32 %v811_v32, %v4812_v58  ;;  %v648_v60 = vpop.xlane.xlu0 %647  ;;  %v5046_v34 = vmul.f32 %v3492_v2, %v6849_v27 }
 0x1e7   :  { %3503 = vrsqrt.f32 %v1080_v11  ;;  %v1014_v52 = vmax.f32 %v946_v28, 0.0  ;;  %v812_v45 = vmul.f32 0.020408163, %v648_v60  ;;  %v651_v23 = vpop.xlane.xlu1 %650  ;;  %v5051_v8 = vmul.f32 %v3494_v42, %v6850_v46  ;;  %v6852_v28 = vld [vmem:[#allocation90_spill] sm:$0xff]  ;;  %v6853_v42 = vld [vmem:[#allocation84_spill] sm:$0xff] }
 0x1e8   :  { %1419 = vrot.lane.b32.xlu1 %v1276_v38, %s3677_s18  ;;  %1421 = vrot.lane.b32.xlu0 %v1277_v13, %s3677_s18  ;;  %3505 = vrsqrt.f32 %v1081_v5  ;;  %v1015_v26 = vmax.f32 %v947_v48, 0.0  ;;  %v813_v41 = vmul.f32 0.020408163, %v651_v23  ;;  %v1278_v58 = vmul.f32 %v5046_v34, %v4695_v51  ;;  %v6854_v48 = vld [vmem:[#allocation110_spill] sm:$0xff]  ;;  %v6855_v51 = vld [vmem:[#allocation24_spill] sm:$0xff] }
 0x1e9   :  { %6851 = vst [vmem:[#allocation124_spill] sm:$0xff] %v5051_v8  ;;  %v3496_v32 = vpop.eup %3495  ;;  %v5057_v2 = vmul.f32 %v5035_v63, %v5035_v63  ;;  %v1082_v11 = vadd.f32 1e-05, %v1014_v52  ;;  %v948_v38 = vsub.f32 %v812_v45, %v4816_v47  ;;  %v1279_v13 = vmul.f32 %v5051_v8, %v6852_v28  ;;  %v6856_v52 = vld [vmem:[#allocation26_spill] sm:$0xff] }
 0x1ea   :  { %v3498_v60 = vpop.eup %3497  ;;  %v5063_v27 = vmul.f32 0.020408163, %v6853_v42  ;;  %v1083_v5 = vadd.f32 1e-05, %v1015_v26  ;;  %v949_v23 = vsub.f32 %v813_v41, %v6854_v48  ;;  %v654_v46 = vpop.xlane.xlu0 %653  ;;  %v5067_v16 = vmul.f32 %v3496_v32, %v6855_v51  ;;  %v6858_v42 = vld [vmem:[#allocation91_spill] sm:$0xff]  ;;  %v6859_v32 = vld [vmem:[#allocation85_spill] sm:$0xff] }
 0x1eb   :  { %3507 = vrsqrt.f32 %v1082_v11  ;;  %v1016_v18 = vmax.f32 %v948_v38, 0.0  ;;  %v814_v3 = vmul.f32 0.020408163, %v654_v46  ;;  %v657_v47 = vpop.xlane.xlu1 %656  ;;  %v5072_v45 = vmul.f32 %v3498_v60, %v6856_v52 }
 0x1ec   :  { %1423 = vrot.lane.b32.xlu1 %v1278_v58, %s3677_s18  ;;  %1425 = vrot.lane.b32.xlu0 %v1279_v13, %s3677_s18  ;;  %3509 = vrsqrt.f32 %v1083_v5  ;;  %v1017_v28 = vmax.f32 %v949_v23, 0.0  ;;  %v815_v26 = vmul.f32 0.020408163, %v657_v47  ;;  %v1280_v41 = vmul.f32 %v5067_v16, %v6858_v42  ;;  %v6860_v58 = vld [vmem:[#allocation92_spill] sm:$0xff] }
 0x1ed   :  { %6857 = vst [vmem:[#allocation90_spill] sm:$0xff] %v5072_v45  ;;  %v3500_v48 = vpop.eup %3499  ;;  %v5077_v51 = vmul.f32 0.020408163, %v6859_v32  ;;  %v1084_v11 = vadd.f32 1e-05, %v1016_v18  ;;  %v950_v46 = vsub.f32 %v814_v3, %v4830_v62  ;;  %v1281_v38 = vmul.f32 %v5072_v45, %v6860_v58  ;;  %v6861_v42 = vld [vmem:[#allocation28_spill] sm:$0xff] }
 0x1ee   :  { %v3502_v13 = vpop.eup %3501  ;;  %v5084_v60 = vmul.f32 %v5063_v27, %v5063_v27  ;;  %v1085_v5 = vadd.f32 1e-05, %v1017_v28  ;;  %v951_v23 = vsub.f32 %v815_v26, %v4837_v37  ;;  %v660_v47 = vpop.xlane.xlu0 %659  ;;  %v5088_v52 = vmul.f32 %v3500_v48, %v6861_v42  ;;  %v6863_v3 = vld [vmem:[#allocation30_spill] sm:$0xff] }
 0x1ef   :  { %3511 = vrsqrt.f32 %v1084_v11  ;;  %v1018_v32 = vmax.f32 %v950_v46, 0.0  ;;  %v816_v18 = vmul.f32 0.020408163, %v660_v47  ;;  %v663_v62 = vpop.xlane.xlu1 %662  ;;  %v5093_v58 = vmul.f32 %v3502_v13, %v6863_v3  ;;  %v6866_v46 = vld [vmem:[#allocation95_spill] sm:$0xff]  ;;  %v6867_v13 = vld [vmem:[#allocation86_spill] sm:$0xff] }
 0x1f0   :  { %6862 = vst [vmem:[#allocation84_spill] sm:$0xff] %v5088_v52  ;;  %1427 = vrot.lane.b32.xlu1 %v1280_v41, %s3677_s18  ;;  %1429 = vrot.lane.b32.xlu0 %v1281_v38, %s3677_s18  ;;  %3513 = vrsqrt.f32 %v1085_v5  ;;  %v1019_v24 = vmax.f32 %v951_v23, 0.0  ;;  %v817_v28 = vmul.f32 0.020408163, %v663_v62  ;;  %v1282_v37 = vmul.f32 %v5088_v52, %v6865_v22  ;;  %v6868_v22 = vld [vmem:[#allocation32_spill] sm:$0xff] }
 0x1f1   :  { %6864 = vst [vmem:[#allocation110_spill] sm:$0xff] %v5093_v58  ;;  %v3504_v26 = vpop.eup %3503  ;;  %v5099_v48 = vmul.f32 %v5077_v51, %v5077_v51  ;;  %v1086_v11 = vadd.f32 1e-05, %v1018_v32  ;;  %v952_v41 = vsub.f32 %v816_v18, %v4847_v59  ;;  %v1283_v38 = vmul.f32 %v5093_v58, %v6866_v46  ;;  %v6870_v32 = vld [vmem:[#allocation34_spill] sm:$0xff] }
 0x1f2   :  { %v3506_v47 = vpop.eup %3505  ;;  %v5105_v42 = vmul.f32 0.020408163, %v6867_v13  ;;  %v1087_v5 = vadd.f32 1e-05, %v1019_v24  ;;  %v953_v23 = vsub.f32 %v817_v28, %v4851_v1  ;;  %v666_v62 = vpop.xlane.xlu0 %665  ;;  %v5109_v3 = vmul.f32 %v3504_v26, %v6868_v22  ;;  %v6872_v13 = vld [vmem:[#allocation96_spill] sm:$0xff]  ;;  %v6873_v26 = vld [vmem:[#allocation87_spill] sm:$0xff] }
 0x1f3   :  { %3515 = vrsqrt.f32 %v1086_v11  ;;  %v1020_v45 = vmax.f32 %v952_v41, 0.0  ;;  %v818_v52 = vmul.f32 0.020408163, %v666_v62  ;;  %v669_v59 = vpop.xlane.xlu1 %668  ;;  %v5114_v18 = vmul.f32 %v3506_v47, %v6870_v32  ;;  %v6874_v41 = vld [vmem:[#allocation114_spill] sm:$0xff] }
 0x1f4   :  { %6869 = vst [vmem:[#allocation91_spill] sm:$0xff] %v5109_v3  ;;  %1431 = vrot.lane.b32.xlu1 %v1282_v37, %s3677_s18  ;;  %1433 = vrot.lane.b32.xlu0 %v1283_v38, %s3677_s18  ;;  %3517 = vrsqrt.f32 %v1087_v5  ;;  %v1021_v46 = vmax.f32 %v953_v23, 0.0  ;;  %v819_v24 = vmul.f32 0.020408163, %v669_v59  ;;  %v1284_v1 = vmul.f32 %v5109_v3, %v6872_v13  ;;  %v6875_v37 = vld [vmem:[#allocation97_spill] sm:$0xff]  ;;  %v6876_v13 = vld [vmem:[#allocation36_spill] sm:$0xff] }
 0x1f5   :  { %6871 = vst [vmem:[#allocation85_spill] sm:$0xff] %v5114_v18  ;;  %v3508_v28 = vpop.eup %3507  ;;  %v5119_v22 = vmul.f32 0.020408163, %v6873_v26  ;;  %v1088_v11 = vadd.f32 1e-05, %v1020_v45  ;;  %v954_v62 = vsub.f32 %v818_v52, %v6874_v41  ;;  %v1285_v38 = vmul.f32 %v5114_v18, %v6875_v37  ;;  %v6878_v41 = vld [vmem:[#allocation38_spill] sm:$0xff] }
 0x1f6   :  { %v3510_v58 = vpop.eup %3509  ;;  %v5126_v47 = vmul.f32 %v5105_v42, %v5105_v42  ;;  %v1089_v5 = vadd.f32 1e-05, %v1021_v46  ;;  %v955_v23 = vsub.f32 %v819_v24, %v4859_v4  ;;  %v672_v59 = vpop.xlane.xlu0 %671  ;;  %v5130_v32 = vmul.f32 %v3508_v28, %v6876_v13  ;;  %v6880_v3 = vld [vmem:[#allocation99_spill] sm:$0xff] }
 0x1f7   :  { %3519 = vrsqrt.f32 %v1088_v11  ;;  %v1022_v26 = vmax.f32 %v954_v62, 0.0  ;;  %v820_v45 = vmul.f32 0.020408163, %v672_v59  ;;  %v675_v52 = vpop.xlane.xlu1 %674  ;;  %v5135_v37 = vmul.f32 %v3510_v58, %v6878_v41  ;;  %v6881_v62 = vld [vmem:[#allocation100_spill] sm:$0xff]  ;;  %v6882_v58 = vld [vmem:[#allocation57_spill] sm:$0xff] }
 0x1f8   :  { %6877 = vst [vmem:[#allocation92_spill] sm:$0xff] %v5130_v32  ;;  %1435 = vrot.lane.b32.xlu1 %v1284_v1, %s3677_s18  ;;  %1437 = vrot.lane.b32.xlu0 %v1285_v38, %s3677_s18  ;;  %3521 = vrsqrt.f32 %v1089_v5  ;;  %v1023_v18 = vmax.f32 %v955_v23, 0.0  ;;  %v821_v46 = vmul.f32 0.020408163, %v675_v52  ;;  %v1286_v4 = vmul.f32 %v5130_v32, %v6880_v3  ;;  %v6883_v3 = vld [vmem:[#allocation40_spill] sm:$0xff] }
 0x1f9   :  { %6879 = vst [vmem:[#allocation93_spill] sm:$0xff] %v5135_v37  ;;  %v3512_v24 = vpop.eup %3511  ;;  %v5141_v28 = vmul.f32 %v5119_v22, %v5119_v22  ;;  %v1090_v11 = vadd.f32 1e-05, %v1022_v26  ;;  %v956_v1 = vsub.f32 %v820_v45, %v4866_v10  ;;  %v1287_v38 = vmul.f32 %v5135_v37, %v6881_v62  ;;  %v6885_v26 = vld [vmem:[#allocation42_spill] sm:$0xff]  ;;  %v6894_v37 = vld [vmem:[#allocation103_spill] sm:$0xff] }
 0x1fa   :  { %v3514_v59 = vpop.eup %3513  ;;  %v5147_v13 = vmul.f32 0.020408163, %v6882_v58  ;;  %v1091_v5 = vadd.f32 1e-05, %v1023_v18  ;;  %v957_v23 = vsub.f32 %v821_v46, %v4874_v30  ;;  %v678_v52 = vpop.xlane.xlu0 %677  ;;  %v5151_v41 = vmul.f32 %v3512_v24, %v6883_v3  ;;  %v6887_v58 = vld [vmem:[#allocation101_spill] sm:$0xff]  ;;  %v6888_v24 = vld [vmem:[#allocation60_spill] sm:$0xff] }
 0x1fb   :  { %3523 = vrsqrt.f32 %v1090_v11  ;;  %v1024_v32 = vmax.f32 %v956_v1, 0.0  ;;  %v822_v8 = vmul.f32 0.020408163, %v678_v52  ;;  %v681_v10 = vpop.xlane.xlu1 %680  ;;  %v5156_v45 = vmul.f32 %v3514_v59, %v6885_v26 }
 0x1fc   :  { %6884 = vst [vmem:[#allocation95_spill] sm:$0xff] %v5151_v41  ;;  %1439 = vrot.lane.b32.xlu1 %v1286_v4, %s3677_s18  ;;  %1441 = vrot.lane.b32.xlu0 %v1287_v38, %s3677_s18  ;;  %3525 = vrsqrt.f32 %v1091_v5  ;;  %v1025_v62 = vmax.f32 %v957_v23, 0.0  ;;  %v823_v18 = vmul.f32 0.020408163, %v681_v10  ;;  %v1288_v30 = vmul.f32 %v5151_v41, %v6887_v58  ;;  %v6889_v4 = vld [vmem:[#allocation102_spill] sm:$0xff]  ;;  %v6890_v58 = vld [vmem:[#allocation44_spill] sm:$0xff] }
 0x1fd   :  { %6886 = vst [vmem:[#allocation86_spill] sm:$0xff] %v5156_v45  ;;  %v3516_v46 = vpop.eup %3515  ;;  %v5161_v3 = vmul.f32 0.020408163, %v6888_v24  ;;  %v1092_v11 = vadd.f32 1e-05, %v1024_v32  ;;  %v958_v1 = vsub.f32 %v822_v8, %v4878_v40  ;;  %v1289_v38 = vmul.f32 %v5156_v45, %v6889_v4  ;;  %v6892_v8 = vld [vmem:[#allocation46_spill] sm:$0xff] }
 0x1fe   :  { %v3518_v52 = vpop.eup %3517  ;;  %v5168_v59 = vmul.f32 %v5147_v13, %v5147_v13  ;;  %v1093_v5 = vadd.f32 1e-05, %v1025_v62  ;;  %v959_v23 = vsub.f32 %v823_v18, %v4885_v21  ;;  %v684_v10 = vpop.xlane.xlu0 %683  ;;  %v5172_v26 = vmul.f32 %v3516_v46, %v6890_v58 }
 0x1ff   :  { %3527 = vrsqrt.f32 %v1092_v11  ;;  %v1026_v24 = vmax.f32 %v958_v1, 0.0  ;;  %v824_v32 = vmul.f32 0.020408163, %v684_v10  ;;  %v687_v40 = vpop.xlane.xlu1 %686  ;;  %v5177_v4 = vmul.f32 %v3518_v52, %v6892_v8  ;;  %v6895_v1 = vld [vmem:[#allocation105_spill] sm:$0xff] }
 0x200   :  { %6891 = vst [vmem:[#allocation96_spill] sm:$0xff] %v5172_v26  ;;  %1443 = vrot.lane.b32.xlu1 %v1288_v30, %s3677_s18  ;;  %1445 = vrot.lane.b32.xlu0 %v1289_v38, %s3677_s18  ;;  %3529 = vrsqrt.f32 %v1093_v5  ;;  %v1027_v45 = vmax.f32 %v959_v23, 0.0  ;;  %v825_v62 = vmul.f32 0.020408163, %v687_v40  ;;  %v1290_v21 = vmul.f32 %v5172_v26, %v6894_v37  ;;  %v6896_v52 = vld [vmem:[#allocation61_spill] sm:$0xff]  ;;  %v6897_v37 = vld [vmem:[#allocation48_spill] sm:$0xff] }
 0x201   :  { %6893 = vst [vmem:[#allocation87_spill] sm:$0xff] %v5177_v4  ;;  %v3520_v18 = vpop.eup %3519  ;;  %v5183_v46 = vmul.f32 %v5161_v3, %v5161_v3  ;;  %v1094_v11 = vadd.f32 1e-05, %v1026_v24  ;;  %v960_v30 = vsub.f32 %v824_v32, %v4893_v25  ;;  %v1291_v38 = vmul.f32 %v5177_v4, %v6895_v1  ;;  %v6899_v24 = vld [vmem:[#allocation50_spill] sm:$0xff]  ;;  %v6908_v4 = vld [vmem:[#allocation108_spill] sm:$0xff] }
 0x202   :  { %v3522_v10 = vpop.eup %3521  ;;  %v5189_v8 = vmul.f32 0.020408163, %v6896_v52  ;;  %v1095_v5 = vadd.f32 1e-05, %v1027_v45  ;;  %v961_v23 = vsub.f32 %v825_v62, %v4904_v36  ;;  %v690_v40 = vpop.xlane.xlu0 %689  ;;  %v5193_v58 = vmul.f32 %v3520_v18, %v6897_v37  ;;  %v6901_v52 = vld [vmem:[#allocation106_spill] sm:$0xff] }
 0x203   :  { %3531 = vrsqrt.f32 %v1094_v11  ;;  %v1028_v26 = vmax.f32 %v960_v30, 0.0  ;;  %v826_v41 = vmul.f32 0.020408163, %v690_v40  ;;  %v693_v25 = vpop.xlane.xlu1 %692  ;;  %v5198_v32 = vmul.f32 %v3522_v10, %v6899_v24  ;;  %v6902_v18 = vld [vmem:[#allocation62_spill] sm:$0xff] }
 0x204   :  { %6898 = vst [vmem:[#allocation114_spill] sm:$0xff] %v5193_v58  ;;  %1447 = vrot.lane.b32.xlu1 %v1290_v21, %s3677_s18  ;;  %1449 = vrot.lane.b32.xlu0 %v1291_v38, %s3677_s18  ;;  %3533 = vrsqrt.f32 %v1095_v5  ;;  %v1029_v1 = vmax.f32 %v961_v23, 0.0  ;;  %v827_v45 = vmul.f32 0.020408163, %v693_v25  ;;  %v1292_v36 = vmul.f32 %v5193_v58, %v6901_v52  ;;  %v6903_v21 = vld [vmem:[#allocation107_spill] sm:$0xff]  ;;  %v6904_v52 = vld [vmem:[#allocation52_spill] sm:$0xff] }
 0x205   :  { %6900 = vst [vmem:[#allocation97_spill] sm:$0xff] %v5198_v32  ;;  %v3524_v62 = vpop.eup %3523  ;;  %v5203_v37 = vmul.f32 0.020408163, %v6902_v18  ;;  %v1096_v11 = vadd.f32 1e-05, %v1028_v26  ;;  %v962_v30 = vsub.f32 %v826_v41, %v4908_v33  ;;  %v1293_v38 = vmul.f32 %v5198_v32, %v6903_v21  ;;  %v6906_v41 = vld [vmem:[#allocation54_spill] sm:$0xff] }
 0x206   :  { %v3526_v40 = vpop.eup %3525  ;;  %v5210_v10 = vmul.f32 %v5189_v8, %v5189_v8  ;;  %v1097_v5 = vadd.f32 1e-05, %v1029_v1  ;;  %v963_v23 = vsub.f32 %v827_v45, %v4916_v29  ;;  %v696_v25 = vpop.xlane.xlu0 %695  ;;  %v5214_v24 = vmul.f32 %v3524_v62, %v6904_v52 }
 0x207   :  { %3535 = vrsqrt.f32 %v1096_v11  ;;  %v1030_v18 = vmax.f32 %v962_v30, 0.0  ;;  %v828_v26 = vmul.f32 0.020408163, %v696_v25  ;;  %v699_v33 = vpop.xlane.xlu1 %698  ;;  %v5219_v21 = vmul.f32 %v3526_v40, %v6906_v41  ;;  %v6909_v30 = vld [vmem:[#allocation109_spill] sm:$0xff]  ;;  %v6910_v40 = vld [vmem:[#allocation64_spill] sm:$0xff] }
 0x208   :  { %6905 = vst [vmem:[#allocation99_spill] sm:$0xff] %v5214_v24  ;;  %1451 = vrot.lane.b32.xlu1 %v1292_v36, %s3677_s18  ;;  %1453 = vrot.lane.b32.xlu0 %v1293_v38, %s3677_s18  ;;  %3537 = vrsqrt.f32 %v1097_v5  ;;  %v1031_v32 = vmax.f32 %v963_v23, 0.0  ;;  %v829_v1 = vmul.f32 0.020408163, %v699_v33  ;;  %v1294_v29 = vmul.f32 %v5214_v24, %v6908_v4  ;;  %v6911_v4 = vld [vmem:[#allocation56_spill] sm:$0xff] }
 0x209   :  { %6907 = vst [vmem:[#allocation100_spill] sm:$0xff] %v5219_v21  ;;  %v3528_v45 = vpop.eup %3527  ;;  %v5225_v62 = vmul.f32 %v5203_v37, %v5203_v37  ;;  %v1098_v11 = vadd.f32 1e-05, %v1030_v18  ;;  %v964_v36 = vsub.f32 %v828_v26, %v4924_v35  ;;  %v1295_v38 = vmul.f32 %v5219_v21, %v6909_v30  ;;  %v6913_v18 = vld [vmem:[#allocation59_spill] sm:$0xff]  ;;  %v6922_v21 = vld [vmem:[#allocation113_spill] sm:$0xff] }
 0x20a   :  { %v3530_v25 = vpop.eup %3529  ;;  %v5231_v41 = vmul.f32 0.020408163, %v6910_v40  ;;  %v1099_v5 = vadd.f32 1e-05, %v1031_v32  ;;  %v965_v23 = vsub.f32 %v829_v1, %v4931_v7  ;;  %v702_v33 = vpop.xlane.xlu0 %701  ;;  %v5235_v52 = vmul.f32 %v3528_v45, %v6911_v4  ;;  %v6915_v40 = vld [vmem:[#allocation111_spill] sm:$0xff]  ;;  %v6916_v45 = vld [vmem:[#allocation66_spill] sm:$0xff] }
 0x20b   :  { %3539 = vrsqrt.f32 %v1098_v11  ;;  %v1032_v24 = vmax.f32 %v964_v36, 0.0  ;;  %v830_v58 = vmul.f32 0.020408163, %v702_v33  ;;  %v705_v35 = vpop.xlane.xlu1 %704  ;;  %v5240_v26 = vmul.f32 %v3530_v25, %v6913_v18 }
 0x20c   :  { %6912 = vst [vmem:[#allocation57_spill] sm:$0xff] %v5235_v52  ;;  %1455 = vrot.lane.b32.xlu1 %v1294_v29, %s3677_s18  ;;  %1457 = vrot.lane.b32.xlu0 %v1295_v38, %s3677_s18  ;;  %3541 = vrsqrt.f32 %v1099_v5  ;;  %v1033_v30 = vmax.f32 %v965_v23, 0.0  ;;  %v831_v32 = vmul.f32 0.020408163, %v705_v35  ;;  %v1296_v7 = vmul.f32 %v5235_v52, %v6915_v40  ;;  %v6917_v29 = vld [vmem:[#allocation112_spill] sm:$0xff]  ;;  %v6918_v40 = vld [vmem:[#allocation65_spill] sm:$0xff] }
 0x20d   :  { %6914 = vst [vmem:[#allocation101_spill] sm:$0xff] %v5240_v26  ;;  %v3532_v1 = vpop.eup %3531  ;;  %v5245_v4 = vmul.f32 0.020408163, %v6916_v45  ;;  %v1100_v11 = vadd.f32 1e-05, %v1032_v24  ;;  %v966_v36 = vsub.f32 %v830_v58, %v4939_v43  ;;  %v1297_v38 = vmul.f32 %v5240_v26, %v6917_v29  ;;  %v6920_v58 = vld [vmem:[#allocation69_spill] sm:$0xff] }
 0x20e   :  { %v3534_v33 = vpop.eup %3533  ;;  %v5252_v25 = vmul.f32 %v5231_v41, %v5231_v41  ;;  %v1101_v5 = vadd.f32 1e-05, %v1033_v30  ;;  %v967_v23 = vsub.f32 %v831_v32, %v4950_v54  ;;  %v708_v35 = vpop.xlane.xlu0 %707  ;;  %v5256_v18 = vmul.f32 %v3532_v1, %v6918_v40 }
 0x20f   :  { %3543 = vrsqrt.f32 %v1100_v11  ;;  %v1034_v45 = vmax.f32 %v966_v36, 0.0  ;;  %v832_v24 = vmul.f32 0.020408163, %v708_v35  ;;  %v711_v43 = vpop.xlane.xlu1 %710  ;;  %v5261_v29 = vmul.f32 %v3534_v33, %v6920_v58  ;;  %v6923_v36 = vld [vmem:[#allocation115_spill] sm:$0xff] }
 0x210   :  { %6919 = vst [vmem:[#allocation60_spill] sm:$0xff] %v5256_v18  ;;  %1459 = vrot.lane.b32.xlu1 %v1296_v7, %s3677_s18  ;;  %1461 = vrot.lane.b32.xlu0 %v1297_v38, %s3677_s18  ;;  %3545 = vrsqrt.f32 %v1101_v5  ;;  %v1035_v26 = vmax.f32 %v967_v23, 0.0  ;;  %v833_v30 = vmul.f32 0.020408163, %v711_v43  ;;  %v1298_v54 = vmul.f32 %v5256_v18, %v6922_v21  ;;  %v6924_v33 = vld [vmem:[#allocation67_spill] sm:$0xff] }
 0x211   :  { %6921 = vst [vmem:[#allocation102_spill] sm:$0xff] %v5261_v29  ;;  %v3536_v32 = vpop.eup %3535  ;;  %v5267_v1 = vmul.f32 %v5245_v4, %v5245_v4  ;;  %v1102_v11 = vadd.f32 1e-05, %v1034_v45  ;;  %v968_v7 = vsub.f32 %v832_v24, %v4954_v56  ;;  %v1299_v38 = vmul.f32 %v5261_v29, %v6923_v36  ;;  %v6925_v21 = vld [vmem:[#allocation75_spill] sm:$0xff]  ;;  %v6926_v45 = vld [vmem:[#allocation2_spill] sm:$0xff] }
 0x212   :  { %v3538_v35 = vpop.eup %3537  ;;  %v5273_v58 = vmul.f32 0.020408163, %v6924_v33  ;;  %v1103_v5 = vadd.f32 1e-05, %v1035_v26  ;;  %v969_v23 = vsub.f32 %v833_v30, %v4961_v15  ;;  %v714_v43 = vpop.xlane.xlu0 %713  ;;  %v5277_v40 = vmul.f32 %v3536_v32, %v6925_v21  ;;  %v6928_v33 = vld [vmem:[#allocation116_spill] sm:$0xff]  ;;  %v6929_v32 = vld [vmem:[#allocation70_spill] sm:$0xff] }
 0x213   :  { %3547 = vrsqrt.f32 %v1102_v11  ;;  %v1036_v18 = vmax.f32 %v968_v7, 0.0  ;;  %v834_v52 = vmul.f32 0.020408163, %v714_v43  ;;  %v717_v56 = vpop.xlane.xlu1 %716  ;;  %v5282_v24 = vmul.f32 %v3538_v35, %v6926_v45 }
 0x214   :  { %1463 = vrot.lane.b32.xlu1 %v1298_v54, %s3677_s18  ;;  %1465 = vrot.lane.b32.xlu0 %v1299_v38, %s3677_s18  ;;  %3549 = vrsqrt.f32 %v1103_v5  ;;  %v1037_v36 = vmax.f32 %v969_v23, 0.0  ;;  %v835_v26 = vmul.f32 0.020408163, %v717_v56  ;;  %v1300_v15 = vmul.f32 %v5277_v40, %v6928_v33  ;;  %v6930_v56 = vld [vmem:[#allocation4_spill] sm:$0xff] }
 0x215   :  { %6927 = vst [vmem:[#allocation103_spill] sm:$0xff] %v5282_v24  ;;  %v3540_v30 = vpop.eup %3539  ;;  %v5287_v21 = vmul.f32 0.020408163, %v6929_v32  ;;  %v1104_v11 = vadd.f32 1e-05, %v1036_v18  ;;  %v970_v7 = vsub.f32 %v834_v52, %v4998_v49  ;;  %v1301_v54 = vmul.f32 %v5282_v24, %v4881_v19  ;;  %v6931_v49 = vld [vmem:[#allocation6_spill] sm:$0xff] }
 0x216   :  { %v3542_v38 = vpop.eup %3541  ;;  %v5294_v35 = vmul.f32 %v5273_v58, %v5273_v58  ;;  %v1105_v5 = vadd.f32 1e-05, %v1037_v36  ;;  %v971_v23 = vsub.f32 %v835_v26, %v5015_v61  ;;  %v720_v43 = vpop.xlane.xlu0 %719  ;;  %v5298_v33 = vmul.f32 %v3540_v30, %v6930_v56 }
 0x217   :  { %3551 = vrsqrt.f32 %v1104_v11  ;;  %v1038_v32 = vmax.f32 %v970_v7, 0.0  ;;  %v836_v18 = vmul.f32 0.020408163, %v720_v43  ;;  %v723_v19 = vpop.xlane.xlu1 %722  ;;  %v5303_v52 = vmul.f32 %v3542_v38, %v6931_v49  ;;  %v6933_v7 = vld [vmem:[#allocation117_spill] sm:$0xff]  ;;  %v6934_v38 = vld [vmem:[#allocation71_spill] sm:$0xff] }
 0x218   :  { %1467 = vrot.lane.b32.xlu1 %v1300_v15, %s3677_s18  ;;  %1469 = vrot.lane.b32.xlu0 %v1301_v54, %s3677_s18  ;;  %3553 = vrsqrt.f32 %v1105_v5  ;;  %v1039_v45 = vmax.f32 %v971_v23, 0.0  ;;  %v837_v36 = vmul.f32 0.020408163, %v723_v19  ;;  %v1302_v61 = vmul.f32 %v5298_v33, %v4888_v14  ;;  %v6935_v14 = vld [vmem:[#allocation8_spill] sm:$0xff] }
 0x219   :  { %6932 = vst [vmem:[#allocation105_spill] sm:$0xff] %v5303_v52  ;;  %v3544_v26 = vpop.eup %3543  ;;  %v5309_v30 = vmul.f32 %v5287_v21, %v5287_v21  ;;  %v1106_v11 = vadd.f32 1e-05, %v1038_v32  ;;  %v972_v15 = vsub.f32 %v836_v18, %v5042_v20  ;;  %v1303_v54 = vmul.f32 %v5303_v52, %v6933_v7  ;;  %v6936_v32 = vld [vmem:[#allocation10_spill] sm:$0xff]  ;;  %v6945_v52 = vld [vmem:[#allocation120_spill] sm:$0xff] }
 0x21a   :  { %v3546_v43 = vpop.eup %3545  ;;  %v5315_v49 = vmul.f32 0.020408163, %v6934_v38  ;;  %v1107_v5 = vadd.f32 1e-05, %v1039_v45  ;;  %v973_v23 = vsub.f32 %v837_v36, %v5057_v2  ;;  %v726_v19 = vpop.xlane.xlu0 %725  ;;  %v5319_v56 = vmul.f32 %v3544_v26, %v6935_v14  ;;  %v6938_v38 = vld [vmem:[#allocation118_spill] sm:$0xff]  ;;  %v6939_v26 = vld [vmem:[#allocation73_spill] sm:$0xff] }
 0x21b   :  { %3555 = vrsqrt.f32 %v1106_v11  ;;  %v1040_v24 = vmax.f32 %v972_v15, 0.0  ;;  %v838_v29 = vmul.f32 0.020408163, %v726_v19  ;;  %v729_v20 = vpop.xlane.xlu1 %728  ;;  %v5324_v18 = vmul.f32 %v3546_v43, %v6936_v32 }
 0x21c   :  { %1471 = vrot.lane.b32.xlu1 %v1302_v61, %s3677_s18  ;;  %1473 = vrot.lane.b32.xlu0 %v1303_v54, %s3677_s18  ;;  %3557 = vrsqrt.f32 %v1107_v5  ;;  %v1041_v7 = vmax.f32 %v973_v23, 0.0  ;;  %v839_v45 = vmul.f32 0.020408163, %v729_v20  ;;  %v1304_v2 = vmul.f32 %v5319_v56, %v6938_v38  ;;  %v6940_v61 = vld [vmem:[#allocation119_spill] sm:$0xff]  ;;  %v6941_v38 = vld [vmem:[#allocation12_spill] sm:$0xff] }
 0x21d   :  { %6937 = vst [vmem:[#allocation61_spill] sm:$0xff] %v5324_v18  ;;  %v3548_v36 = vpop.eup %3547  ;;  %v5329_v14 = vmul.f32 0.020408163, %v6939_v26  ;;  %v1108_v11 = vadd.f32 1e-05, %v1040_v24  ;;  %v974_v15 = vsub.f32 %v838_v29, %v5084_v60  ;;  %v1305_v54 = vmul.f32 %v5324_v18, %v6940_v61  ;;  %v6943_v29 = vld [vmem:[#allocation14_spill] sm:$0xff] }
 0x21e   :  { %v3550_v19 = vpop.eup %3549  ;;  %v5336_v43 = vmul.f32 %v5315_v49, %v5315_v49  ;;  %v1109_v5 = vadd.f32 1e-05, %v1041_v7  ;;  %v975_v23 = vsub.f32 %v839_v45, %v5099_v48  ;;  %v732_v20 = vpop.xlane.xlu0 %731  ;;  %v5340_v32 = vmul.f32 %v3548_v36, %v6941_v38 }
 0x21f   :  { %3559 = vrsqrt.f32 %v1108_v11  ;;  %v1042_v26 = vmax.f32 %v974_v15, 0.0  ;;  %v840_v24 = vmul.f32 0.020408163, %v732_v20  ;;  %v735_v60 = vpop.xlane.xlu1 %734  ;;  %v5345_v61 = vmul.f32 %v3550_v19, %v6943_v29  ;;  %v6946_v19 = vld [vmem:[#allocation74_spill] sm:$0xff] }
 0x220   :  { %6942 = vst [vmem:[#allocation106_spill] sm:$0xff] %v5340_v32  ;;  %1475 = vrot.lane.b32.xlu1 %v1304_v2, %s3677_s18  ;;  %1477 = vrot.lane.b32.xlu0 %v1305_v54, %s3677_s18  ;;  %3561 = vrsqrt.f32 %v1109_v5  ;;  %v1043_v18 = vmax.f32 %v975_v23, 0.0  ;;  %v841_v7 = vmul.f32 0.020408163, %v735_v60  ;;  %v1306_v48 = vmul.f32 %v5340_v32, %v6945_v52  ;;  %v6947_v52 = vld [vmem:[#allocation16_spill] sm:$0xff] }
 0x221   :  { %6944 = vst [vmem:[#allocation62_spill] sm:$0xff] %v5345_v61  ;;  %v3552_v45 = vpop.eup %3551  ;;  %v5351_v36 = vmul.f32 %v5329_v14, %v5329_v14  ;;  %v1110_v11 = vadd.f32 1e-05, %v1042_v26  ;;  %v976_v2 = vsub.f32 %v840_v24, %v5126_v47  ;;  %v1307_v15 = vmul.f32 %v5345_v61, %v4927_v39  ;;  %v6948_v39 = vld [vmem:[#allocation18_spill] sm:$0xff] }
 0x222   :  { %v3554_v54 = vpop.eup %3553  ;;  %v5357_v20 = vmul.f32 0.020408163, %v6946_v19  ;;  %v1111_v5 = vadd.f32 1e-05, %v1043_v18  ;;  %v977_v23 = vsub.f32 %v841_v7, %v5141_v28  ;;  %v738_v60 = vpop.xlane.xlu0 %737  ;;  %v5361_v29 = vmul.f32 %v3552_v45, %v6947_v52  ;;  %v6950_v19 = vld [vmem:[#allocation121_spill] sm:$0xff]  ;;  %v6951_v45 = vld [vmem:[#allocation76_spill] sm:$0xff] }
 0x223   :  { %3563 = vrsqrt.f32 %v1110_v11  ;;  %v1044_v38 = vmax.f32 %v976_v2, 0.0  ;;  %v842_v32 = vmul.f32 0.020408163, %v738_v60  ;;  %v741_v47 = vpop.xlane.xlu1 %740  ;;  %v5366_v26 = vmul.f32 %v3554_v54, %v6948_v39 }
 0x224   :  { %1479 = vrot.lane.b32.xlu1 %v1306_v48, %s3677_s18  ;;  %1481 = vrot.lane.b32.xlu0 %v1307_v15, %s3677_s18  ;;  %3565 = vrsqrt.f32 %v1111_v5  ;;  %v1045_v24 = vmax.f32 %v977_v23, 0.0  ;;  %v843_v18 = vmul.f32 0.020408163, %v741_v47  ;;  %v1308_v28 = vmul.f32 %v5361_v29, %v6950_v19  ;;  %v6952_v48 = vld [vmem:[#allocation122_spill] sm:$0xff]  ;;  %v6953_v19 = vld [vmem:[#allocation20_spill] sm:$0xff] }
 0x225   :  { %6949 = vst [vmem:[#allocation107_spill] sm:$0xff] %v5366_v26  ;;  %v3556_v7 = vpop.eup %3555  ;;  %v5371_v52 = vmul.f32 0.020408163, %v6951_v45  ;;  %v1112_v11 = vadd.f32 1e-05, %v1044_v38  ;;  %v978_v2 = vsub.f32 %v842_v32, %v5168_v59  ;;  %v1309_v15 = vmul.f32 %v5366_v26, %v6952_v48  ;;  %v6954_v32 = vld [vmem:[#allocation23_spill] sm:$0xff] }
 0x226   :  { %v3558_v60 = vpop.eup %3557  ;;  %v5378_v54 = vmul.f32 %v5357_v20, %v5357_v20  ;;  %v1113_v5 = vadd.f32 1e-05, %v1045_v24  ;;  %v979_v23 = vsub.f32 %v843_v18, %v5183_v46  ;;  %v744_v47 = vpop.xlane.xlu0 %743  ;;  %v5382_v39 = vmul.f32 %v3556_v7, %v6953_v19 }
 0x227   :  { %3567 = vrsqrt.f32 %v1112_v11  ;;  %v1046_v45 = vmax.f32 %v978_v2, 0.0  ;;  %v844_v38 = vmul.f32 0.020408163, %v744_v47  ;;  %v747_v59 = vpop.xlane.xlu1 %746  ;;  %v5387_v48 = vmul.f32 %v3558_v60, %v6954_v32  ;;  %v6956_v60 = vld [vmem:[#allocation77_spill] sm:$0xff] }
 0x228   :  { %1483 = vrot.lane.b32.xlu1 %v1308_v28, %s3677_s18  ;;  %1485 = vrot.lane.b32.xlu0 %v1309_v15, %s3677_s18  ;;  %3569 = vrsqrt.f32 %v1113_v5  ;;  %v1047_v26 = vmax.f32 %v979_v23, 0.0  ;;  %v845_v24 = vmul.f32 0.020408163, %v747_v59  ;;  %v1310_v46 = vmul.f32 %v5382_v39, %v4974_v17  ;;  %v6957_v17 = vld [vmem:[#allocation25_spill] sm:$0xff] }
 0x229   :  { %6955 = vst [vmem:[#allocation108_spill] sm:$0xff] %v5387_v48  ;;  %v3560_v18 = vpop.eup %3559  ;;  %v5393_v7 = vmul.f32 %v5371_v52, %v5371_v52  ;;  %v1114_v11 = vadd.f32 1e-05, %v1046_v45  ;;  %v980_v28 = vsub.f32 %v844_v38, %v5210_v10  ;;  %v1311_v2 = vmul.f32 %v5387_v48, %v4980_v44  ;;  %v6958_v44 = vld [vmem:[#allocation27_spill] sm:$0xff] }
 0x22a   :  { %v3562_v15 = vpop.eup %3561  ;;  %v5399_v47 = vmul.f32 0.020408163, %v6956_v60  ;;  %v1115_v5 = vadd.f32 1e-05, %v1047_v26  ;;  %v981_v23 = vsub.f32 %v845_v24, %v5225_v62  ;;  %v750_v59 = vpop.xlane.xlu0 %749  ;;  %v5403_v19 = vmul.f32 %v3560_v18, %v6957_v17  ;;  %v6960_v18 = vld [vmem:[#allocation80_spill] sm:$0xff] }
 0x22b   :  { %3571 = vrsqrt.f32 %v1114_v11  ;;  %v1048_v32 = vmax.f32 %v980_v28, 0.0  ;;  %v846_v61 = vmul.f32 0.020408163, %v750_v59  ;;  %v753_v10 = vpop.xlane.xlu1 %752  ;;  %v5408_v45 = vmul.f32 %v3562_v15, %v6958_v44 }
 0x22c   :  { %1487 = vrot.lane.b32.xlu1 %v1310_v46, %s3677_s18  ;;  %1489 = vrot.lane.b32.xlu0 %v1311_v2, %s3677_s18  ;;  %3573 = vrsqrt.f32 %v1115_v5  ;;  %v1049_v38 = vmax.f32 %v981_v23, 0.0  ;;  %v847_v26 = vmul.f32 0.020408163, %v753_v10  ;;  %v1312_v62 = vmul.f32 %v5403_v19, %v5021_v12  ;;  %v6961_v12 = vld [vmem:[#allocation29_spill] sm:$0xff] }
 0x22d   :  { %6959 = vst [vmem:[#allocation109_spill] sm:$0xff] %v5408_v45  ;;  %v3564_v24 = vpop.eup %3563  ;;  %v5413_v60 = vmul.f32 0.020408163, %v6960_v18  ;;  %v1116_v11 = vadd.f32 1e-05, %v1048_v32  ;;  %v982_v28 = vsub.f32 %v846_v61, %v5252_v25  ;;  %v1313_v46 = vmul.f32 %v5408_v45, %v5035_v63  ;;  %v6962_v25 = vld [vmem:[#allocation31_spill] sm:$0xff] }
 0x22e   :  { %v3566_v2 = vpop.eup %3565  ;;  %v5420_v15 = vmul.f32 %v5399_v47, %v5399_v47  ;;  %v1117_v5 = vadd.f32 1e-05, %v1049_v38  ;;  %v983_v23 = vsub.f32 %v847_v26, %v5267_v1  ;;  %v756_v59 = vpop.xlane.xlu0 %755  ;;  %v5424_v10 = vmul.f32 %v3564_v24, %v6961_v12 }
 0x22f   :  { %3575 = vrsqrt.f32 %v1116_v11  ;;  %v1050_v18 = vmax.f32 %v982_v28, 0.0  ;;  %v848_v32 = vmul.f32 0.020408163, %v756_v59  ;;  %v759_v63 = vpop.xlane.xlu1 %758  ;;  %v5429_v61 = vmul.f32 %v3566_v2, %v6962_v25  ;;  %v6964_v2 = vld [vmem:[#allocation88_spill] sm:$0xff] }
 0x230   :  { %1491 = vrot.lane.b32.xlu1 %v1312_v62, %s3677_s18  ;;  %1493 = vrot.lane.b32.xlu0 %v1313_v46, %s3677_s18  ;;  %3577 = vrsqrt.f32 %v1117_v5  ;;  %v1051_v45 = vmax.f32 %v983_v23, 0.0  ;;  %v849_v38 = vmul.f32 0.020408163, %v759_v63  ;;  %v1314_v1 = vmul.f32 %v5424_v10, %v5063_v27  ;;  %v6965_v27 = vld [vmem:[#allocation33_spill] sm:$0xff] }
 0x231   :  { %6963 = vst [vmem:[#allocation64_spill] sm:$0xff] %v5429_v61  ;;  %v3568_v26 = vpop.eup %3567  ;;  %v5435_v24 = vmul.f32 %v5413_v60, %v5413_v60  ;;  %v1118_v11 = vadd.f32 1e-05, %v1050_v18  ;;  %v984_v62 = vsub.f32 %v848_v32, %v5294_v35  ;;  %v1315_v28 = vmul.f32 %v5429_v61, %v5077_v51  ;;  %v6966_v51 = vld [vmem:[#allocation35_spill] sm:$0xff]  ;;  %v6971_v61 = vld [vmem:[#allocation41_spill] sm:$0xff] }
 0x232   :  { %v3570_v46 = vpop.eup %3569  ;;  %v5441_v59 = vmul.f32 0.020408163, %v6964_v2  ;;  %v1119_v5 = vadd.f32 1e-05, %v1051_v45  ;;  %v985_v23 = vsub.f32 %v849_v38, %v5309_v30  ;;  %v762_v63 = vpop.xlane.xlu0 %761  ;;  %v5445_v12 = vmul.f32 %v3568_v26, %v6965_v27  ;;  %v6967_v26 = vld [vmem:[#allocation89_spill] sm:$0xff] }
 0x233   :  { %3579 = vrsqrt.f32 %v1118_v11  ;;  %v1052_v17 = vmax.f32 %v984_v62, 0.0  ;;  %v850_v48 = vmul.f32 0.020408163, %v762_v63  ;;  %v765_v35 = vpop.xlane.xlu1 %764  ;;  %v5450_v18 = vmul.f32 %v3570_v46, %v6966_v51 }
 0x234   :  { %1495 = vrot.lane.b32.xlu1 %v1314_v1, %s3677_s18  ;;  %1497 = vrot.lane.b32.xlu0 %v1315_v28, %s3677_s18  ;;  %3581 = vrsqrt.f32 %v1119_v5  ;;  %v1053_v32 = vmax.f32 %v985_v23, 0.0  ;;  %v851_v45 = vmul.f32 0.020408163, %v765_v35  ;;  %v1316_v30 = vmul.f32 %v5445_v12, %v5105_v42  ;;  %v6968_v42 = vld [vmem:[#allocation37_spill] sm:$0xff] }
 0x235   :  { %v3572_v38 = vpop.eup %3571  ;;  %v5455_v2 = vmul.f32 0.020408163, %v6967_v26  ;;  %v1120_v11 = vadd.f32 1e-05, %v1052_v17  ;;  %v986_v62 = vsub.f32 %v850_v48, %v5336_v43  ;;  %v1317_v1 = vmul.f32 %v5450_v18, %v5119_v22  ;;  %v6969_v43 = vld [vmem:[#allocation39_spill] sm:$0xff] }
 0x236   :  { %v3574_v28 = vpop.eup %3573  ;;  %v5462_v46 = vmul.f32 %v5441_v59, %v5441_v59  ;;  %v1121_v5 = vadd.f32 1e-05, %v1053_v32  ;;  %v987_v23 = vsub.f32 %v851_v45, %v5351_v36  ;;  %v768_v63 = vpop.xlane.xlu0 %767  ;;  %v5466_v35 = vmul.f32 %v3572_v38, %v6968_v42 }
 0x237   :  { %3583 = vrsqrt.f32 %v1120_v11  ;;  %v1054_v26 = vmax.f32 %v986_v62, 0.0  ;;  %v852_v17 = vmul.f32 0.020408163, %v768_v63  ;;  %v771_v22 = vpop.xlane.xlu1 %770  ;;  %v5471_v48 = vmul.f32 %v3574_v28, %v6969_v43  ;;  %v6970_v63 = vld [vmem:[#allocation94_spill] sm:$0xff] }
 0x238   :  { %1499 = vrot.lane.b32.xlu1 %v1316_v30, %s3677_s18  ;;  %1501 = vrot.lane.b32.xlu0 %v1317_v1, %s3677_s18  ;;  %3585 = vrsqrt.f32 %v1121_v5  ;;  %v1055_v27 = vmax.f32 %v987_v23, 0.0  ;;  %v853_v32 = vmul.f32 0.020408163, %v771_v22  ;;  %v1318_v36 = vmul.f32 %v5466_v35, %v5147_v13 }
 0x239   :  { %v3576_v45 = vpop.eup %3575  ;;  %v925_v38 = vmul.f32 %v5455_v2, %v5455_v2  ;;  %v1122_v11 = vadd.f32 1e-05, %v1054_v26  ;;  %v988_v62 = vsub.f32 %v852_v17, %v5378_v54  ;;  %v1319_v30 = vmul.f32 %v5471_v48, %v5161_v3  ;;  %v6972_v3 = vld [vmem:[#allocation43_spill] sm:$0xff] }
 0x23a   :  { %v3578_v1 = vpop.eup %3577  ;;  %v5481_v28 = vmul.f32 0.020408163, %v6970_v63  ;;  %v1123_v5 = vadd.f32 1e-05, %v1055_v27  ;;  %v989_v23 = vsub.f32 %v853_v32, %v5393_v7  ;;  %v774_v22 = vpop.xlane.xlu0 %773  ;;  %v5485_v13 = vmul.f32 %v3576_v45, %v6971_v61  ;;  %v6973_v45 = vld [vmem:[#allocation98_spill] sm:$0xff] }
 0x23b   :  { %3587 = vrsqrt.f32 %v1122_v11  ;;  %v1056_v25 = vmax.f32 %v988_v62, 0.0  ;;  %v854_v44 = vmul.f32 0.020408163, %v774_v22  ;;  %v777_v54 = vpop.xlane.xlu1 %776  ;;  %v5490_v26 = vmul.f32 %v3578_v1, %v6972_v3 }
 0x23c   :  { %1503 = vrot.lane.b32.xlu1 %v1318_v36, %s3677_s18  ;;  %1505 = vrot.lane.b32.xlu0 %v1319_v30, %s3677_s18  ;;  %3589 = vrsqrt.f32 %v1123_v5  ;;  %v1057_v17 = vmax.f32 %v989_v23, 0.0  ;;  %v855_v27 = vmul.f32 0.020408163, %v777_v54  ;;  %v1320_v7 = vmul.f32 %v5485_v13, %v5189_v8  ;;  %v6974_v54 = vld [vmem:[#allocation45_spill] sm:$0xff] }
 0x23d   :  { %v3580_v32 = vpop.eup %3579  ;;  %v5495_v63 = vmul.f32 0.020408163, %v6973_v45  ;;  %v1124_v11 = vadd.f32 1e-05, %v1056_v25  ;;  %v990_v62 = vsub.f32 %v854_v44, %v5420_v15  ;;  %v1321_v36 = vmul.f32 %v5490_v26, %v5203_v37  ;;  %v6976_v37 = vld [vmem:[#allocation47_spill] sm:$0xff] }
 0x23e   :  { %v3582_v30 = vpop.eup %3581  ;;  %v926_v1 = vmul.f32 %v5481_v28, %v5481_v28  ;;  %v1125_v5 = vadd.f32 1e-05, %v1057_v17  ;;  %v991_v23 = vsub.f32 %v855_v27, %v5435_v24  ;;  %v780_v22 = vpop.xlane.xlu0 %779  ;;  %v5504_v8 = vmul.f32 %v3580_v32, %v6974_v54 }
 0x23f   :  { %3591 = vrsqrt.f32 %v1124_v11  ;;  %v1058_v45 = vmax.f32 %v990_v62, 0.0  ;;  %v856_v3 = vmul.f32 0.020408163, %v780_v22  ;;  %v783_v44 = vpop.xlane.xlu1 %782  ;;  %v5509_v15 = vmul.f32 %v3582_v30, %v6976_v37  ;;  %v6977_v22 = vld [vmem:[#allocation104_spill] sm:$0xff]  ;;  %v6978_v37 = vld [vmem:[#allocation49_spill] sm:$0xff] }
 0x240   :  { %6975 = vst [vmem:[#allocation111_spill] sm:$0xff] %v5504_v8  ;;  %1507 = vrot.lane.b32.xlu1 %v1320_v7, %s3677_s18  ;;  %1509 = vrot.lane.b32.xlu0 %v1321_v36, %s3677_s18  ;;  %3593 = vrsqrt.f32 %v1125_v5  ;;  %v1059_v25 = vmax.f32 %v991_v23, 0.0  ;;  %v857_v17 = vmul.f32 0.020408163, %v783_v44  ;;  %v1322_v24 = vmul.f32 %v5504_v8, %v5231_v41 }
 0x241   :  { %v3584_v27 = vpop.eup %3583  ;;  %v927_v32 = vmul.f32 %v5495_v63, %v5495_v63  ;;  %v1126_v11 = vadd.f32 1e-05, %v1058_v45  ;;  %v992_v62 = vsub.f32 %v856_v3, %v5462_v46  ;;  %v1323_v7 = vmul.f32 %v5509_v15, %v5245_v4  ;;  %v6979_v3 = vld [vmem:[#allocation51_spill] sm:$0xff] }
 0x242   :  { %v3586_v36 = vpop.eup %3585  ;;  %v5519_v30 = vmul.f32 0.020408163, %v6977_v22  ;;  %v1127_v5 = vadd.f32 1e-05, %v1059_v25  ;;  %v993_v23 = vsub.f32 %v857_v17, %v925_v38  ;;  %v786_v44 = vpop.xlane.xlu0 %785  ;;  %v5522_v54 = vmul.f32 %v3584_v27, %v6978_v37 }
 0x243   :  { %3595 = vrsqrt.f32 %v1126_v11  ;;  %v1060_v41 = vmax.f32 %v992_v62, 0.0  ;;  %v858_v8 = vmul.f32 0.020408163, %v786_v44  ;;  %v789_v46 = vpop.xlane.xlu1 %788  ;;  %v5527_v4 = vmul.f32 %v3586_v36, %v6979_v3  ;;  %v6980_v3 = vld [vmem:[#allocation53_spill] sm:$0xff] }
 0x244   :  { %1511 = vrot.lane.b32.xlu1 %v1322_v24, %s3677_s18  ;;  %1513 = vrot.lane.b32.xlu0 %v1323_v7, %s3677_s18  ;;  %3597 = vrsqrt.f32 %v1127_v5  ;;  %v1061_v45 = vmax.f32 %v993_v23, 0.0  ;;  %v859_v22 = vmul.f32 0.020408163, %v789_v46  ;;  %v1324_v38 = vmul.f32 %v5522_v54, %v5273_v58  ;;  %v6981_v58 = vld [vmem:[#allocation55_spill] sm:$0xff] }
 0x245   :  { %v3588_v25 = vpop.eup %3587  ;;  %v1128_v17 = vadd.f32 1e-05, %v1060_v41  ;;  %v994_v27 = vsub.f32 %v858_v8, %v926_v1  ;;  %v1325_v11 = vmul.f32 %v5527_v4, %v5287_v21  ;;  %v928_v24 = vmul.f32 %v5519_v30, %v5519_v30 }
 0x246   :  { %v3590_v62 = vpop.eup %3589  ;;  %v1129_v7 = vadd.f32 1e-05, %v1061_v45  ;;  %v995_v44 = vsub.f32 %v859_v22, %v927_v32  ;;  %v792_v36 = vpop.xlane.xlu0 %791  ;;  %v5536_v5 = vmul.f32 %v3588_v25, %v6980_v3 }
 0x247   :  { %3599 = vrsqrt.f32 %v1128_v17  ;;  %v1062_v23 = vmax.f32 %v994_v27, 0.0  ;;  %v860_v46 = vmul.f32 0.020408163, %v792_v36  ;;  %v5541_v1 = vmul.f32 %v3590_v62, %v6981_v58  ;;  %v6982_v27 = vld [vmem:[#allocation58_spill] sm:$0xff] }
 0x248   :  { %1515 = vrot.lane.b32.xlu1 %v1324_v38, %s3677_s18  ;;  %1517 = vrot.lane.b32.xlu0 %v1325_v11, %s3677_s18  ;;  %3601 = vrsqrt.f32 %v1129_v7  ;;  %v1063_v21 = vmax.f32 %v995_v44, 0.0  ;;  %v1326_v8 = vmul.f32 %v5536_v5, %v5315_v49  ;;  %v6984_v49 = vld [vmem:[#allocation63_spill] sm:$0xff] }
 0x249   :  { %v3592_v32 = vpop.eup %3591  ;;  %v1130_v41 = vadd.f32 1e-05, %v1062_v23  ;;  %v996_v45 = vsub.f32 %v860_v46, %v928_v24  ;;  %v5545_v22 = vpop.permute.xlu1 %1405  ;;  %v1327_v25 = vmul.f32 %v5541_v1, %v5329_v14 }
 0x24a   :  { %v3594_v17 = vpop.eup %3593  ;;  %v1131_v38 = vadd.f32 1e-05, %v1063_v21  ;;  %v5550_v11 = vmul.f32 %v3592_v32, %v6982_v27  ;;  %v7018_v27 = vld [vmem:[#allocation96_spill] sm:$0xff] }
 0x24b   :  { %3603 = vrsqrt.f32 %v1130_v41  ;;  %v1064_v62 = vmax.f32 %v996_v45, 0.0  ;;  %v5555_v7 = vmul.f32 %v3594_v17, %v6984_v49  ;;  %v6987_v41 = vld [vmem:[#allocation72_spill] sm:$0xff] }
 0x24c   :  { %6983 = vst [vmem:[#allocation66_spill] sm:$0xff] %v5550_v11  ;;  %1519 = vrot.lane.b32.xlu1 %v1326_v8, %s3677_s18  ;;  %1521 = vrot.lane.b32.xlu0 %v1327_v25, %s3677_s18  ;;  %3605 = vrsqrt.f32 %v1131_v38  ;;  %v5557_v24 = vpop.permute.xlu0 %1407  ;;  %v1328_v14 = vmul.f32 %v5550_v11, %v5357_v20  ;;  %v6985_v8 = vld [vmem:[#allocation68_spill] sm:$0xff] }
 0x24d   :  { %v3596_v44 = vpop.eup %3595  ;;  %v1132_v36 = vadd.f32 1e-05, %v1064_v62  ;;  %v5561_v23 = vpop.permute.xlu1 %1409  ;;  %v1329_v46 = vmul.f32 %v5555_v7, %v5371_v52 }
 0x24e   :  { %v3598_v21 = vpop.eup %3597  ;;  %v5566_v32 = vmul.f32 %v3596_v44, %v6985_v8  ;;  %v6988_v44 = vld [vmem:[#allocation78_spill] sm:$0xff] }
 0x24f   :  { %3607 = vrsqrt.f32 %v1132_v36  ;;  %v5571_v45 = vmul.f32 %v3598_v21, %v6987_v41 }
 0x250   :  { %6986 = vst [vmem:[#allocation112_spill] sm:$0xff] %v5566_v32  ;;  %1523 = vrot.lane.b32.xlu1 %v1328_v14, %s3677_s18  ;;  %1525 = vrot.lane.b32.xlu0 %v1329_v46, %s3677_s18  ;;  %v1330_v20 = vmul.f32 %v5566_v32, %v5399_v47  ;;  %v6990_v14 = vld [vmem:[#allocation79_spill] sm:$0xff] }
 0x251   :  { %v3600_v25 = vpop.eup %3599  ;;  %v1331_v52 = vmul.f32 %v5571_v45, %v5413_v60 }
 0x252   :  { %v5575_v17 = vpop.permute.xlu0 %1413  ;;  %v5577_v38 = vpop.permute.xlu1 %1411  ;;  %v5582_v36 = vmul.f32 %v3600_v25, %v6988_v44  ;;  %v6992_v44 = vld [vmem:[#allocation81_spill] sm:$0xff] }
 0x253   :  { %v3602_v62 = vpop.eup %3601 }
 0x254   :  { %6989 = vst [vmem:[#allocation113_spill] sm:$0xff] %v5582_v36  ;;  %1527 = vrot.lane.b32.xlu1 %v1330_v20, %s3677_s18  ;;  %1529 = vrot.lane.b32.xlu0 %v1331_v52, %s3677_s18  ;;  %v5587_v46 = vmul.f32 %v3602_v62, %v6990_v14  ;;  %v1332_v47 = vmul.f32 %v5582_v36, %v5441_v59  ;;  %v6994_v20 = vld [vmem:[#allocation82_spill] sm:$0xff] }
 0x255   :  { %v3604_v21 = vpop.eup %3603 }
 0x256   :  { %6991 = vst [vmem:[#allocation115_spill] sm:$0xff] %v5587_v46  ;;  %v5591_v41 = vpop.permute.xlu0 %1417  ;;  %v5593_v8 = vpop.permute.xlu1 %1415  ;;  %v1333_v60 = vmul.f32 %v5587_v46, %v5455_v2  ;;  %v5598_v49 = vmul.f32 %v3604_v21, %v6992_v44  ;;  %v6996_v21 = vld [vmem:[#allocation83_spill] sm:$0xff] }
 0x257   :  { %v3606_v25 = vpop.eup %3605 }
 0x258   :  { %6993 = vst [vmem:[#allocation67_spill] sm:$0xff] %v5598_v49  ;;  %1531 = vrot.lane.b32.xlu1 %v1332_v47, %s3677_s18  ;;  %1533 = vrot.lane.b32.xlu0 %v1333_v60, %s3677_s18  ;;  %v5603_v52 = vmul.f32 %v3606_v25, %v6994_v20  ;;  %v1334_v59 = vmul.f32 %v5598_v49, %v5481_v28  ;;  %v6999_v25 = vld [vmem:[#allocation123_spill] sm:$0xff] }
 0x259   :  { %v3608_v62 = vpop.eup %3607 }
 0x25a   :  { %6995 = vst [vmem:[#allocation116_spill] sm:$0xff] %v5603_v52  ;;  %v5607_v14 = vpop.permute.xlu0 %1421  ;;  %v5609_v36 = vpop.permute.xlu1 %1419  ;;  %v1335_v2 = vmul.f32 %v5603_v52, %v5495_v63  ;;  %v5614_v32 = vmul.f32 %v3608_v62, %v6996_v21 }
 0x25c   :  { %6997 = vst [vmem:[#allocation70_spill] sm:$0xff] %v5614_v32  ;;  %1535 = vrot.lane.b32.xlu1 %v1334_v59, %s3677_s18  ;;  %1537 = vrot.lane.b32.xlu0 %v1335_v2, %s3677_s18  ;;  %v1336_v47 = vmul.f32 %v5614_v32, %v5519_v30  ;;  %v7008_v32 = vld [vmem:[#allocation91_spill] sm:$0xff] }
 0x25e   :  { %v5620_v60 = vpop.permute.xlu0 %1425  ;;  %v5622_v28 = vpop.permute.xlu1 %1423 }
 0x25f   :  { %6998 = vst [vmem:[#allocation117_spill] sm:$0xff] %v5622_v28 }
 0x260   :  { %1539 = vrot.lane.b32.xlu1 %v1336_v47, %s3677_s18  ;;  %1679 = vperm.xlu0 %3393, %v6999_v25   ;;  %v7006_v25 = vld [vmem:[#allocation84_spill] sm:$0xff] }
 0x262   :  { %v5626_v49 = vpop.permute.xlu0 %1429  ;;  %v5628_v63 = vpop.permute.xlu1 %1427 }
 0x263   :  { %7000 = vst [vmem:[#allocation71_spill] sm:$0xff] %v5626_v49  ;;  %7001 = vst [vmem:[#allocation118_spill] sm:$0xff] %v5628_v63  ;;  %v7014_v63 = vld [vmem:[#allocation95_spill] sm:$0xff] }
 0x264   :  { %1684 = vperm.xlu1 %3394, %v4965_v57   ;;  %1694 = vperm.xlu0 %3393, %v4985_v55  }
 0x266   :  { %v5632_v59 = vpop.permute.xlu0 %1433  ;;  %v5634_v62 = vpop.permute.xlu1 %1431 }
 0x267   :  { %7002 = vst [vmem:[#allocation73_spill] sm:$0xff] %v5632_v59  ;;  %7003 = vst [vmem:[#allocation119_spill] sm:$0xff] %v5634_v62  ;;  %v7027_v59 = vld [vmem:[#allocation100_spill] sm:$0xff] }
 0x268   :  { %1689 = vperm.xlu1 %3394, %v4969_v31   ;;  %1704 = vperm.xlu0 %3393, %v5002_v50  }
 0x26a   :  { %v5638_v30 = vpop.permute.xlu0 %1437  ;;  %v5640_v2 = vpop.permute.xlu1 %1435 }
 0x26b   :  { %7004 = vst [vmem:[#allocation120_spill] sm:$0xff] %v5640_v2  ;;  %v7011_v2 = vld [vmem:[#allocation92_spill] sm:$0xff] }
 0x26c   :  { %1699 = vperm.xlu1 %3394, %v4989_v9   ;;  %1714 = vperm.xlu0 %3393, %v5025_v6   ;;  %v7005_v6 = vld [vmem:[#allocation124_spill] sm:$0xff] }
 0x26e   :  { %v5644_v47 = vpop.permute.xlu0 %1441  ;;  %v5646_v57 = vpop.permute.xlu1 %1439 }
 0x270   :  { %1709 = vperm.xlu1 %3394, %v5009_v53   ;;  %1724 = vperm.xlu0 %3393, %v5046_v34   ;;  %v7007_v34 = vld [vmem:[#allocation90_spill] sm:$0xff] }
 0x272   :  { %v5650_v55 = vpop.permute.xlu0 %1445  ;;  %v5652_v31 = vpop.permute.xlu1 %1443 }
 0x274   :  { %1719 = vperm.xlu1 %3394, %v5030_v0   ;;  %1734 = vperm.xlu0 %3393, %v5067_v16   ;;  %v7010_v16 = vld [vmem:[#allocation110_spill] sm:$0xff] }
 0x276   :  { %v5656_v50 = vpop.permute.xlu0 %1449  ;;  %v5658_v9 = vpop.permute.xlu1 %1447 }
 0x278   :  { %1729 = vperm.xlu1 %3394, %v7005_v6   ;;  %1744 = vperm.xlu0 %3393, %v7006_v25   ;;  %v7013_v25 = vld [vmem:[#allocation85_spill] sm:$0xff] }
 0x27a   :  { %v5662_v21 = vpop.permute.xlu0 %1453  ;;  %v5664_v53 = vpop.permute.xlu1 %1451 }
 0x27c   :  { %1739 = vperm.xlu1 %3394, %v7007_v34   ;;  %1754 = vperm.xlu0 %3393, %v7008_v32   ;;  %v7017_v32 = vld [vmem:[#allocation93_spill] sm:$0xff] }
 0x27e   :  { %v5668_v52 = vpop.permute.xlu0 %1457  ;;  %v5670_v0 = vpop.permute.xlu1 %1455 }
 0x27f   :  { %7009 = vst [vmem:[#allocation74_spill] sm:$0xff] %v5668_v52  ;;  %v7025_v52 = vld [vmem:[#allocation57_spill] sm:$0xff] }
 0x280   :  { %1749 = vperm.xlu1 %3394, %v7010_v16   ;;  %1764 = vperm.xlu0 %3393, %v7011_v2   ;;  %v7020_v2 = vld [vmem:[#allocation86_spill] sm:$0xff] }
 0x282   :  { %v5674_v62 = vpop.permute.xlu0 %1461  ;;  %v5676_v6 = vpop.permute.xlu1 %1459 }
 0x283   :  { %7012 = vst [vmem:[#allocation121_spill] sm:$0xff] %v5674_v62  ;;  %v7021_v62 = vld [vmem:[#allocation114_spill] sm:$0xff] }
 0x284   :  { %1759 = vperm.xlu1 %3394, %v7013_v25   ;;  %1774 = vperm.xlu0 %3393, %v7014_v63   ;;  %v7022_v63 = vld [vmem:[#allocation87_spill] sm:$0xff] }
 0x286   :  { %v5680_v20 = vpop.permute.xlu0 %1465  ;;  %v5682_v34 = vpop.permute.xlu1 %1463 }
 0x287   :  { %7015 = vst [vmem:[#allocation76_spill] sm:$0xff] %v5680_v20  ;;  %7016 = vst [vmem:[#allocation122_spill] sm:$0xff] %v5682_v34  ;;  %v7023_v20 = vld [vmem:[#allocation99_spill] sm:$0xff]  ;;  %v7036_v34 = vld [vmem:[#allocation105_spill] sm:$0xff] }
 0x288   :  { %1769 = vperm.xlu1 %3394, %v7017_v32   ;;  %1784 = vperm.xlu0 %3393, %v7018_v27   ;;  %v7024_v27 = vld [vmem:[#allocation97_spill] sm:$0xff] }
 0x28a   :  { %v5686_v44 = vpop.permute.xlu0 %1469  ;;  %v5688_v16 = vpop.permute.xlu1 %1467 }
 0x28b   :  { %7019 = vst [vmem:[#allocation77_spill] sm:$0xff] %v5688_v16 }
 0x28c   :  { %1779 = vperm.xlu1 %3394, %v7020_v2   ;;  %1794 = vperm.xlu0 %3393, %v7021_v62   ;;  %v7026_v62 = vld [vmem:[#allocation60_spill] sm:$0xff] }
 0x28e   :  { %v5692_v58 = vpop.permute.xlu0 %1473  ;;  %v1472_v25 = vpop.permute.xlu1 %1471 }
 0x290   :  { %1789 = vperm.xlu1 %3394, %v7022_v63   ;;  %1804 = vperm.xlu0 %3393, %v7023_v20   ;;  %v7028_v20 = vld [vmem:[#allocation101_spill] sm:$0xff] }
 0x292   :  { %v5696_v46 = vpop.permute.xlu0 %1477  ;;  %v5698_v32 = vpop.permute.xlu1 %1475 }
 0x294   :  { %1799 = vperm.xlu1 %3394, %v7024_v27   ;;  %1814 = vperm.xlu0 %3393, %v7025_v52   ;;  %v7030_v52 = vld [vmem:[#allocation102_spill] sm:$0xff] }
 0x296   :  { %v5702_v11 = vpop.permute.xlu0 %1481  ;;  %v5704_v2 = vpop.permute.xlu1 %1479 }
 0x298   :  { %1824 = vperm.xlu0 %3393, %v7026_v62   ;;  %1809 = vperm.xlu1 %3394, %v7027_v59   ;;  %v7033_v59 = vld [vmem:[#allocation103_spill] sm:$0xff] }
 0x29a   :  { %v5708_v16 = vpop.permute.xlu0 %1485  ;;  %v5710_v63 = vpop.permute.xlu1 %1483 }
 0x29c   :  { %1834 = vperm.xlu0 %3393, %v5277_v40   ;;  %1819 = vperm.xlu1 %3394, %v7028_v20   ;;  %v7035_v20 = vld [vmem:[#allocation106_spill] sm:$0xff] }
 0x29e   :  { %v5714_v28 = vpop.permute.xlu0 %1489  ;;  %v5716_v27 = vpop.permute.xlu1 %1487 }
 0x29f   :  { %7029 = vst [vmem:[#allocation80_spill] sm:$0xff] %v5716_v27 }
 0x2a0   :  { %1844 = vperm.xlu0 %3393, %v5298_v33   ;;  %1829 = vperm.xlu1 %3394, %v7030_v52   ;;  %v7038_v52 = vld [vmem:[#allocation61_spill] sm:$0xff] }
 0x2a2   :  { %v5720_v3 = vpop.permute.xlu0 %1493  ;;  %v5722_v62 = vpop.permute.xlu1 %1491 }
 0x2a3   :  { %7031 = vst [vmem:[#allocation88_spill] sm:$0xff] %v5720_v3  ;;  %7032 = vst [vmem:[#allocation35_spill] sm:$0xff] %v5722_v62 }
 0x2a4   :  { %1854 = vperm.xlu0 %3393, %v5319_v56   ;;  %1839 = vperm.xlu1 %3394, %v7033_v59  }
 0x2a6   :  { %v5726_v49 = vpop.permute.xlu0 %1497  ;;  %v5728_v40 = vpop.permute.xlu1 %1495 }
 0x2a7   :  { %7034 = vst [vmem:[#allocation89_spill] sm:$0xff] %v5728_v40 }
 0x2a8   :  { %1864 = vperm.xlu0 %3393, %v7035_v20   ;;  %1849 = vperm.xlu1 %3394, %v7036_v34   ;;  %v7039_v20 = vld [vmem:[#allocation34_spill] sm:$0xff]  ;;  %v6688_v34 = vmov 1  }
 0x2a9   :  { %v1625_v40 = vsub.f32 %v7039_v20, %v5638_v30  ;;  %v7040_v30 = vld [vmem:[#allocation5_spill] sm:$0xff] }
 0x2aa   :  { %v1502_v27 = vpop.permute.xlu0 %1501  ;;  %v5732_v33 = vpop.permute.xlu1 %1499 }
 0x2ab   :  { %7037 = vst [vmem:[#allocation37_spill] sm:$0xff] %v5732_v33 }
 0x2ac   :  { %1924 = vperm.xlu0 %3393, %v5466_v35   ;;  %1859 = vperm.xlu1 %3394, %v7038_v52   ;;  %v1657_v52 = vsub.f32 %v6966_v51, %v1502_v27  ;;  %v7041_v27 = vld [vmem:[#allocation4_spill] sm:$0xff] }
 0x2ae   :  { %v1506_v62 = vpop.permute.xlu0 %1505  ;;  %v1504_v3 = vpop.permute.xlu1 %1503 }
 0x2b0   :  { %1929 = vperm.xlu0 %3393, %v5471_v48   ;;  %1919 = vperm.xlu1 %3394, %v5450_v18   ;;  %v1658_v18 = vsub.f32 %v6968_v42, %v1504_v3  ;;  %v7042_v3 = vmov 0  }
 0x2b2   :  { %v5738_v56 = vpop.permute.xlu0 %1509  ;;  %v1508_v59 = vpop.permute.xlu1 %1507 }
 0x2b4   :  { %1939 = vperm.xlu0 %3393, %v5490_v26   ;;  %3395 = vset.pattern.permute.xlu1 %v6688_v34 }
 0x2b5   :  { %2167 = vperm.xlu1 %3395, %v1625_v40   ;;  %v1610_v40 = vsub.f32 %v7040_v30, %v5557_v24 }
 0x2b6   :  { %v5744_v35 = vpop.permute.xlu1 %1511  ;;  %v5747_v33 = vpop.permute.xlu0 %1513 }
 0x2b8   :  { %1949 = vperm.xlu0 %3393, %v5509_v15   ;;  %v1642_v15 = vsub.f32 %v7041_v27, %v1472_v25 }
 0x2b9   :  { %2327 = vperm.xlu1 %3395, %v1657_v52  }
 0x2ba   :  { %v5751_v48 = vpop.permute.xlu1 %1515  ;;  %v5754_v26 = vpop.permute.xlu0 %1517 }
 0x2bc   :  { %1874 = vperm.xlu0 %3393, %v5361_v29  }
 0x2bd   :  { %2332 = vperm.xlu1 %3395, %v1658_v18  }
 0x2be   :  { %v5759_v51 = vpop.permute.xlu1 %1519  ;;  %v5762_v20 = vpop.permute.xlu0 %1521 }
 0x2c0   :  { %1959 = vperm.xlu0 %3393, %v5527_v4   ;;  %v7043_v4 = vld [vmem:[#allocation38_spill] sm:$0xff] }
 0x2c1   :  { %2092 = vperm.xlu1 %3395, %v1610_v40   ;;  %v1627_v24 = vsub.f32 %v7043_v4, %v5644_v47  ;;  %v7044_v47 = vld [vmem:[#allocation9_spill] sm:$0xff]  ;;  %v7050_v4 = vld [vmem:[#allocation2_spill] sm:$0xff] }
 0x2c2   :  { %v5765_v42 = vpop.permute.xlu1 %1523  ;;  %v5768_v29 = vpop.permute.xlu0 %1525  ;;  %v1612_v18 = vsub.f32 %v7044_v47, %v5577_v38 }
 0x2c4   :  { %1884 = vperm.xlu0 %3393, %v5382_v39  }
 0x2c5   :  { %2252 = vperm.xlu1 %3395, %v1642_v15  }
 0x2c6   :  { %v5775_v25 = vpop.permute.xlu1 %1527  ;;  %v5778_v39 = vpop.permute.xlu0 %1529 }
 0x2c8   :  { %1969 = vperm.xlu0 %3393, %v5541_v1   ;;  %v1659_v1 = vsub.f32 %v6969_v43, %v1506_v62  ;;  %v7045_v43 = vld [vmem:[#allocation8_spill] sm:$0xff] }
 0x2c9   :  { %3396 = vset.pattern.permute.xlu1 %v7042_v3 }
 0x2ca   :  { %1934 = vperm.xlu1 %3396, %v5485_v13   ;;  %v5782_v52 = vpop.permute.xlu1 %1531  ;;  %v5786_v13 = vpop.permute.xlu0 %1533 }
 0x2cc   :  { %1894 = vperm.xlu0 %3393, %v5403_v19   ;;  %v1660_v19 = vsub.f32 %v6971_v61, %v1508_v59  ;;  %v7046_v61 = vld [vmem:[#allocation36_spill] sm:$0xff] }
 0x2cd   :  { %v1626_v62 = vsub.f32 %v7046_v61, %v5646_v57  ;;  %v7049_v57 = vld [vmem:[#allocation42_spill] sm:$0xff] }
 0x2ce   :  { %3397 = vset.pattern.permute.xlu1 %v6688_v34  ;;  %v5791_v30 = vpop.permute.xlu1 %1535  ;;  %v1629_v15 = vsub.f32 %v7049_v57, %v5650_v55  ;;  %v7056_v57 = vld [vmem:[#allocation6_spill] sm:$0xff] }
 0x2cf   :  { %2177 = vperm.xlu1 %3397, %v1627_v24   ;;  %v1641_v24 = vsub.f32 %v7050_v4, %v5686_v44  ;;  %v7053_v44 = vld [vmem:[#allocation7_spill] sm:$0xff] }
 0x2d0   :  { %1979 = vperm.xlu0 %3393, %v5555_v7   ;;  %v5793_v7 = vpop.permute.xlu0 %1537  ;;  %v1611_v61 = vsub.f32 %v7053_v44, %v5561_v23  ;;  %v7058_v23 = vld [vmem:[#allocation44_spill] sm:$0xff] }
 0x2d2   :  { %v5800_v59 = vpop.permute.xlu1 %1539 }
 0x2d3   :  { %2337 = vperm.xlu1 %3397, %v1659_v1  }
 0x2d4   :  { %1904 = vperm.xlu0 %3393, %v5424_v10   ;;  %v1644_v10 = vsub.f32 %v7045_v43, %v5698_v32  ;;  %v7048_v32 = vld [vmem:[#allocation111_spill] sm:$0xff] }
 0x2d7   :  { %2342 = vperm.xlu1 %3397, %v1660_v19  }
 0x2d8   :  { %1989 = vperm.xlu0 %3393, %v5571_v45   ;;  %v7047_v45 = vld [vmem:[#allocation3_spill] sm:$0xff] }
 0x2d9   :  { %v1609_v38 = vsub.f32 %v7047_v45, %v5545_v22  ;;  %v7051_v22 = vld [vmem:[#allocation40_spill] sm:$0xff] }
 0x2da   :  { %v1628_v47 = vsub.f32 %v7051_v22, %v5652_v31  ;;  %v7055_v31 = vld [vmem:[#allocation13_spill] sm:$0xff]  ;;  %v7059_v22 = vld [vmem:[#allocation12_spill] sm:$0xff] }
 0x2db   :  { %2102 = vperm.xlu1 %3397, %v1612_v18   ;;  %v7052_v18 = vld [vmem:[#allocation43_spill] sm:$0xff] }
 0x2dc   :  { %1914 = vperm.xlu0 %3393, %v5445_v12   ;;  %v1661_v43 = vsub.f32 %v7052_v18, %v5738_v56  ;;  %v1614_v56 = vsub.f32 %v7055_v31, %v5593_v8  ;;  %v7067_v31 = vld [vmem:[#allocation62_spill] sm:$0xff] }
 0x2df   :  { %v5802_v40 = vpop.permute.xlu0 %1679  ;;  %2262 = vperm.xlu1 %3397, %v1644_v10  }
 0x2e0   :  { %3409 = vset.pattern.permute.xlu0 %v6688_v34 }
 0x2e1   :  { %2172 = vperm.xlu0 %3409, %v1626_v62   ;;  %v7054_v62 = vld [vmem:[#allocation45_spill] sm:$0xff] }
 0x2e2   :  { %v1662_v45 = vsub.f32 %v7054_v62, %v5744_v35  ;;  %v1630_v35 = vsub.f32 %v7058_v23, %v5658_v9  ;;  %v7065_v9 = vld [vmem:[#allocation10_spill] sm:$0xff] }
 0x2e3   :  { %v5807_v27 = vpop.permute.xlu0 %1694  ;;  %3398 = vset.pattern.permute.xlu1 %v7042_v3  ;;  %v5810_v12 = vpop.permute.xlu1 %1684  ;;  %v7069_v23 = vld [vmem:[#allocation46_spill] sm:$0xff] }
 0x2e4   :  { %1944 = vperm.xlu1 %3398, %v7048_v32  }
 0x2e5   :  { %2087 = vperm.xlu0 %3409, %v1609_v38  }
 0x2e7   :  { %v5817_v1 = vpop.permute.xlu0 %1704  ;;  %v5819_v19 = vpop.permute.xlu1 %1689 }
 0x2e8   :  { %3399 = vset.pattern.permute.xlu1 %v6688_v34 }
 0x2e9   :  { %2247 = vperm.xlu0 %3409, %v1641_v24   ;;  %2187 = vperm.xlu1 %3399, %v1629_v15   ;;  %v1643_v15 = vsub.f32 %v7056_v57, %v5692_v58  ;;  %v7062_v58 = vld [vmem:[#allocation11_spill] sm:$0xff] }
 0x2ea   :  { %v1613_v8 = vsub.f32 %v7062_v58, %v5575_v17  ;;  %v7068_v17 = vld [vmem:[#allocation48_spill] sm:$0xff] }
 0x2eb   :  { %v5826_v10 = vpop.permute.xlu0 %1714  ;;  %v5828_v55 = vpop.permute.xlu1 %1699 }
 0x2ed   :  { %2182 = vperm.xlu0 %3409, %v1628_v47   ;;  %2347 = vperm.xlu1 %3399, %v1661_v43   ;;  %v1646_v47 = vsub.f32 %v7059_v22, %v5704_v2  ;;  %v1645_v2 = vsub.f32 %v7065_v9, %v5696_v46  ;;  %v7070_v46 = vld [vmem:[#allocation15_spill] sm:$0xff] }
 0x2ef   :  { %v5834_v38 = vpop.permute.xlu0 %1724  ;;  %v5836_v32 = vpop.permute.xlu1 %1709 }
 0x2f1   :  { %2097 = vperm.xlu0 %3409, %v1611_v61   ;;  %2352 = vperm.xlu1 %3399, %v1662_v45  }
 0x2f3   :  { %v5842_v4 = vpop.permute.xlu0 %1734  ;;  %v5844_v24 = vpop.permute.xlu1 %1719 }
 0x2f4   :  { %7057 = vst [vmem:[#allocation39_spill] sm:$0xff] %v5842_v4 }
 0x2f5   :  { %2257 = vperm.xlu0 %3409, %v1643_v15   ;;  %2112 = vperm.xlu1 %3399, %v1614_v56   ;;  %v1632_v56 = vsub.f32 %v7068_v17, %v5664_v53  ;;  %v7071_v53 = vld [vmem:[#allocation47_spill] sm:$0xff] }
 0x2f6   :  { %v1663_v58 = vsub.f32 %v7071_v53, %v5747_v33  ;;  %v7077_v53 = vld [vmem:[#allocation18_spill] sm:$0xff] }
 0x2f7   :  { %v5850_v18 = vpop.permute.xlu0 %1744  ;;  %v5852_v43 = vpop.permute.xlu1 %1729 }
 0x2f8   :  { %7060 = vst [vmem:[#allocation94_spill] sm:$0xff] %v5850_v18  ;;  %7061 = vst [vmem:[#allocation41_spill] sm:$0xff] %v5852_v43 }
 0x2f9   :  { %2192 = vperm.xlu0 %3409, %v1630_v35   ;;  %2272 = vperm.xlu1 %3399, %v1646_v47   ;;  %v1615_v35 = vsub.f32 %v7070_v46, %v5591_v41  ;;  %v1664_v41 = vsub.f32 %v6978_v37, %v5751_v48  ;;  %v7076_v48 = vld [vmem:[#allocation16_spill] sm:$0xff] }
 0x2fb   :  { %v5856_v44 = vpop.permute.xlu0 %1754  ;;  %v5858_v61 = vpop.permute.xlu1 %1739 }
 0x2fc   :  { %7063 = vst [vmem:[#allocation98_spill] sm:$0xff] %v5856_v44  ;;  %7064 = vst [vmem:[#allocation104_spill] sm:$0xff] %v5858_v61 }
 0x2fd   :  { %2107 = vperm.xlu0 %3409, %v1613_v8   ;;  %3400 = vset.pattern.permute.xlu1 %v7042_v3  ;;  %v7072_v8 = vld [vmem:[#allocation14_spill] sm:$0xff] }
 0x2fe   :  { %1954 = vperm.xlu1 %3400, %v5522_v54   ;;  %v1631_v54 = vsub.f32 %v7069_v23, %v5656_v50  ;;  %v1647_v9 = vsub.f32 %v7072_v8, %v5702_v11  ;;  %v7074_v23 = vld [vmem:[#allocation17_spill] sm:$0xff] }
 0x2ff   :  { %v5864_v62 = vpop.permute.xlu0 %1764  ;;  %v5866_v45 = vpop.permute.xlu1 %1749  ;;  %v1616_v11 = vsub.f32 %v7074_v23, %v5609_v36 }
 0x300   :  { %7066 = vst [vmem:[#allocation49_spill] sm:$0xff] %v5866_v45 }
 0x301   :  { %2267 = vperm.xlu0 %3409, %v1645_v2  }
 0x302   :  { %1869 = vperm.xlu1 %3400, %v7067_v31   ;;  %v7073_v31 = vld [vmem:[#allocation52_spill] sm:$0xff] }
 0x303   :  { %v5871_v57 = vpop.permute.xlu0 %1774  ;;  %v5873_v15 = vpop.permute.xlu1 %1759  ;;  %v1634_v17 = vsub.f32 %v7073_v31, %v5670_v0  ;;  %v1648_v0 = vsub.f32 %v7076_v48, %v5710_v63 }
 0x305   :  { %2202 = vperm.xlu0 %3409, %v1632_v56  }
 0x306   :  { %3401 = vset.pattern.permute.xlu1 %v6688_v34 }
 0x307   :  { %v5880_v22 = vpop.permute.xlu0 %1784  ;;  %2197 = vperm.xlu1 %3401, %v1631_v54   ;;  %v5882_v47 = vpop.permute.xlu1 %1769  ;;  %v7075_v54 = vld [vmem:[#allocation19_spill] sm:$0xff] }
 0x308   :  { %v1617_v46 = vsub.f32 %v7075_v54, %v5607_v14  ;;  %v7079_v14 = vld [vmem:[#allocation56_spill] sm:$0xff] }
 0x309   :  { %2117 = vperm.xlu0 %3409, %v1615_v35  }
 0x30b   :  { %v5888_v2 = vpop.permute.xlu0 %1794  ;;  %2357 = vperm.xlu1 %3401, %v1663_v58   ;;  %v5890_v50 = vpop.permute.xlu1 %1779  ;;  %v1649_v58 = vsub.f32 %v7077_v53, %v5708_v16  ;;  %v7082_v16 = vld [vmem:[#allocation22_spill] sm:$0xff]  ;;  %v7088_v53 = vld [vmem:[#allocation65_spill] sm:$0xff] }
 0x30c   :  { %v1619_v63 = vsub.f32 %v7082_v16, %v5620_v60  ;;  %v7087_v60 = vld [vmem:[#allocation122_spill] sm:$0xff] }
 0x30d   :  { %2277 = vperm.xlu0 %3409, %v1647_v9   ;;  %v1636_v9 = vsub.f32 %v7079_v14, %v5676_v6  ;;  %v7085_v6 = vld [vmem:[#allocation50_spill] sm:$0xff]  ;;  %v7089_v14 = vld [vmem:[#allocation51_spill] sm:$0xff] }
 0x30e   :  { %v1633_v54 = vsub.f32 %v7085_v6, %v5662_v21  ;;  %v7092_v6 = vld [vmem:[#allocation53_spill] sm:$0xff] }
 0x30f   :  { %v5896_v56 = vpop.permute.xlu0 %1804  ;;  %2362 = vperm.xlu1 %3401, %v1664_v41   ;;  %v5898_v33 = vpop.permute.xlu1 %1789 }
 0x311   :  { %2212 = vperm.xlu0 %3409, %v1634_v17  }
 0x313   :  { %v5904_v35 = vpop.permute.xlu0 %1814  ;;  %2122 = vperm.xlu1 %3401, %v1616_v11   ;;  %v5906_v37 = vpop.permute.xlu1 %1799  ;;  %v7084_v11 = vld [vmem:[#allocation107_spill] sm:$0xff] }
 0x315   :  { %2127 = vperm.xlu0 %3409, %v1617_v46   ;;  %v7086_v46 = vld [vmem:[#allocation23_spill] sm:$0xff] }
 0x316   :  { %v1651_v48 = vsub.f32 %v7086_v46, %v5714_v28  ;;  %v7090_v28 = vld [vmem:[#allocation71_spill] sm:$0xff]  ;;  %v1666_v46 = vsub.f32 %v7092_v6, %v5759_v51  ;;  %v7099_v51 = vld [vmem:[#allocation80_spill] sm:$0xff] }
 0x317   :  { %v5912_v8 = vpop.permute.xlu0 %1824  ;;  %2282 = vperm.xlu1 %3401, %v1648_v0   ;;  %v5914_v36 = vpop.permute.xlu1 %1809  ;;  %v7100_v6 = vld [vmem:[#allocation20_spill] sm:$0xff] }
 0x318   :  { %7078 = vst [vmem:[#allocation123_spill] sm:$0xff] %v5912_v8 }
 0x319   :  { %2287 = vperm.xlu0 %3409, %v1649_v58   ;;  %v1638_v58 = vsub.f32 %v7088_v53, %v7087_v60  ;;  %v7093_v60 = vld [vmem:[#allocation117_spill] sm:$0xff] }
 0x31a   :  { %v7094_v53 = vld [vmem:[#allocation21_spill] sm:$0xff] }
 0x31b   :  { %v5918_v41 = vpop.permute.xlu0 %1834  ;;  %3402 = vset.pattern.permute.xlu1 %v7042_v3  ;;  %v5921_v31 = vpop.permute.xlu1 %1819 }
 0x31c   :  { %7080 = vst [vmem:[#allocation124_spill] sm:$0xff] %v5918_v41  ;;  %7081 = vst [vmem:[#allocation84_spill] sm:$0xff] %v5921_v31  ;;  %1964 = vperm.xlu1 %3402, %v5536_v5   ;;  %v7106_v31 = vld [vmem:[#allocation74_spill] sm:$0xff] }
 0x31d   :  { %2222 = vperm.xlu0 %3409, %v1636_v9   ;;  %v1665_v9 = vsub.f32 %v7089_v14, %v5754_v26  ;;  %v1618_v26 = vsub.f32 %v7094_v53, %v7093_v60  ;;  %v7095_v14 = vld [vmem:[#allocation88_spill] sm:$0xff]  ;;  %v7102_v60 = vld [vmem:[#allocation30_spill] sm:$0xff] }
 0x31f   :  { %v5926_v17 = vpop.permute.xlu0 %1844  ;;  %v5928_v23 = vpop.permute.xlu1 %1829 }
 0x320   :  { %7083 = vst [vmem:[#allocation90_spill] sm:$0xff] %v5928_v23  ;;  %1879 = vperm.xlu1 %3402, %v7084_v11   ;;  %v1650_v23 = vsub.f32 %v7100_v6, %v7099_v51 }
 0x321   :  { %2137 = vperm.xlu0 %3409, %v1619_v63   ;;  %v7091_v63 = vld [vmem:[#allocation26_spill] sm:$0xff] }
 0x322   :  { %v1621_v11 = vsub.f32 %v7091_v63, %v7090_v28  ;;  %v7098_v28 = vld [vmem:[#allocation75_spill] sm:$0xff] }
 0x323   :  { %v5935_v0 = vpop.permute.xlu0 %1854  ;;  %v5937_v5 = vpop.permute.xlu1 %1839 }
 0x324   :  { %3403 = vset.pattern.permute.xlu1 %v6688_v34  ;;  %v7096_v34 = vld [vmem:[#allocation27_spill] sm:$0xff] }
 0x325   :  { %2297 = vperm.xlu0 %3409, %v1651_v48   ;;  %2207 = vperm.xlu1 %3403, %v1633_v54   ;;  %v1653_v44 = vsub.f32 %v7096_v34, %v7095_v14 }
 0x327   :  { %v5944_v16 = vpop.permute.xlu0 %1864  ;;  %v5946_v21 = vpop.permute.xlu1 %1849 }
 0x329   :  { %2232 = vperm.xlu0 %3409, %v1638_v58   ;;  %2367 = vperm.xlu1 %3403, %v1665_v9   ;;  %v7097_v9 = vld [vmem:[#allocation77_spill] sm:$0xff] }
 0x32a   :  { %v1640_v63 = vsub.f32 %v7098_v28, %v7097_v9  ;;  %v7103_v9 = vld [vmem:[#allocation66_spill] sm:$0xff]  ;;  %v7104_v28 = vld [vmem:[#allocation31_spill] sm:$0xff] }
 0x32b   :  { %v1925_v48 = vpop.permute.xlu0 %1924  ;;  %v5952_v54 = vpop.permute.xlu1 %1859 }
 0x32d   :  { %2147 = vperm.xlu0 %3409, %v1621_v11   ;;  %2372 = vperm.xlu1 %3403, %v1666_v46   ;;  %v7101_v46 = vld [vmem:[#allocation73_spill] sm:$0xff] }
 0x32e   :  { %v1623_v34 = vsub.f32 %v7102_v60, %v7101_v46 }
 0x32f   :  { %v5958_v45 = vpop.permute.xlu0 %1929  ;;  %v1920_v58 = vpop.permute.xlu1 %1919 }
 0x331   :  { %2307 = vperm.xlu0 %3409, %v1653_v44   ;;  %2132 = vperm.xlu1 %3403, %v1618_v26   ;;  %v3609_v44 = vld [vmem:[%s6536_s0 + $0x180] sm:$0xff] }
 0x332   :  { %v2065_v26 = vmul.f32 %v3609_v44, %v1920_v58  ;;  %v7105_v58 = vld [vmem:[#allocation108_spill] sm:$0xff] }
 0x333   :  { %v5964_v41 = vpop.permute.xlu0 %1939 }
 0x334   :  { %v5966_v11 = vpop.permute.xlu1 %2167 }
 0x335   :  { %2242 = vperm.xlu0 %3409, %v1640_v63   ;;  %2292 = vperm.xlu1 %3403, %v1650_v23   ;;  %v1655_v63 = vsub.f32 %v7104_v28, %v5726_v49  ;;  %v3610_v23 = vld [vmem:[%s6536_s0 + $0x188] sm:$0xff]  ;;  %v7107_v49 = vld [vmem:[#allocation54_spill] sm:$0xff] }
 0x336   :  { %v2066_v51 = vmul.f32 %v3610_v23, %v1925_v48  ;;  %v1635_v28 = vsub.f32 %v7107_v49, %v7106_v31  ;;  %v7108_v48 = vld [vmem:[#allocation115_spill] sm:$0xff] }
 0x337   :  { %v5970_v53 = vpop.permute.xlu0 %1949  ;;  %v7110_v23 = vld [vmem:[#allocation55_spill] sm:$0xff] }
 0x338   :  { %v2328_v14 = vpop.permute.xlu1 %2327 }
 0x339   :  { %2157 = vperm.xlu0 %3409, %v1623_v34   ;;  %3404 = vset.pattern.permute.xlu1 %v7042_v3  ;;  %v2473_v6 = vadd.f32 %v2328_v14, %v2065_v26  ;;  %v7109_v14 = vmov 1  }
 0x33a   :  { %1974 = vperm.xlu1 %3404, %v7103_v9  }
 0x33b   :  { %v5982_v46 = vpop.permute.xlu0 %1874  ;;  %v2541_v44 = vmax.f32 %v2473_v6, 0.0 }
 0x33c   :  { %v2333_v60 = vpop.permute.xlu1 %2332 }
 0x33d   :  { %v2474_v18 = vadd.f32 %v2333_v60, %v2066_v51  ;;  %2317 = vperm.xlu0 %3409, %v1655_v63   ;;  %v7111_v51 = vld [vmem:[#allocation81_spill] sm:$0xff]  ;;  %v7113_v60 = vld [vmem:[#allocation58_spill] sm:$0xff] }
 0x33e   :  { %1889 = vperm.xlu1 %3404, %v7105_v58   ;;  %v1674_v6 = vsub.f32 %v7111_v51, %v5791_v30  ;;  %v1668_v58 = vsub.f32 %v7113_v60, %v5765_v42  ;;  %v7120_v51 = vld [vmem:[#allocation25_spill] sm:$0xff] }
 0x33f   :  { %v5985_v34 = vpop.permute.xlu0 %1959  ;;  %v2542_v9 = vmax.f32 %v2474_v18, 0.0  ;;  %v1667_v18 = vsub.f32 %v7110_v23, %v5762_v20  ;;  %v7116_v20 = vld [vmem:[#allocation118_spill] sm:$0xff] }
 0x340   :  { %v2093_v61 = vpop.permute.xlu1 %2092 }
 0x341   :  { %3411 = vset.pattern.permute.xlu0 %v7042_v3  ;;  %v2633_v8 = vpack.c.bf16 %v2542_v9, %v2541_v44  ;;  %v7114_v44 = vld [vmem:[#allocation82_spill] sm:$0xff] }
 0x342   :  { %1999 = vperm.xlu0 %3411, %v7108_v48   ;;  %3405 = vset.pattern.permute.xlu1 %v7109_v14 }
 0x343   :  { %v5992_v26 = vpop.permute.xlu0 %1884  ;;  %2217 = vperm.xlu1 %3405, %v1635_v28   ;;  %3291 = vmatprep.subr.bf16.mxu1 %v2633_v8  ;;  %v1675_v8 = vsub.f32 %v7114_v44, %v5793_v7  ;;  %v7117_v28 = vld [vmem:[#allocation24_spill] sm:$0xff] }
 0x344   :  { %v5994_v63 = vpop.permute.xlu1 %2252  ;;  %v1620_v30 = vsub.f32 %v7117_v28, %v7116_v20  ;;  %v7125_v28 = vld [vmem:[#allocation109_spill] sm:$0xff] }
 0x346   :  { %3414 = vset.pattern.permute.xlu0 %v7109_v14 }
 0x347   :  { %v6001_v31 = vpop.permute.xlu0 %1969  ;;  %2412 = vperm.xlu0 %3414, %v1674_v6   ;;  %2377 = vperm.xlu1 %3405, %v1667_v18   ;;  %v7119_v18 = vld [vmem:[#allocation35_spill] sm:$0xff] }
 0x348   :  { %7112 = vst [vmem:[#allocation91_spill] sm:$0xff] %v6001_v31  ;;  %v1652_v6 = vsub.f32 %v7120_v51, %v7119_v18  ;;  %v3615_v31 = vld [vmem:[%s6536_s0 + $0x198] sm:$0xff] }
 0x349   :  { %v1935_v9 = vpop.permute.xlu1 %1934 }
 0x34b   :  { %v6007_v49 = vpop.permute.xlu0 %1894  ;;  %2417 = vperm.xlu0 %3414, %v1675_v8   ;;  %2382 = vperm.xlu1 %3405, %v1668_v58   ;;  %v7123_v58 = vld [vmem:[#allocation112_spill] sm:$0xff] }
 0x34c   :  { %7115 = vst [vmem:[#allocation110_spill] sm:$0xff] %v6007_v49 }
 0x34e   :  { %v6011_v48 = vpop.permute.xlu1 %2177 }
 0x34f   :  { %v6013_v23 = vpop.permute.xlu0 %1979  ;;  %2142 = vperm.xlu1 %3405, %v1620_v30   ;;  %v3611_v30 = vld [vmem:[%s6536_s0 + $0x80] sm:$0xff] }
 0x350   :  { %7118 = vst [vmem:[#allocation92_spill] sm:$0xff] %v6013_v23  ;;  %v2033_v18 = vmul.f32 %v3611_v30, %v5873_v15  ;;  %v3613_v15 = vld [vmem:[%s6536_s0 + $0x8] sm:$0xff] }
 0x351   :  { %v2018_v30 = vmul.f32 %v3613_v15, %v5810_v12  ;;  %v2068_v12 = vmul.f32 %v3615_v31, %v1935_v9  ;;  %v3618_v9 = vld [vmem:[%s6536_s0 + $0x100] sm:$0xff] }
 0x352   :  { %v2338_v42 = vpop.permute.xlu1 %2337 }
 0x353   :  { %v6017_v60 = vpop.permute.xlu0 %1904  ;;  %2302 = vperm.xlu1 %3405, %v1652_v6   ;;  %v7126_v6 = vld [vmem:[#allocation121_spill] sm:$0xff] }
 0x354   :  { %7121 = vst [vmem:[#allocation85_spill] sm:$0xff] %v6017_v60 }
 0x356   :  { %v2343_v7 = vpop.permute.xlu1 %2342 }
 0x357   :  { %v6019_v44 = vpop.permute.xlu0 %1989  ;;  %3406 = vset.pattern.permute.xlu1 %v7042_v3  ;;  %v2476_v31 = vadd.f32 %v2343_v7, %v2068_v12  ;;  %v7130_v12 = vld [vmem:[#allocation119_spill] sm:$0xff] }
 0x358   :  { %7122 = vst [vmem:[#allocation95_spill] sm:$0xff] %v6019_v44  ;;  %1984 = vperm.xlu1 %3406, %v7123_v58   ;;  %v7127_v44 = vld [vmem:[#allocation59_spill] sm:$0xff] }
 0x359   :  { %v1637_v60 = vsub.f32 %v7127_v44, %v7126_v6  ;;  %v3612_v58 = vld [vmem:[%s6536_s0 + $0x88] sm:$0xff] }
 0x35a   :  { %v6023_v8 = vpop.permute.xlu1 %2102  ;;  %v2034_v23 = vmul.f32 %v3612_v58, %v5864_v62  ;;  %v7128_v44 = vld [vmem:[#allocation63_spill] sm:$0xff]  ;;  %v3614_v62 = vld [vmem:[%s6536_s0] sm:$0xff] }
 0x35b   :  { %v6025_v20 = vpop.permute.xlu0 %1914  ;;  %v1669_v6 = vsub.f32 %v7128_v44, %v5768_v29  ;;  %v3616_v29 = vld [vmem:[%s6536_s0 + $0x108] sm:$0xff] }
 0x35c   :  { %7124 = vst [vmem:[#allocation93_spill] sm:$0xff] %v6025_v20  ;;  %1899 = vperm.xlu1 %3406, %v7125_v28   ;;  %v2441_v20 = vadd.f32 %v5966_v11, %v2033_v18  ;;  %v2017_v11 = vmul.f32 %v3614_v62, %v5802_v40  ;;  %v2426_v18 = vadd.f32 %v2093_v61, %v2018_v30  ;;  %v7129_v40 = vld [vmem:[#allocation68_spill] sm:$0xff] }
 0x35d   :  { %v1670_v61 = vsub.f32 %v7129_v40, %v5775_v25  ;;  %v2049_v30 = vmul.f32 %v3618_v9, %v5937_v5  ;;  %v7132_v9 = vld [vmem:[#allocation89_spill] sm:$0xff] }
 0x35e   :  { %v6032_v51 = vpop.permute.xlu1 %2262  ;;  %v2509_v43 = vmax.f32 %v2441_v20, 0.0 }
 0x360   :  { %v2173_v28 = vpop.permute.xlu0 %2172  ;;  %3407 = vset.pattern.permute.xlu1 %v7109_v14 }
 0x361   :  { %v2442_v49 = vadd.f32 %v2173_v28, %v2034_v23  ;;  %2227 = vperm.xlu1 %3407, %v1637_v60   ;;  %v2050_v60 = vmul.f32 %v3616_v29, %v5926_v17  ;;  %v2494_v17 = vmax.f32 %v2426_v18, 0.0  ;;  %v2544_v18 = vmax.f32 %v2476_v31, 0.0 }
 0x363   :  { %v2510_v58 = vmax.f32 %v2442_v49, 0.0  ;;  %v1945_v4 = vpop.permute.xlu1 %1944  ;;  %v3617_v49 = vld [vmem:[%s6536_s0 + $0x190] sm:$0xff]  ;;  %v2458_v44 = vadd.f32 %v5994_v63, %v2050_v60  ;;  %v3620_v63 = vld [vmem:[%s6536_s0 + $0x98] sm:$0xff] }
 0x364   :  { %v2088_v23 = vpop.permute.xlu0 %2087  ;;  %v2067_v20 = vmul.f32 %v3617_v49, %v5958_v45 }
 0x365   :  { %v2425_v28 = vadd.f32 %v2088_v23, %v2017_v11  ;;  %2387 = vperm.xlu1 %3407, %v1669_v6   ;;  %v2617_v15 = vpack.c.bf16 %v2510_v58, %v2509_v43  ;;  %v3619_v11 = vld [vmem:[%s6536_s0 + $0x90] sm:$0xff]  ;;  %v2526_v29 = vmax.f32 %v2458_v44, 0.0 }
 0x366   :  { %v2475_v6 = vadd.f32 %v2338_v42, %v2067_v20  ;;  %v2035_v45 = vmul.f32 %v3619_v11, %v5882_v47  ;;  %v7131_v23 = vld [vmem:[#allocation28_spill] sm:$0xff]  ;;  %v2036_v42 = vmul.f32 %v3620_v63, %v5871_v57 }
 0x367   :  { %v2493_v43 = vmax.f32 %v2425_v28, 0.0  ;;  %3227 = vmatprep.subr.bf16.mxu0 %v2617_v15  ;;  %v1622_v5 = vsub.f32 %v7131_v23, %v7130_v12 }
 0x368   :  { %v2248_v25 = vpop.permute.xlu0 %2247  ;;  %v2188_v62 = vpop.permute.xlu1 %2187  ;;  %v2443_v60 = vadd.f32 %v6011_v48, %v2035_v45  ;;  %v2543_v15 = vmax.f32 %v2475_v6, 0.0  ;;  %v3622_v48 = vld [vmem:[%s6536_s0 + $0x10] sm:$0xff] }
 0x369   :  { %v2457_v7 = vadd.f32 %v2248_v25, %v2049_v30  ;;  %2392 = vperm.xlu1 %3407, %v1670_v61   ;;  %v2609_v58 = vpack.c.bf16 %v2494_v17, %v2493_v43  ;;  %v3621_v61 = vld [vmem:[%s6536_s0 + $0x18] sm:$0xff]  ;;  %v2019_v44 = vmul.f32 %v3622_v48, %v5819_v19  ;;  %v3629_v48 = vld [vmem:[%s6536_s0 + $0x28] sm:$0xff] }
 0x36a   :  { %v2020_v49 = vmul.f32 %v3621_v61, %v5807_v27  ;;  %v7133_v30 = vld [vmem:[#allocation29_spill] sm:$0xff]  ;;  %v2634_v17 = vpack.c.bf16 %v2544_v18, %v2543_v15  ;;  %v2511_v43 = vmax.f32 %v2443_v60, 0.0  ;;  %v3623_v27 = vld [vmem:[%s6536_s0 + $0x1a8] sm:$0xff] }
 0x36b   :  { %v2525_v28 = vmax.f32 %v2457_v7, 0.0  ;;  %3228 = vmatpush3.bf16.msra.mxu0 %v2609_v58  ;;  %v1654_v57 = vsub.f32 %v7133_v30, %v7132_v9  ;;  %v2070_v11 = vmul.f32 %v3623_v27, %v1945_v4  ;;  %v3624_v58 = vld [vmem:[%s6536_s0 + $0x118] sm:$0xff]  ;;  %v3626_v4 = vld [vmem:[%s6536_s0 + $0x110] sm:$0xff] }
 0x36c   :  { %v2183_v47 = vpop.permute.xlu0 %2182  ;;  %v2348_v40 = vpop.permute.xlu1 %2347  ;;  %v2428_v6 = vadd.f32 %v6023_v8, %v2020_v49  ;;  %v2052_v12 = vmul.f32 %v3624_v58, %v5935_v0  ;;  %v3625_v8 = vld [vmem:[%s6536_s0 + $0x1a0] sm:$0xff]  ;;  %v2051_v63 = vmul.f32 %v3626_v4, %v5946_v21  ;;  %v7134_v21 = vld [vmem:[#allocation113_spill] sm:$0xff]  ;;  %v7135_v27 = vld [vmem:[#allocation64_spill] sm:$0xff] }
 0x36d   :  { %v2444_v20 = vadd.f32 %v2183_v47, %v2036_v42  ;;  %2152 = vperm.xlu1 %3407, %v1622_v5   ;;  %v2625_v31 = vpack.c.bf16 %v2526_v29, %v2525_v28  ;;  %v2069_v5 = vmul.f32 %v3625_v8, %v5964_v41  ;;  %v3627_v47 = vld [vmem:[%s6536_s0 + $0xa0] sm:$0xff] }
 0x36e   :  { %v2496_v42 = vmax.f32 %v2428_v6, 0.0  ;;  %v2460_v29 = vadd.f32 %v6032_v51, %v2052_v12  ;;  %v2037_v41 = vmul.f32 %v3627_v47, %v5890_v50  ;;  %v3628_v51 = vld [vmem:[%s6536_s0 + $0xa8] sm:$0xff]  ;;  %v7136_v12 = vld [vmem:[#allocation76_spill] sm:$0xff] }
 0x36f   :  { %v2512_v25 = vmax.f32 %v2444_v20, 0.0  ;;  %3292 = vmatpush3.bf16.msra.mxu1 %v2625_v31  ;;  %v2477_v60 = vadd.f32 %v2348_v40, %v2069_v5  ;;  %v2038_v40 = vmul.f32 %v3628_v51, %v5880_v22  ;;  %v3630_v22 = vld [vmem:[%s6536_s0 + $0x20] sm:$0xff] }
 0x370   :  { %v2098_v45 = vpop.permute.xlu0 %2097  ;;  %3293 = vmatprep.subr.bf16.mxu1 %v2634_v17  ;;  %v2353_v7 = vpop.permute.xlu1 %2352  ;;  %v2528_v31 = vmax.f32 %v2460_v29, 0.0  ;;  %v2445_v9 = vadd.f32 %v2188_v62, %v2037_v41  ;;  %v2021_v62 = vmul.f32 %v3630_v22, %v5828_v55  ;;  %v3632_v55 = vld [vmem:[%s6536_s0 + $0x120] sm:$0xff]  ;;  %v7142_v22 = vld [vmem:[#allocation37_spill] sm:$0xff] }
 0x371   :  { %v2618_v19 = vpack.c.bf16 %v2512_v25, %v2511_v43  ;;  %v2427_v23 = vadd.f32 %v2098_v45, %v2019_v44  ;;  %2312 = vperm.xlu1 %3407, %v1654_v57   ;;  %v2478_v18 = vadd.f32 %v2353_v7, %v2070_v11  ;;  %v2545_v57 = vmax.f32 %v2477_v60, 0.0  ;;  %v7139_v51 = vld [vmem:[#allocation78_spill] sm:$0xff] }
 0x372   :  { %v2022_v44 = vmul.f32 %v3629_v48, %v5817_v1  ;;  %v2513_v11 = vmax.f32 %v2445_v9, 0.0 }
 0x373   :  { %v2495_v0 = vmax.f32 %v2427_v23, 0.0  ;;  %3229 = vmatprep.subr.bf16.mxu0 %v2618_v19  ;;  %v2546_v20 = vmax.f32 %v2478_v18, 0.0  ;;  %v7137_v19 = vld [vmem:[#allocation69_spill] sm:$0xff]  ;;  %v3631_v23 = vld [vmem:[%s6536_s0 + $0x128] sm:$0xff] }
 0x374   :  { %v2258_v28 = vpop.permute.xlu0 %2257  ;;  %v2113_v15 = vpop.permute.xlu1 %2112  ;;  %v1639_v1 = vsub.f32 %v7137_v19, %v7136_v12  ;;  %v2054_v8 = vmul.f32 %v3631_v23, %v5944_v16  ;;  %v3637_v19 = vld [vmem:[%s6536_s0 + $0x30] sm:$0xff]  ;;  %v3638_v23 = vld [vmem:[%s6536_s0 + $0x38] sm:$0xff] }
 0x375   :  { %v2610_v61 = vpack.c.bf16 %v2496_v42, %v2495_v0  ;;  %v2459_v49 = vadd.f32 %v2258_v28, %v2051_v63  ;;  %3408 = vset.pattern.permute.xlu1 %v7042_v3  ;;  %v2635_v25 = vpack.c.bf16 %v2546_v20, %v2545_v57  ;;  %v2430_v45 = vadd.f32 %v2113_v15, %v2022_v44  ;;  %v7138_v28 = vld [vmem:[#allocation72_spill] sm:$0xff] }
 0x376   :  { %1994 = vperm.xlu1 %3408, %v7134_v21   ;;  %v2053_v63 = vmul.f32 %v3632_v55, %v5952_v54  ;;  %v1671_v16 = vsub.f32 %v7138_v28, %v5778_v39  ;;  %v3634_v39 = vld [vmem:[%s6536_s0 + $0xb0] sm:$0xff]  ;;  %v3419_v55 = vld [vmem:[%s6537_s2 + $0x4] ss:$20 sps:$4 sm:$0xff]  }
 0x377   :  { %v2527_v30 = vmax.f32 %v2459_v49, 0.0  ;;  %3230 = vmatpush3.bf16.msra.mxu0 %v2610_v61  ;;  %v2498_v42 = vmax.f32 %v2430_v45, 0.0  ;;  %v3633_v61 = vld [vmem:[%s6536_s0 + $0xb8] sm:$0xff]  ;;  %2900 = vmatprep.mubr.bf16.mxu0 %v3419_v55 }
 0x378   :  { %v2193_v17 = vpop.permute.xlu0 %2192  ;;  %v2273_v50 = vpop.permute.xlu1 %2272  ;;  %v2040_v49 = vmul.f32 %v3633_v61, %v5888_v2  ;;  %v7140_v2 = vld [vmem:[#allocation120_spill] sm:$0xff]  ;;  %v3636_v45 = vld [vmem:[%s6536_s0 + $0x1b8] sm:$0xff] }
 0x379   :  { %v2626_v43 = vpack.c.bf16 %v2528_v31, %v2527_v30  ;;  %v2446_v6 = vadd.f32 %v2193_v17, %v2038_v40  ;;  %v2462_v29 = vadd.f32 %v2273_v50, %v2054_v8  ;;  %v1672_v40 = vsub.f32 %v7139_v51, %v5782_v52  ;;  %v7141_v50 = vld [vmem:[#allocation32_spill] sm:$0xff]  ;;  %v3640_v28 = vld [vmem:[%s6536_s0 + $0x138] sm:$0xff] }
 0x37a   :  { %1909 = vperm.xlu1 %3408, %v7135_v27   ;;  %v2039_v31 = vmul.f32 %v3634_v39, %v5898_v33  ;;  %v1624_v48 = vsub.f32 %v7141_v50, %v7140_v2  ;;  %v3635_v52 = vld [vmem:[%s6536_s0 + $0x1b0] sm:$0xff]  ;;  %v2024_v8 = vmul.f32 %v3638_v23, %v5826_v10  ;;  %v7144_v10 = vld [vmem:[#allocation67_spill] sm:$0xff]  ;;  %v7147_v2 = vld [vmem:[#allocation70_spill] sm:$0xff] }
 0x37b   :  { %v2514_v7 = vmax.f32 %v2446_v6, 0.0  ;;  %3294 = vmatpush3.bf16.msra.mxu1 %v2626_v43  ;;  %v2530_v20 = vmax.f32 %v2462_v29, 0.0  ;;  %v3642_v50 = vld [vmem:[%s6536_s0 + $0xc0] sm:$0xff] }
 0x37c   :  { %v2108_v58 = vpop.permute.xlu0 %2107  ;;  %3295 = vmatprep.subr.bf16.mxu1 %v2635_v25  ;;  %v2071_v25 = vmul.f32 %v3635_v52, %v5970_v53  ;;  %v2023_v53 = vmul.f32 %v3637_v19, %v5836_v32  ;;  %v3639_v32 = vld [vmem:[%s6536_s0 + $0x130] sm:$0xff] }
 0x37d   :  { %v2619_v5 = vpack.c.bf16 %v2514_v7, %v2513_v11  ;;  %v2429_v18 = vadd.f32 %v2108_v58, %v2021_v62  ;;  %v1955_v4 = vpop.permute.xlu1 %1954  ;;  %v7143_v62 = vld [vmem:[#allocation33_spill] sm:$0xff] }
 0x37e   :  { %3410 = vset.pattern.permute.xlu1 %v7109_v14  ;;  %v1656_v11 = vsub.f32 %v7143_v62, %v7142_v22  ;;  %v2072_v7 = vmul.f32 %v3636_v45, %v1955_v4 }
 0x37f   :  { %v2497_v0 = vmax.f32 %v2429_v18, 0.0  ;;  %2237 = vperm.xlu1 %3410, %v1639_v1   ;;  %3231 = vmatprep.subr.bf16.mxu0 %v2619_v5 }
 0x380   :  { %v2268_v60 = vpop.permute.xlu0 %2267 }
 0x381   :  { %v2611_v15 = vpack.c.bf16 %v2498_v42, %v2497_v0  ;;  %v2461_v47 = vadd.f32 %v2268_v60, %v2053_v63  ;;  %v1870_v41 = vpop.permute.xlu1 %1869 }
 0x382   :  { %v2055_v29 = vmul.f32 %v3639_v32, %v1870_v41  ;;  %v3422_v41 = vld [vmem:[%s6537_s2 + $0xc] ss:$20 sps:$4 sm:$0xff]  }
 0x383   :  { %v2529_v54 = vmax.f32 %v2461_v47, 0.0  ;;  %2397 = vperm.xlu1 %3410, %v1671_v16   ;;  %3232 = vmatpush3.bf16.msra.mxu0 %v2611_v15  ;;  %v2056_v16 = vmul.f32 %v3640_v28, %v5982_v46 }
 0x384   :  { %v2203_v21 = vpop.permute.xlu0 %2202  ;;  %2997 = vmatprep.mubr.bf16.mxu1 %v3422_v41 }
 0x385   :  { %v2627_v9 = vpack.c.bf16 %v2530_v20, %v2529_v54  ;;  %v2448_v30 = vadd.f32 %v2203_v21, %v2040_v49  ;;  %v7145_v20 = vld [vmem:[#allocation79_spill] sm:$0xff] }
 0x386   :  { %v2198_v57 = vpop.permute.xlu1 %2197  ;;  %v1673_v54 = vsub.f32 %v7145_v20, %v5786_v13  ;;  %v3641_v13 = vld [vmem:[%s6536_s0 + $0xc8] sm:$0xff]  ;;  %v3650_v20 = vld [vmem:[%s6536_s0 + $0xd0] sm:$0xff] }
 0x387   :  { %v2447_v17 = vadd.f32 %v2198_v57, %v2039_v31  ;;  %2402 = vperm.xlu1 %3410, %v1672_v40   ;;  %3296 = vmatpush3.bf16.msra.mxu1 %v2627_v9  ;;  %v2516_v44 = vmax.f32 %v2448_v30, 0.0  ;;  %v7146_v9 = vld [vmem:[#allocation116_spill] sm:$0xff] }
 0x388   :  { %v2118_v33 = vpop.permute.xlu0 %2117 }
 0x389   :  { %v2515_v43 = vmax.f32 %v2447_v17, 0.0  ;;  %v2431_v5 = vadd.f32 %v2118_v33, %v2023_v53  ;;  %v2042_v17 = vmul.f32 %v3641_v13, %v5896_v56  ;;  %v3643_v33 = vld [vmem:[%s6536_s0 + $0x1c0] sm:$0xff] }
 0x38a   :  { %v2358_v6 = vpop.permute.xlu1 %2357  ;;  %v2073_v22 = vmul.f32 %v3643_v33, %v5985_v34  ;;  %v3646_v34 = vld [vmem:[%s6536_s0 + $0x48] sm:$0xff] }
 0x38b   :  { %v2620_v27 = vpack.c.bf16 %v2516_v44, %v2515_v43  ;;  %2162 = vperm.xlu1 %3410, %v1624_v48   ;;  %v2479_v58 = vadd.f32 %v2358_v6, %v2071_v25  ;;  %v2499_v15 = vmax.f32 %v2431_v5, 0.0  ;;  %v2041_v48 = vmul.f32 %v3642_v50, %v5906_v37  ;;  %v7148_v43 = vld [vmem:[#allocation83_spill] sm:$0xff] }
 0x38c   :  { %v2278_v63 = vpop.permute.xlu0 %2277  ;;  %v1676_v6 = vsub.f32 %v7148_v43, %v5800_v59  ;;  %v3644_v37 = vld [vmem:[%s6536_s0 + $0x1c8] sm:$0xff]  ;;  %v2026_v19 = vmul.f32 %v3646_v34, %v5834_v38 }
 0x38d   :  { %3233 = vmatprep.subr.bf16.mxu0 %v2620_v27  ;;  %v2547_v18 = vmax.f32 %v2479_v58, 0.0  ;;  %v2463_v47 = vadd.f32 %v2278_v63, %v2055_v29 }
 0x38e   :  { %v2363_v12 = vpop.permute.xlu1 %2362 }
 0x38f   :  { %v2480_v1 = vadd.f32 %v2363_v12, %v2072_v7  ;;  %2322 = vperm.xlu1 %3410, %v1656_v11   ;;  %v2531_v40 = vmax.f32 %v2463_v47, 0.0  ;;  %v3645_v7 = vld [vmem:[%s6536_s0 + $0x40] sm:$0xff] }
 0x390   :  { %v2213_v57 = vpop.permute.xlu0 %2212  ;;  %v2025_v58 = vmul.f32 %v3645_v7, %v5844_v24  ;;  %v3648_v24 = vld [vmem:[%s6536_s0 + $0x148] sm:$0xff]  ;;  %v7152_v7 = vld [vmem:[#allocation110_spill] sm:$0xff] }
 0x391   :  { %v2548_v4 = vmax.f32 %v2480_v1, 0.0  ;;  %v3647_v1 = vld [vmem:[%s6536_s0 + $0x140] sm:$0xff] }
 0x392   :  { %v2123_v42 = vpop.permute.xlu1 %2122 }
 0x393   :  { %v2636_v0 = vpack.c.bf16 %v2548_v4, %v2547_v18  ;;  %v2432_v60 = vadd.f32 %v2123_v42, %v2024_v8  ;;  %3412 = vset.pattern.permute.xlu1 %v7042_v3  ;;  %v2058_v42 = vmul.f32 %v3648_v24, %v5992_v26  ;;  %v3657_v24 = vld [vmem:[%s6536_s0 + $0xe8] sm:$0xff] }
 0x394   :  { %2004 = vperm.xlu1 %3412, %v7144_v10   ;;  %v2128_v45 = vpop.permute.xlu0 %2127 }
 0x395   :  { %v2500_v61 = vmax.f32 %v2432_v60, 0.0  ;;  %3297 = vmatprep.subr.bf16.mxu1 %v2636_v0  ;;  %v2433_v53 = vadd.f32 %v2128_v45, %v2025_v58 }
 0x396   :  { %v2283_v49 = vpop.permute.xlu1 %2282 }
 0x397   :  { %v2612_v21 = vpack.c.bf16 %v2500_v61, %v2499_v15  ;;  %v2464_v51 = vadd.f32 %v2283_v49, %v2056_v16  ;;  %v2501_v32 = vmax.f32 %v2433_v53, 0.0  ;;  %v3649_v49 = vld [vmem:[%s6536_s0 + $0xd8] sm:$0xff] }
 0x398   :  { %3413 = vset.pattern.permute.xlu1 %v7109_v14  ;;  %v2288_v63 = vpop.permute.xlu0 %2287  ;;  %v2044_v26 = vmul.f32 %v3649_v49, %v5904_v35  ;;  %v3652_v35 = vld [vmem:[%s6536_s0 + $0x1d8] sm:$0xff] }
 0x399   :  { %v2532_v39 = vmax.f32 %v2464_v51, 0.0  ;;  %2407 = vperm.xlu1 %3413, %v1673_v54   ;;  %3234 = vmatpush3.bf16.msra.mxu0 %v2612_v21  ;;  %v2043_v54 = vmul.f32 %v3650_v20, %v5914_v36  ;;  %v3660_v20 = vld [vmem:[%s6536_s0 + $0x1e8] sm:$0xff] }
 0x39b   :  { %v2628_v46 = vpack.c.bf16 %v2532_v39, %v2531_v40  ;;  %v1965_v31 = vpop.permute.xlu1 %1964 }
 0x39c   :  { %v2074_v11 = vmul.f32 %v3644_v37, %v1965_v31  ;;  %v2223_v41 = vpop.permute.xlu0 %2222 }
 0x39d   :  { %3415 = vset.pattern.permute.xlu1 %v7042_v3  ;;  %3298 = vmatpush3.bf16.msra.mxu1 %v2628_v46  ;;  %v2450_v3 = vadd.f32 %v2213_v57, %v2042_v17  ;;  %v2452_v21 = vadd.f32 %v2223_v41, %v2044_v26  ;;  %v7155_v41 = vld [vmem:[#allocation92_spill] sm:$0xff] }
 0x39e   :  { %2009 = vperm.xlu1 %3415, %v7146_v9   ;;  %v3651_v9 = vld [vmem:[%s6536_s0 + $0x1d0] sm:$0xff] }
 0x39f   :  { %v1880_v30 = vpop.permute.xlu1 %1879  ;;  %v2518_v25 = vmax.f32 %v2450_v3, 0.0  ;;  %v2520_v39 = vmax.f32 %v2452_v21, 0.0  ;;  %v7150_v3 = vld [vmem:[#allocation41_spill] sm:$0xff] }
 0x3a0   :  { %v2057_v23 = vmul.f32 %v3647_v1, %v1880_v30  ;;  %v7149_v30 = vld [vmem:[#allocation91_spill] sm:$0xff]  ;;  %v2138_v36 = vpop.permute.xlu0 %2137 }
 0x3a1   :  { %v2075_v57 = vmul.f32 %v3651_v9, %v7149_v30  ;;  %v3662_v30 = vld [vmem:[%s6536_s0 + $0x68] sm:$0xff] }
 0x3a2   :  { %2014 = vperm.xlu1 %3415, %v7147_v2   ;;  %v2465_v38 = vadd.f32 %v2288_v63, %v2057_v23 }
 0x3a4   :  { %v2208_v44 = vpop.permute.xlu1 %2207  ;;  %v2533_v28 = vmax.f32 %v2465_v38, 0.0  ;;  %v2298_v45 = vpop.permute.xlu0 %2297  ;;  %v3658_v38 = vld [vmem:[%s6536_s0 + $0xe0] sm:$0xff] }
 0x3a5   :  { %v2449_v52 = vadd.f32 %v2208_v44, %v2041_v48  ;;  %v3653_v48 = vld [vmem:[%s6536_s0 + $0x50] sm:$0xff] }
 0x3a6   :  { %3416 = vset.pattern.permute.xlu1 %v7109_v14  ;;  %v2027_v44 = vmul.f32 %v3653_v48, %v7150_v3 }
 0x3a7   :  { %v2517_v27 = vmax.f32 %v2449_v52, 0.0  ;;  %2422 = vperm.xlu1 %3416, %v1676_v6   ;;  %v3654_v6 = vld [vmem:[%s6536_s0 + $0x58] sm:$0xff]  ;;  %v7151_v52 = vld [vmem:[#allocation39_spill] sm:$0xff] }
 0x3a8   :  { %v2368_v56 = vpop.permute.xlu1 %2367  ;;  %v2233_v63 = vpop.permute.xlu0 %2232 }
 0x3a9   :  { %v2621_v62 = vpack.c.bf16 %v2518_v25, %v2517_v27  ;;  %v2481_v59 = vadd.f32 %v2368_v56, %v2073_v22  ;;  %v2028_v25 = vmul.f32 %v3654_v6, %v7151_v52  ;;  %v2435_v27 = vadd.f32 %v2138_v36, %v2027_v44  ;;  %v3655_v56 = vld [vmem:[%s6536_s0 + $0x150] sm:$0xff]  ;;  %v3664_v6 = vld [vmem:[%s6536_s0 + $0x168] sm:$0xff]  ;;  %v7158_v52 = vld [vmem:[#allocation85_spill] sm:$0xff] }
 0x3ab   :  { %3235 = vmatprep.subr.bf16.mxu0 %v2621_v62  ;;  %v2549_v8 = vmax.f32 %v2481_v59, 0.0 }
 0x3ac   :  { %v2373_v14 = vpop.permute.xlu1 %2372 }
 0x3ad   :  { %v2482_v12 = vadd.f32 %v2373_v14, %v2074_v11  ;;  %v3656_v14 = vld [vmem:[%s6536_s0 + $0x158] sm:$0xff] }
 0x3ae   :  { %v2060_v58 = vmul.f32 %v3656_v14, %v7152_v7 }
 0x3af   :  { %v2550_v5 = vmax.f32 %v2482_v12, 0.0  ;;  %v2503_v12 = vmax.f32 %v2435_v27, 0.0 }
 0x3b0   :  { %v2133_v18 = vpop.permute.xlu1 %2132 }
 0x3b1   :  { %v2637_v4 = vpack.c.bf16 %v2550_v5, %v2549_v8  ;;  %v2434_v55 = vadd.f32 %v2133_v18, %v2026_v19 }
 0x3b3   :  { %v2502_v29 = vmax.f32 %v2434_v55, 0.0  ;;  %3299 = vmatprep.subr.bf16.mxu1 %v2637_v4 }
 0x3b4   :  { %v2293_v0 = vpop.permute.xlu1 %2292 }
 0x3b5   :  { %v2613_v60 = vpack.c.bf16 %v2502_v29, %v2501_v32  ;;  %v2466_v10 = vadd.f32 %v2293_v0, %v2058_v42  ;;  %v7153_v42 = vld [vmem:[#allocation123_spill] sm:$0xff]  ;;  %v7154_v29 = vld [vmem:[#allocation84_spill] sm:$0xff] }
 0x3b6   :  { %v2046_v32 = vmul.f32 %v3657_v24, %v7153_v42  ;;  %v2045_v0 = vmul.f32 %v3658_v38, %v7154_v29  ;;  %v3667_v24 = vld [vmem:[%s6536_s0 + $0x1f0] sm:$0xff]  ;;  %v7161_v42 = vld [vmem:[#allocation95_spill] sm:$0xff] }
 0x3b7   :  { %v2534_v16 = vmax.f32 %v2466_v10, 0.0  ;;  %3236 = vmatpush3.bf16.msra.mxu0 %v2613_v60 }
 0x3b8   :  { %v2454_v60 = vadd.f32 %v2233_v63, %v2046_v32  ;;  %v2079_v32 = vmul.f32 %v3667_v24, %v7161_v42  ;;  %v3434_v42 = vld [vmem:[%s6537_s2 + $0x58] ss:$20 sps:$4 sm:$0xff]  }
 0x3b9   :  { %v2629_v15 = vpack.c.bf16 %v2534_v16, %v2533_v28  ;;  %v1975_v47 = vpop.permute.xlu1 %1974 }
 0x3ba   :  { %v2076_v17 = vmul.f32 %v3652_v35, %v1975_v47  ;;  %v2522_v16 = vmax.f32 %v2454_v60, 0.0 }
 0x3bb   :  { %3300 = vmatpush3.bf16.msra.mxu1 %v2629_v15 }
 0x3bd   :  { %v1890_v61 = vpop.permute.xlu1 %1889 }
 0x3be   :  { %v2059_v33 = vmul.f32 %v3655_v56, %v1890_v61  ;;  %v3659_v61 = vld [vmem:[%s6536_s0 + $0x1e0] sm:$0xff] }
 0x3bf   :  { %v2077_v49 = vmul.f32 %v3659_v61, %v7155_v41  ;;  %v3670_v41 = vld [vmem:[%s6536_s0 + $0x78] sm:$0xff] }
 0x3c0   :  { %v2467_v34 = vadd.f32 %v2298_v45, %v2059_v33 }
 0x3c2   :  { %v2218_v51 = vpop.permute.xlu1 %2217  ;;  %v2535_v8 = vmax.f32 %v2467_v34, 0.0  ;;  %v7159_v34 = vld [vmem:[#allocation124_spill] sm:$0xff] }
 0x3c3   :  { %v2451_v40 = vadd.f32 %v2218_v51, %v2043_v54  ;;  %v2148_v51 = vpop.permute.xlu0 %2147 }
 0x3c5   :  { %v2519_v46 = vmax.f32 %v2451_v40, 0.0 }
 0x3c6   :  { %v2378_v31 = vpop.permute.xlu1 %2377 }
 0x3c7   :  { %v2622_v13 = vpack.c.bf16 %v2520_v39, %v2519_v46  ;;  %v2483_v2 = vadd.f32 %v2378_v31, %v2075_v57  ;;  %v3661_v39 = vld [vmem:[%s6536_s0 + $0x60] sm:$0xff]  ;;  %v7156_v46 = vld [vmem:[#allocation104_spill] sm:$0xff] }
 0x3c8   :  { %v2029_v31 = vmul.f32 %v3661_v39, %v7156_v46  ;;  %v7157_v57 = vld [vmem:[#allocation94_spill] sm:$0xff] }
 0x3c9   :  { %3237 = vmatprep.subr.bf16.mxu0 %v2622_v13  ;;  %v2551_v22 = vmax.f32 %v2483_v2, 0.0  ;;  %v2030_v13 = vmul.f32 %v3662_v30, %v7157_v57  ;;  %v3672_v30 = vld [vmem:[%s6536_s0 + $0x178] sm:$0xff] }
 0x3ca   :  { %v2383_v50 = vpop.permute.xlu1 %2382  ;;  %v2437_v35 = vadd.f32 %v2148_v51, %v2029_v31  ;;  %v7164_v57 = vld [vmem:[#allocation93_spill] sm:$0xff] }
 0x3cb   :  { %v2484_v43 = vadd.f32 %v2383_v50, %v2076_v17  ;;  %v3663_v17 = vld [vmem:[%s6536_s0 + $0x160] sm:$0xff] }
 0x3cc   :  { %v2505_v27 = vmax.f32 %v2437_v35, 0.0 }
 0x3cd   :  { %v2552_v62 = vmax.f32 %v2484_v43, 0.0  ;;  %v2308_v43 = vpop.permute.xlu0 %2307 }
 0x3ce   :  { %v2143_v37 = vpop.permute.xlu1 %2142 }
 0x3cf   :  { %v2638_v11 = vpack.c.bf16 %v2552_v62, %v2551_v22  ;;  %v2436_v59 = vadd.f32 %v2143_v37, %v2028_v25  ;;  %v2062_v25 = vmul.f32 %v3664_v6, %v7158_v52  ;;  %v3423_v52 = vld [vmem:[%s6537_s2 + $0x2c] ss:$20 sps:$4 sm:$0xff]  }
 0x3d1   :  { %v2504_v19 = vmax.f32 %v2436_v59, 0.0  ;;  %3301 = vmatprep.subr.bf16.mxu1 %v2638_v11 }
 0x3d2   :  { %v2303_v53 = vpop.permute.xlu1 %2302 }
 0x3d3   :  { %v2614_v1 = vpack.c.bf16 %v2504_v19, %v2503_v12  ;;  %v2468_v23 = vadd.f32 %v2303_v53, %v2060_v58  ;;  %v2243_v58 = vpop.permute.xlu0 %2242  ;;  %v3665_v12 = vld [vmem:[%s6536_s0 + $0xf8] sm:$0xff]  ;;  %v3666_v53 = vld [vmem:[%s6536_s0 + $0xf0] sm:$0xff] }
 0x3d4   :  { %v2048_v19 = vmul.f32 %v3665_v12, %v7159_v34  ;;  %v3429_v12 = vld [vmem:[%s6537_s2 + $0x54] ss:$20 sps:$4 sm:$0xff]  }
 0x3d5   :  { %v2536_v5 = vmax.f32 %v2468_v23, 0.0  ;;  %3238 = vmatpush3.bf16.msra.mxu0 %v2614_v1  ;;  %v7160_v1 = vld [vmem:[#allocation90_spill] sm:$0xff] }
 0x3d6   :  { %v2047_v23 = vmul.f32 %v3666_v53, %v7160_v1  ;;  %v3428_v53 = vld [vmem:[%s6537_s2 + $0x30] ss:$20 sps:$4 sm:$0xff]  }
 0x3d7   :  { %v2630_v18 = vpack.c.bf16 %v2536_v5, %v2535_v8  ;;  %v1985_v4 = vpop.permute.xlu1 %1984  ;;  %v2456_v8 = vadd.f32 %v2243_v58, %v2048_v19  ;;  %v2158_v29 = vpop.permute.xlu0 %2157 }
 0x3d8   :  { %v2078_v54 = vmul.f32 %v3660_v20, %v1985_v4 }
 0x3d9   :  { %3302 = vmatpush3.bf16.msra.mxu1 %v2630_v18  ;;  %v2524_v4 = vmax.f32 %v2456_v8, 0.0  ;;  %v3432_v8 = vld [vmem:[%s6537_s2 + $0x5c] ss:$20 sps:$4 sm:$0xff]  }
 0x3db   :  { %v1900_v55 = vpop.permute.xlu1 %1899  ;;  %v2318_v39 = vpop.permute.xlu0 %2317 }
 0x3dc   :  { %v2061_v2 = vmul.f32 %v3663_v17, %v1900_v55 }
 0x3de   :  { %v2469_v56 = vadd.f32 %v2308_v43, %v2061_v2 }
 0x3e0   :  { %v2228_v10 = vpop.permute.xlu1 %2227  ;;  %v2537_v11 = vmax.f32 %v2469_v56, 0.0  ;;  %v3673_v56 = vld [vmem:[%s6536_s0 + $0x208] sm:$0xff] }
 0x3e1   :  { %v2453_v28 = vadd.f32 %v2228_v10, %v2045_v0  ;;  %v3668_v0 = vld [vmem:[%s6536_s0 + $0x1f8] sm:$0xff] }
 0x3e3   :  { %v2521_v15 = vmax.f32 %v2453_v28, 0.0 }
 0x3e4   :  { %v2388_v47 = vpop.permute.xlu1 %2387 }
 0x3e5   :  { %v2623_v26 = vpack.c.bf16 %v2522_v16, %v2521_v15  ;;  %v2485_v21 = vadd.f32 %v2388_v47, %v2077_v49  ;;  %v3669_v16 = vld [vmem:[%s6536_s0 + $0x70] sm:$0xff]  ;;  %v7162_v15 = vld [vmem:[#allocation49_spill] sm:$0xff]  ;;  %v7163_v49 = vld [vmem:[#allocation98_spill] sm:$0xff] }
 0x3e6   :  { %v2031_v47 = vmul.f32 %v3669_v16, %v7162_v15 }
 0x3e7   :  { %3239 = vmatprep.subr.bf16.mxu0 %v2623_v26  ;;  %v2553_v36 = vmax.f32 %v2485_v21, 0.0  ;;  %v2032_v26 = vmul.f32 %v3670_v41, %v7163_v49  ;;  %v3440_v41 = vld [vmem:[%s6537_s2 + $0x80] ss:$20 sps:$4 sm:$0xff]  }
 0x3e8   :  { %v2393_v40 = vpop.permute.xlu1 %2392  ;;  %v2439_v20 = vadd.f32 %v2158_v29, %v2031_v47  ;;  %v3444_v49 = vld [vmem:[%s6537_s2 + $0xac] ss:$20 sps:$4 sm:$0xff]  }
 0x3e9   :  { %v2486_v9 = vadd.f32 %v2393_v40, %v2078_v54  ;;  %v3671_v54 = vld [vmem:[%s6536_s0 + $0x170] sm:$0xff] }
 0x3ea   :  { %v2507_v35 = vmax.f32 %v2439_v20, 0.0  ;;  %v3447_v20 = vld [vmem:[%s6537_s2 + $0xcc] ss:$20 sps:$4 sm:$0xff]  }
 0x3eb   :  { %v2554_v50 = vmax.f32 %v2486_v9, 0.0 }
 0x3ec   :  { %v2153_v48 = vpop.permute.xlu1 %2152 }
 0x3ed   :  { %v2639_v3 = vpack.c.bf16 %v2554_v50, %v2553_v36  ;;  %v2438_v44 = vadd.f32 %v2153_v48, %v2030_v13  ;;  %v2064_v13 = vmul.f32 %v3672_v30, %v7164_v57  ;;  %v3458_v30 = vld [vmem:[%s6537_s2 + $0xf8] ss:$20 sps:$4 sm:$0xff]  }
 0x3ee   :  { %v3462_v57 = vld [vmem:[%s6537_s2 + $0x124] ss:$20 sps:$4 sm:$0xff]  }
 0x3ef   :  { %v2506_v33 = vmax.f32 %v2438_v44, 0.0  ;;  %3303 = vmatprep.subr.bf16.mxu1 %v2639_v3  ;;  %v2000_v3 = vpop.permute.xlu0 %1999  ;;  %v3417_v44 = vld [vmem:[%s6537_s2] ss:$20 sps:$4 sm:$0xff]  }
 0x3f0   :  { %v2313_v22 = vpop.permute.xlu1 %2312 }
 0x3f1   :  { %v2615_v62 = vpack.c.bf16 %v2506_v33, %v2505_v27  ;;  %v2470_v37 = vadd.f32 %v2313_v22, %v2062_v25  ;;  %v3420_v22 = vld [vmem:[%s6537_s2 + $0x8] ss:$20 sps:$4 sm:$0xff]  }
 0x3f3   :  { %v2538_v59 = vmax.f32 %v2470_v37, 0.0  ;;  %3240 = vmatpush3.bf16.msra.mxu0 %v2615_v62  ;;  %v3426_v62 = vld [vmem:[%s6537_s2 + $0x34] ss:$20 sps:$4 sm:$0xff]   ;;  %v2413_v37 = vpop.permute.xlu0 %2412 }
 0x3f5   :  { %v2631_v45 = vpack.c.bf16 %v2538_v59, %v2537_v11  ;;  %v1995_v14 = vpop.permute.xlu1 %1994  ;;  %v3674_v11 = vld [vmem:[%s6536_s0 + $0x200] sm:$0xff] }
 0x3f6   :  { %v2080_v60 = vmul.f32 %v3668_v0, %v1995_v14  ;;  %v2081_v59 = vmul.f32 %v3674_v11, %v2000_v3  ;;  %v3438_v0 = vld [vmem:[%s6537_s2 + $0x84] ss:$20 sps:$4 sm:$0xff]   ;;  %v3471_v3 = vld [vmem:[%s6537_s2 + $0x100] ss:$20 sps:$4 sm:$0xff]  }
 0x3f7   :  { %3304 = vmatpush3.bf16.msra.mxu1 %v2631_v45  ;;  %v2418_v24 = vpop.permute.xlu0 %2417 }
 0x3f9   :  { %v1910_v7 = vpop.permute.xlu1 %1909 }
 0x3fa   :  { %v2063_v21 = vmul.f32 %v3671_v54, %v1910_v7  ;;  %v3425_v7 = vld [vmem:[%s6537_s2 + $0x28] ss:$20 sps:$4 sm:$0xff]  }
 0x3fb   :  { %v3446_v54 = vld [vmem:[%s6537_s2 + $0xa8] ss:$20 sps:$4 sm:$0xff]  }
 0x3fc   :  { %v2471_v17 = vadd.f32 %v2318_v39, %v2063_v21  ;;  %v3450_v21 = vld [vmem:[%s6537_s2 + $0xd4] ss:$20 sps:$4 sm:$0xff]   ;;  %v3452_v39 = vld [vmem:[%s6537_s2 + $0xd0] ss:$20 sps:$4 sm:$0xff]  }
 0x3fe   :  { %v2238_v5 = vpop.permute.xlu1 %2237  ;;  %v2539_v43 = vmax.f32 %v2471_v17, 0.0  ;;  %v3464_v17 = vld [vmem:[%s6537_s2 + $0x120] ss:$20 sps:$4 sm:$0xff]  }
 0x3ff   :  { %v2455_v18 = vadd.f32 %v2238_v5, %v2047_v23  ;;  %v3431_v5 = vld [vmem:[%s6537_s2 + $0x50] ss:$20 sps:$4 sm:$0xff]  }
 0x401   :  { %v2523_v55 = vmax.f32 %v2455_v18, 0.0  ;;  %v3675_v18 = vld [vmem:[%s6536_s0 + $0x210] sm:$0xff] }
 0x402   :  { %v2398_v63 = vpop.permute.xlu1 %2397 }
 0x403   :  { %v2624_v38 = vpack.c.bf16 %v2524_v4, %v2523_v55  ;;  %v2487_v10 = vadd.f32 %v2398_v63, %v2079_v32  ;;  %v3435_v63 = vld [vmem:[%s6537_s2 + $0x7c] ss:$20 sps:$4 sm:$0xff]  }
 0x405   :  { %3241 = vmatprep.subr.bf16.mxu0 %v2624_v38  ;;  %v2555_v51 = vmax.f32 %v2487_v10, 0.0  ;;  %v3676_v38 = vld [vmem:[%s6536_s0 + $0x218] sm:$0xff] }
 0x406   :  { %v2403_v28 = vpop.permute.xlu1 %2402 }
 0x407   :  { %v2488_v61 = vadd.f32 %v2403_v28, %v2080_v60  ;;  %v3437_v28 = vld [vmem:[%s6537_s2 + $0x78] ss:$20 sps:$4 sm:$0xff]  }
 0x409   :  { %v2556_v40 = vmax.f32 %v2488_v61, 0.0  ;;  %v3441_v61 = vld [vmem:[%s6537_s2 + $0xa4] ss:$20 sps:$4 sm:$0xff]  }
 0x40a   :  { %v2163_v46 = vpop.permute.xlu1 %2162 }
 0x40b   :  { %v2640_v31 = vpack.c.bf16 %v2556_v40, %v2555_v51  ;;  %v2440_v9 = vadd.f32 %v2163_v46, %v2032_v26  ;;  %v3443_v26 = vld [vmem:[%s6537_s2 + $0xa0] ss:$20 sps:$4 sm:$0xff]   ;;  %v3449_v51 = vld [vmem:[%s6537_s2 + $0xc8] ss:$20 sps:$4 sm:$0xff]  }
 0x40c   :  { %v3453_v40 = vld [vmem:[%s6537_s2 + $0xf4] ss:$20 sps:$4 sm:$0xff]   ;;  %v3456_v46 = vld [vmem:[%s6537_s2 + $0xfc] ss:$20 sps:$4 sm:$0xff]  }
 0x40d   :  { %v2508_v2 = vmax.f32 %v2440_v9, 0.0  ;;  %3305 = vmatprep.subr.bf16.mxu1 %v2640_v31  ;;  %v3455_v31 = vld [vmem:[%s6537_s2 + $0xf0] ss:$20 sps:$4 sm:$0xff]  }
 0x40e   :  { %v2323_v36 = vpop.permute.xlu1 %2322  ;;  %v3459_v9 = vld [vmem:[%s6537_s2 + $0x11c] ss:$20 sps:$4 sm:$0xff]  }
 0x40f   :  { %v2616_v50 = vpack.c.bf16 %v2508_v2, %v2507_v35  ;;  %v2472_v48 = vadd.f32 %v2323_v36, %v2064_v13  ;;  %v3461_v13 = vld [vmem:[%s6537_s2 + $0x118] ss:$20 sps:$4 sm:$0xff]   ;;  %v3465_v35 = vld [vmem:[%s6537_s2 + $0x10] ss:$20 sps:$4 sm:$0xff]  }
 0x410   :  { %v3467_v2 = vld [vmem:[%s6537_s2 + $0xb0] ss:$20 sps:$4 sm:$0xff]   ;;  %v3466_v36 = vld [vmem:[%s6537_s2 + $0x38] ss:$20 sps:$4 sm:$0xff]  }
 0x411   :  { %v2540_v6 = vmax.f32 %v2472_v48, 0.0  ;;  %3242 = vmatpush3.bf16.msra.mxu0 %v2616_v50  ;;  %v3469_v50 = vld [vmem:[%s6537_s2 + $0x60] ss:$20 sps:$4 sm:$0xff]   ;;  %v3468_v48 = vld [vmem:[%s6537_s2 + $0xd8] ss:$20 sps:$4 sm:$0xff]  }
 0x413   :  { %v2632_v25 = vpack.c.bf16 %v2540_v6, %v2539_v43  ;;  %v2005_v27 = vpop.permute.xlu1 %2004  ;;  %v3472_v43 = vld [vmem:[%s6537_s2 + $0x128] ss:$20 sps:$4 sm:$0xff]  }
 0x414   :  { %v2082_v33 = vmul.f32 %v3673_v56, %v2005_v27  ;;  %2901 = vmatmul.mubr.bf16.vlgmr.msra.gmra.mrb[0].mxu0 %v3417_v44  ;;  %v3470_v44 = vld [vmem:[%s6537_s2 + $0x88] ss:$20 sps:$4 sm:$0xff]  }
 0x415   :  { %3306 = vmatpush3.bf16.msra.mxu1 %v2632_v25  ;;  %2908 = vmatprep.mubr.bf16.mxu0 %v3423_v52 }
 0x416   :  { %v2490_v45 = vadd.f32 %v2413_v37, %v2082_v33 }
 0x418   :  { %2998 = vmatmul.mubr.bf16.vlgmr.msra.gmra.mrb[0].mxu1 %v3420_v22  ;;  %v2408_v14 = vpop.permute.xlu1 %2407  ;;  %v2558_v34 = vmax.f32 %v2490_v45, 0.0 }
 0x419   :  { %v2489_v58 = vadd.f32 %v2408_v14, %v2081_v59  ;;  %3005 = vmatprep.mubr.bf16.mxu1 %v3426_v62 }
 0x41b   :  { %v2557_v19 = vmax.f32 %v2489_v58, 0.0 }
 0x41c   :  { %2909 = vmatmul.mubr.bf16.gmra.mrb[4].mxu0 %v3425_v7 }
 0x41d   :  { %v2641_v1 = vpack.c.bf16 %v2558_v34, %v2557_v19  ;;  %v2010_v23 = vpop.permute.xlu1 %2009  ;;  %2916 = vmatprep.mubr.bf16.mxu0 %v3429_v12 }
 0x41e   :  { %v2083_v4 = vmul.f32 %v3675_v18, %v2010_v23 }
 0x41f   :  { %3365 = vmatprep.subr.bf16.mxu0 %v2641_v1  ;;  %3385 = vmatprep.subr.bf16.mxu1 %v2641_v1 }
 0x420   :  { %3006 = vmatmul.mubr.bf16.gmra.mrb[4].mxu1 %v3428_v53  ;;  %3366 = vmatpush3.bf16.msra.mxu0 %v2641_v1  ;;  %v2491_v32 = vadd.f32 %v2418_v24, %v2083_v4 }
 0x421   :  { %3387 = vmatpush3.bf16.msra.mxu1 %v2641_v1  ;;  %v2015_v55 = vpop.permute.xlu1 %2014  ;;  %3013 = vmatprep.mubr.bf16.mxu1 %v3432_v8 }
 0x422   :  { %v2084_v29 = vmul.f32 %v3676_v38, %v2015_v55  ;;  %v2559_v16 = vmax.f32 %v2491_v32, 0.0 }
 0x424   :  { %2917 = vmatmul.mubr.bf16.gmra.mrb[8].mxu0 %v3431_v5 }
 0x425   :  { %2924 = vmatprep.mubr.bf16.mxu0 %v3435_v63 }
 0x426   :  { %v2423_v60 = vpop.permute.xlu1 %2422 }
 0x427   :  { %v2492_v10 = vadd.f32 %v2423_v60, %v2084_v29 }
 0x428   :  { %3014 = vmatmul.mubr.bf16.gmra.mrb[8].mxu1 %v3434_v42 }
 0x429   :  { %v2560_v15 = vmax.f32 %v2492_v10, 0.0  ;;  %3021 = vmatprep.mubr.bf16.mxu1 %v3438_v0 }
 0x42b   :  { %v2642_v47 = vpack.c.bf16 %v2560_v15, %v2559_v16 }
 0x42c   :  { %2925 = vmatmul.mubr.bf16.gmra.mrb[12].mxu0 %v3437_v28 }
 0x42d   :  { %3367 = vmatprep.subr.bf16.mxu0 %v2642_v47  ;;  %3386 = vmatprep.subr.bf16.mxu1 %v2642_v47 }
 0x42e   :  { %3368 = vmatpush3.bf16.msra.mxu0 %v2642_v47  ;;  %3388 = vmatpush3.bf16.msra.mxu1 %v2642_v47 }
 0x42f   :  { %2932 = vmatprep.mubr.bf16.mxu0 %v3441_v61 }
 0x430   :  { %3022 = vmatmul.mubr.bf16.gmra.mrb[12].mxu1 %v3440_v41 }
 0x431   :  { %3029 = vmatprep.mubr.bf16.mxu1 %v3444_v49 }
 0x434   :  { %2933 = vmatmul.mubr.bf16.gmra.mrb[16].mxu0 %v3443_v26 }
 0x435   :  { %2940 = vmatprep.mubr.bf16.mxu0 %v3447_v20 }
 0x438   :  { %3030 = vmatmul.mubr.bf16.gmra.mrb[16].mxu1 %v3446_v54 }
 0x439   :  { %3037 = vmatprep.mubr.bf16.mxu1 %v3450_v21 }
 0x43c   :  { %2941 = vmatmul.mubr.bf16.gmra.mrb[20].mxu0 %v3449_v51 }
 0x43d   :  { %2948 = vmatprep.mubr.bf16.mxu0 %v3453_v40 }
 0x440   :  { %3038 = vmatmul.mubr.bf16.gmra.mrb[20].mxu1 %v3452_v39 }
 0x441   :  { %3045 = vmatprep.mubr.bf16.mxu1 %v3456_v46 }
 0x444   :  { %2949 = vmatmul.mubr.bf16.gmra.mrb[24].mxu0 %v3455_v31 }
 0x445   :  { %2956 = vmatprep.mubr.bf16.mxu0 %v3459_v9 }
 0x448   :  { %3046 = vmatmul.mubr.bf16.gmra.mrb[24].mxu1 %v3458_v30 }
 0x449   :  { %3053 = vmatprep.mubr.bf16.mxu1 %v3462_v57 }
 0x44c   :  { %2957 = vmatmul.mubr.bf16.gmra.mrb[28].mxu0 %v3461_v13 }
 0x44d   :  { %3369 = vmatprep.mubr.msk.bf16.mxu0 %vm2843_vm1, %v3465_v35 }
 0x450   :  { %3054 = vmatmul.mubr.bf16.gmra.mrb[28].mxu1 %v3464_v17 }
 0x451   :  { %3377 = vmatprep.mubr.msk.bf16.mxu1 %vm2843_vm1, %v3467_v2 }
 0x454   :  { %3370 = vmatmul.mubr.msk.bf16.vlgmr.msra.gmra.mrb[32].mxu0 %vm2843_vm1, %v3466_v36 }
 0x455   :  { %3373 = vmatprep.mubr.msk.bf16.mxu0 %vm2843_vm1, %v3469_v50 }
 0x458   :  { %3378 = vmatmul.mubr.msk.bf16.vlgmr.msra.gmra.mrb[32].mxu1 %vm2843_vm1, %v3468_v48 }
 0x459   :  { %3381 = vmatprep.mubr.msk.bf16.mxu1 %vm2843_vm1, %v3471_v3 }
 0x45c   :  { %3374 = vmatmul.mubr.msk.bf16.gmra.mrb[36].mxu0 %vm2843_vm1, %v3470_v44 }
 0x460   :  { %3382 = vmatmul.mubr.msk.bf16.gmra.mrb[36].mxu1 %vm2843_vm1, %v3472_v43 }
 0x4e7   :  { %v3243_v6 = vpop.f32.mrb[0].mxu0 }
 0x4e8   :  { %v3244_v52 = vpop.f32.mrb[1].mxu0 }
 0x4e9   :  { %v3245_v25 = vadd.f32 %v3244_v52, %v3243_v6  ;;  %v3246_v27 = vpop.f32.mrb[2].mxu0 }
 0x4ea   :  { %v3247_v56 = vpop.f32.mrb[3].mxu0 }
 0x4eb   :  { %v3307_v33 = vpop.f32.mrb[0].mxu1  ;;  %v3248_v22 = vadd.f32 %v3247_v56, %v3246_v27 }
 0x4ec   :  { %v3308_v62 = vpop.f32.mrb[1].mxu1 }
 0x4ed   :  { %v3309_v37 = vadd.f32 %v3308_v62, %v3307_v33  ;;  %v3310_v11 = vpop.f32.mrb[2].mxu1 }
 0x4ee   :  { %v3311_v59 = vpop.f32.mrb[3].mxu1 }
 0x4ef   :  { %v3312_v45 = vadd.f32 %v3311_v59, %v3310_v11  ;;  %v3249_v14 = vpop.f32.mrb[4].mxu0  ;;  %v6447_v7 = vadd.f32 %v3309_v37, %v3245_v25 }
 0x4f0   :  { %v3250_v58 = vpop.f32.mrb[5].mxu0 }
 0x4f1   :  { %v3251_v12 = vadd.f32 %v3250_v58, %v3249_v14  ;;  %v3252_v34 = vpop.f32.mrb[6].mxu0  ;;  %v6449_v19 = vadd.f32 %v3312_v45, %v3248_v22 }
 0x4f2   :  { %v3253_v53 = vpop.f32.mrb[7].mxu0 }
 0x4f3   :  { %v3313_v1 = vpop.f32.mrb[4].mxu1  ;;  %v3254_v23 = vadd.f32 %v3253_v53, %v3252_v34 }
 0x4f4   :  { %v3314_v8 = vpop.f32.mrb[5].mxu1 }
 0x4f5   :  { %v3315_v5 = vadd.f32 %v3314_v8, %v3313_v1  ;;  %v3316_v18 = vpop.f32.mrb[6].mxu1 }
 0x4f6   :  { %v3317_v4 = vpop.f32.mrb[7].mxu1 }
 0x4f7   :  { %v3318_v55 = vadd.f32 %v3317_v4, %v3316_v18  ;;  %v3255_v63 = vpop.f32.mrb[8].mxu0  ;;  %v6451_v24 = vadd.f32 %v3315_v5, %v3251_v12 }
 0x4f8   :  { %v3256_v42 = vpop.f32.mrb[9].mxu0 }
 0x4f9   :  { %v3257_v32 = vadd.f32 %v3256_v42, %v3255_v63  ;;  %v3258_v38 = vpop.f32.mrb[10].mxu0  ;;  %v6453_v29 = vadd.f32 %v3318_v55, %v3254_v23 }
 0x4fa   :  { %v3259_v0 = vpop.f32.mrb[11].mxu0 }
 0x4fb   :  { %v3319_v60 = vpop.f32.mrb[8].mxu1  ;;  %v3260_v10 = vadd.f32 %v3259_v0, %v3258_v38 }
 0x4fc   :  { %v3320_v28 = vpop.f32.mrb[9].mxu1 }
 0x4fd   :  { %v3321_v16 = vadd.f32 %v3320_v28, %v3319_v60  ;;  %v3322_v15 = vpop.f32.mrb[10].mxu1 }
 0x4fe   :  { %v3323_v47 = vpop.f32.mrb[11].mxu1 }
 0x4ff   :  { %v3324_v61 = vadd.f32 %v3323_v47, %v3322_v15  ;;  %v3261_v41 = vpop.f32.mrb[12].mxu0  ;;  %v6455_v49 = vadd.f32 %v3321_v16, %v3257_v32 }
 0x500   :  { %v3262_v26 = vpop.f32.mrb[13].mxu0 }
 0x501   :  { %v3263_v20 = vadd.f32 %v3262_v26, %v3261_v41  ;;  %v3264_v54 = vpop.f32.mrb[14].mxu0  ;;  %v6457_v21 = vadd.f32 %v3324_v61, %v3260_v10 }
 0x502   :  { %v3265_v51 = vpop.f32.mrb[15].mxu0 }
 0x503   :  { %v3325_v40 = vpop.f32.mrb[12].mxu1  ;;  %v3266_v39 = vadd.f32 %v3265_v51, %v3264_v54 }
 0x504   :  { %v3326_v46 = vpop.f32.mrb[13].mxu1 }
 0x505   :  { %v3327_v31 = vadd.f32 %v3326_v46, %v3325_v40  ;;  %v3328_v9 = vpop.f32.mrb[14].mxu1 }
 0x506   :  { %v3329_v30 = vpop.f32.mrb[15].mxu1 }
 0x507   :  { %v3330_v57 = vadd.f32 %v3329_v30, %v3328_v9  ;;  %v3267_v13 = vpop.f32.mrb[16].mxu0  ;;  %v6459_v35 = vadd.f32 %v3327_v31, %v3263_v20 }
 0x508   :  { %v3268_v17 = vpop.f32.mrb[17].mxu0 }
 0x509   :  { %v3269_v2 = vadd.f32 %v3268_v17, %v3267_v13  ;;  %v3270_v36 = vpop.f32.mrb[18].mxu0  ;;  %v6461_v50 = vadd.f32 %v3330_v57, %v3266_v39 }
 0x50a   :  { %v3271_v48 = vpop.f32.mrb[19].mxu0 }
 0x50b   :  { %v3331_v3 = vpop.f32.mrb[16].mxu1  ;;  %v3272_v44 = vadd.f32 %v3271_v48, %v3270_v36 }
 0x50c   :  { %v3332_v43 = vpop.f32.mrb[17].mxu1 }
 0x50d   :  { %v3333_v6 = vadd.f32 %v3332_v43, %v3331_v3  ;;  %v3334_v52 = vpop.f32.mrb[18].mxu1 }
 0x50e   :  { %v3335_v25 = vpop.f32.mrb[19].mxu1 }
 0x50f   :  { %v3336_v27 = vadd.f32 %v3335_v25, %v3334_v52  ;;  %v3273_v56 = vpop.f32.mrb[20].mxu0  ;;  %v3032_v33 = vadd.f32 %v3333_v6, %v3269_v2 }
 0x510   :  { %v3274_v22 = vpop.f32.mrb[21].mxu0 }
 0x511   :  { %v3275_v62 = vadd.f32 %v3274_v22, %v3273_v56  ;;  %v3276_v37 = vpop.f32.mrb[22].mxu0  ;;  %v3035_v11 = vadd.f32 %v3336_v27, %v3272_v44 }
 0x512   :  { %v3277_v59 = vpop.f32.mrb[23].mxu0 }
 0x513   :  { %v3337_v45 = vpop.f32.mrb[20].mxu1  ;;  %v3278_v14 = vadd.f32 %v3277_v59, %v3276_v37 }
 0x514   :  { %v3338_v58 = vpop.f32.mrb[21].mxu1 }
 0x515   :  { %v3339_v12 = vadd.f32 %v3338_v58, %v3337_v45  ;;  %v3340_v34 = vpop.f32.mrb[22].mxu1 }
 0x516   :  { %v3341_v53 = vpop.f32.mrb[23].mxu1 }
 0x517   :  { %v3342_v1 = vadd.f32 %v3341_v53, %v3340_v34  ;;  %v3279_v23 = vpop.f32.mrb[24].mxu0  ;;  %v3040_v8 = vadd.f32 %v3339_v12, %v3275_v62 }
 0x518   :  { %v3280_v5 = vpop.f32.mrb[25].mxu0 }
 0x519   :  { %v3281_v18 = vadd.f32 %v3280_v5, %v3279_v23  ;;  %v3282_v4 = vpop.f32.mrb[26].mxu0  ;;  %v3043_v55 = vadd.f32 %v3342_v1, %v3278_v14 }
 0x51a   :  { %v3283_v63 = vpop.f32.mrb[27].mxu0 }
 0x51b   :  { %v3343_v42 = vpop.f32.mrb[24].mxu1  ;;  %v3284_v32 = vadd.f32 %v3283_v63, %v3282_v4 }
 0x51c   :  { %v3344_v38 = vpop.f32.mrb[25].mxu1 }
 0x51d   :  { %v3345_v0 = vadd.f32 %v3344_v38, %v3343_v42  ;;  %v3346_v60 = vpop.f32.mrb[26].mxu1 }
 0x51e   :  { %v3347_v10 = vpop.f32.mrb[27].mxu1 }
 0x51f   :  { %v3285_v28 = vpop.f32.mrb[28].mxu0  ;;  %v3348_v16 = vadd.f32 %v3347_v10, %v3346_v60  ;;  %v3048_v15 = vadd.f32 %v3345_v0, %v3281_v18 }
 0x520   :  { %v3286_v47 = vpop.f32.mrb[29].mxu0 }
 0x521   :  { %v3287_v61 = vadd.f32 %v3286_v47, %v3285_v28  ;;  %v3288_v41 = vpop.f32.mrb[30].mxu0  ;;  %v3051_v26 = vadd.f32 %v3348_v16, %v3284_v32 }
 0x522   :  { %v3289_v20 = vpop.f32.mrb[31].mxu0 }
 0x523   :  { %v3290_v54 = vadd.f32 %v3289_v20, %v3288_v41  ;;  %v3349_v51 = vpop.f32.mrb[28].mxu1 }
 0x524   :  { %v3350_v40 = vpop.f32.mrb[29].mxu1 }
 0x525   :  { %v3351_v39 = vadd.f32 %v3350_v40, %v3349_v51  ;;  %v3352_v46 = vpop.f32.mrb[30].mxu1 }
 0x526   :  { %v3353_v31 = vpop.f32.mrb[31].mxu1 }
 0x527   :  { %v3371_v9 = vpop.f32.mrb[32].mxu0  ;;  %v3354_v30 = vadd.f32 %v3353_v31, %v3352_v46  ;;  %v3056_v57 = vadd.f32 %v3351_v39, %v3287_v61 }
 0x528   :  { %v3105_v13 = vadd.f32 %v3371_v9, %v6451_v24  ;;  %v3096_v17 = vpop.f32.mrb[33].mxu0 }
 0x529   :  { %v3097_v2 = vadd.f32 %v3096_v17, %v6447_v7  ;;  %v3372_v36 = vpop.f32.mrb[34].mxu0  ;;  %v3059_v48 = vadd.f32 %v3354_v30, %v3290_v54 }
 0x52a   :  { %3161 = vst.msk [vmem:[%s6538_s3 + $0x10] sm:$0xff] %vm248_vm0, %v3105_v13  ;;  %v3108_v3 = vadd.f32 %v3372_v36, %v6453_v29  ;;  %v3099_v44 = vpop.f32.mrb[35].mxu0 }
 0x52b   :  { %3159 = vst.msk [vmem:[%s6538_s3] sm:$0xff] %vm248_vm0, %v3097_v2  ;;  %v3100_v24 = vadd.f32 %v3099_v44, %v6449_v19  ;;  %v3379_v43 = vpop.f32.mrb[32].mxu1 }
 0x52c   :  { %3162 = vst.msk [vmem:[%s6538_s3 + $0x18] sm:$0xff] %vm248_vm0, %v3108_v3  ;;  %v3137_v7 = vadd.f32 %v3379_v43, %v3040_v8  ;;  %v3128_v6 = vpop.f32.mrb[33].mxu1 }
 0x52d   :  { %3160 = vst.msk [vmem:[%s6538_s3 + $0x8] sm:$0xff] %vm248_vm0, %v3100_v24  ;;  %v3129_v29 = vadd.f32 %v3128_v6, %v3032_v33  ;;  %v3380_v52 = vpop.f32.mrb[34].mxu1 }
 0x52e   :  { %3169 = vst.msk [vmem:[%s6538_s3 + $0x50] sm:$0xff] %vm248_vm0, %v3137_v7  ;;  %v3140_v19 = vadd.f32 %v3380_v52, %v3043_v55  ;;  %v3131_v25 = vpop.f32.mrb[35].mxu1 }
 0x52f   :  { %3167 = vst.msk [vmem:[%s6538_s3 + $0x40] sm:$0xff] %vm248_vm0, %v3129_v29  ;;  %v3132_v27 = vadd.f32 %v3131_v25, %v3035_v11  ;;  %v3375_v56 = vpop.f32.mrb[36].mxu0 }
 0x530   :  { %3170 = vst.msk [vmem:[%s6538_s3 + $0x58] sm:$0xff] %vm248_vm0, %v3140_v19  ;;  %v3121_v33 = vadd.f32 %v3375_v56, %v6459_v35  ;;  %v3112_v22 = vpop.f32.mrb[37].mxu0 }
 0x531   :  { %3168 = vst.msk [vmem:[%s6538_s3 + $0x48] sm:$0xff] %vm248_vm0, %v3132_v27  ;;  %v3113_v62 = vadd.f32 %v3112_v22, %v6455_v49  ;;  %v3376_v37 = vpop.f32.mrb[38].mxu0 }
 0x532   :  { %3165 = vst.msk [vmem:[%s6538_s3 + $0x30] sm:$0xff] %vm248_vm0, %v3121_v33  ;;  %v3124_v11 = vadd.f32 %v3376_v37, %v6461_v50  ;;  %v3115_v59 = vpop.f32.mrb[39].mxu0 }
 0x533   :  { %3163 = vst.msk [vmem:[%s6538_s3 + $0x20] sm:$0xff] %vm248_vm0, %v3113_v62  ;;  %v3116_v35 = vadd.f32 %v3115_v59, %v6457_v21  ;;  %v3383_v45 = vpop.f32.mrb[36].mxu1 }
 0x534   :  { %3166 = vst.msk [vmem:[%s6538_s3 + $0x38] sm:$0xff] %vm248_vm0, %v3124_v11  ;;  %v3153_v49 = vadd.f32 %v3383_v45, %v3056_v57  ;;  %v3144_v14 = vpop.f32.mrb[37].mxu1 }
 0x535   :  { %3164 = vst.msk [vmem:[%s6538_s3 + $0x28] sm:$0xff] %vm248_vm0, %v3116_v35  ;;  %v3145_v50 = vadd.f32 %v3144_v14, %v3048_v15  ;;  %v3384_v58 = vpop.f32.mrb[38].mxu1 }
 0x536   :  { %3173 = vst.msk [vmem:[%s6538_s3 + $0x70] sm:$0xff] %vm248_vm0, %v3153_v49  ;;  %v3156_v21 = vadd.f32 %v3384_v58, %v3059_v48  ;;  %v3147_v12 = vpop.f32.mrb[39].mxu1 }
 0x537   :  { %3171 = vst.msk [vmem:[%s6538_s3 + $0x60] sm:$0xff] %vm248_vm0, %v3145_v50  ;;  %v3148_v34 = vadd.f32 %v3147_v12, %v3051_v26 }
 0x538   :  { %3174 = vst.msk [vmem:[%s6538_s3 + $0x78] sm:$0xff] %vm248_vm0, %v3156_v21 }
 0x539   :  { %3172 = vst.msk [vmem:[%s6538_s3 + $0x68] sm:$0xff] %vm248_vm0, %v3148_v34 }

</bundles_post_ra>
